<compile_context>
chip_gen: v6e
topology: v6e:2x2x1
jax: 0.10.0
libtpu: 0.0.40
codegen_flags: <defaults>
</compile_context>

<pallas_src>
import functools

import jax
import jax.numpy as jnp
from jax.experimental import pallas as pl
from jax.experimental.pallas import tpu as pltpu


# ----------------------------- small helpers -------------------------------

def _round_up(n, m):
    return ((n + m - 1) // m) * m


def _pad_to(x, shape):
    pads = [(0, t - s) for s, t in zip(x.shape, shape)]
    return jnp.pad(x, pads)


def _l2_normalize(y):
    # torch.nn.functional.normalize(dim=-1): x / max(||x||, 1e-12)
    ss = jnp.sum(y * y, axis=-1, keepdims=True)
    return y * jax.lax.rsqrt(jnp.maximum(ss, 1e-24))


# ------------------------------- the kernel --------------------------------

def combined_kernel(text_ref, img_ref, cw_ref, hw_ref, b_ref, out_ref, *,
                    l2_norm, H, W, Wp, blk_pad, Vp, Cp, Dp):
    B = text_ref.shape[0]
    M = B * blk_pad                               # conv rows (multiple of 8)

    # ---- image branch: 3x3 conv (pad=1) as ONE (M, 9*Cin) @ (9*Cin, Cp) matmul.
    # Each tap (dy, dx) is a static sublane-shifted view of the flattened padded
    # image; lane-concatenating the 9 views builds the fused-K operand (1x data).
    views = []
    for k in range(9):
        off = (k // 3) * Wp + (k % 3)             # tap (dy, dx) row shift
        views.append(img_ref[off:off + M, :])
    xcat = jnp.concatenate(views, axis=-1)                        # (M, 9*Cin) bf16
    conv = jnp.dot(xcat, cw_ref[...], preferred_element_type=jnp.float32)
    feat = jnp.maximum(conv + b_ref[1:2, :Cp], 0.0)               # bias + ReLU, f32

    # ---- global average pool: in-kernel mask (iota), one multiply, one
    # sublane-sum reduce.  mask = 1/(H*W) on valid anchor rows, 0 on junk rows;
    # float floor-div keeps the index math off the integer-divide path.
    p = jax.lax.broadcasted_iota(jnp.int32, (blk_pad, 1), 0).astype(jnp.float32)
    py = jnp.floor(p / Wp)
    px = p - py * Wp
    mask = jnp.where(jnp.logical_and(py < H, px < W), 1.0 / (H * W), 0.0)
    pooled = jnp.sum(feat.reshape(B, blk_pad, Cp) * mask, axis=1)  # (B, Cp) f32

    # ---- heads: text Linear and image projection Linear (two tiny matmuls;
    # bf16 MXU operands, f32 accumulation, f32 bias add).
    yt = jnp.dot(text_ref[...], hw_ref[0:Vp, :],
                 preferred_element_type=jnp.float32) + b_ref[0:1, :Dp]
    yi = jnp.dot(pooled.astype(jnp.bfloat16), hw_ref[Vp:Vp + Cp, :],
                 preferred_element_type=jnp.float32) + b_ref[2:3, :Dp]

    if l2_norm:
        yt = _l2_normalize(yt)
        yi = _l2_normalize(yi)

    # lane-dense (2B, Dp) slab: rows [0:B] = text, rows [B:2B] = image.
    out_ref[0:B, :] = yt.astype(out_ref.dtype)
    out_ref[B:2 * B, :] = yi.astype(out_ref.dtype)


# ------------------------------ glue wrapper --------------------------------

def combined_model(text_input, image_input, params, *, l2_norm=False):
    B, V = text_input.shape
    _, Cin, H, W = image_input.shape
    D = params["text_w"].shape[1]
    Cout = params["conv_w"].shape[-1]

    Dp = _round_up(D, 128)               # lane-dense embedding dim
    Cp = _round_up(Cout, 128)            # lane-dense conv channel dim
    BP = max(Cp, Dp)
    Vp = _round_up(V, 16)                # bf16 sublane tile -> aligned hw slices
    Wp = W + 2                           # padded image row width
    blk_raw = (H + 3) * Wp               # flattened (padded) pixels per image
    blk_pad = _round_up(blk_raw, 8)      # 8-aligned per-image block
    M = B * blk_pad
    n_rows = _round_up(M + 2 * Wp + 2, 8)   # room for the largest tap shift

    # --- parameters: lane-dense zero padding, bf16 MXU operands, packed heads ---
    tw = _pad_to(params["text_w"], (Vp, Dp)).astype(jnp.bfloat16)
    pw = _pad_to(params["proj_w"], (Cp, Dp)).astype(jnp.bfloat16)
    hw = jnp.concatenate([tw, pw], axis=0)                          # (Vp+Cp, Dp)
    cw = _pad_to(params["conv_w"].reshape(9 * Cin, Cout),
                 (9 * Cin, Cp)).astype(jnp.bfloat16)                # (9*Cin, Cp)
    bias = jnp.zeros((3, BP), jnp.float32)                          # [tb; cb; pb]
    bias = bias.at[0, :D].set(params["text_b"][0].astype(jnp.float32))
    bias = bias.at[1, :Cout].set(params["conv_b"][0].astype(jnp.float32))
    bias = bias.at[2, :D].set(params["proj_b"][0].astype(jnp.float32))

    # --- activations: bf16 on the wire, image flattened & sublane-aligned ---
    text = _pad_to(text_input, (B, Vp)).astype(jnp.bfloat16)
    x = jnp.transpose(image_input, (0, 2, 3, 1))                    # NCHW -> NHWC
    xp = jnp.pad(x, ((0, 0), (1, 2), (1, 1), (0, 0)))               # (B, H+3, Wp, Cin)
    xf = jnp.pad(xp.reshape(B, blk_raw, Cin),
                 ((0, 0), (0, blk_pad - blk_raw), (0, 0)))          # 8-aligned block
    ximg = jnp.pad(xf.reshape(M, Cin),
                   ((0, n_rows - M), (0, 0))).astype(jnp.bfloat16)  # (n_rows, Cin)

    # VMEM budget from the actual footprint: tile-padded explicit buffers plus a
    # handful of (M, Cp)-sized f32 intermediates the kernel keeps live, with
    # headroom; capped well under v7x's 64 MiB physical VMEM.
    def tile_bytes(a):
        sub = 32 // a.dtype.itemsize
        return (_round_up(a.shape[0], sub) * _round_up(a.shape[1], 128)
                * a.dtype.itemsize)
    io_bytes = sum(tile_bytes(a) for a in (text, ximg, cw, hw, bias)) + 2 * B * Dp * 4
    interm_bytes = 6 * M * Cp * 4
    vmem_limit = int(min(64 << 20, 2 * io_bytes + 2 * interm_bytes + (4 << 20)))

    kernel = functools.partial(combined_kernel, l2_norm=l2_norm, H=H, W=W,
                               Wp=Wp, blk_pad=blk_pad, Vp=Vp, Cp=Cp, Dp=Dp)
    # TODO(synk): production sizes need a grid (PrefetchScalarGridSpec) with the
    # batch/N axes "parallel" (v7x megacore) and the vocab-K axis "arbitrary"
    # over an f32 VMEM accumulator; one grid step is enough at these shapes.
    out = pl.pallas_call(
        kernel,
        out_shape=jax.ShapeDtypeStruct((2 * B, Dp), jnp.float32),
        in_specs=[pl.BlockSpec(memory_space=pltpu.MemorySpace.VMEM)] * 5,
        out_specs=pl.BlockSpec(memory_space=pltpu.MemorySpace.VMEM),
        compiler_params=pltpu.CompilerParams(vmem_limit_bytes=vmem_limit),
    )(text, ximg, cw, hw, bias)

    # layout plumbing only: strip the lane padding and split the fused slab.
    return out[:B, :D], out[B:2 * B, :D]


# --------------------------- pure-JAX reference ------------------------------

def reference_model(text_input, image_input, params, *, l2_norm=False):
    yt = text_input @ params["text_w"] + params["text_b"]
    x = jnp.transpose(image_input, (0, 2, 3, 1))
    conv = jax.lax.conv_general_dilated(
        x, params["conv_w"], window_strides=(1, 1), padding="SAME",
        dimension_numbers=("NHWC", "HWIO", "NHWC"))
    feat = jnp.maximum(conv + params["conv_b"].reshape(1, 1, 1, -1), 0.0)
    pooled = jnp.mean(feat, axis=(1, 2))
    yi = pooled @ params["proj_w"] + params["proj_b"]
    if l2_norm:
        yt = yt / jnp.maximum(jnp.linalg.norm(yt, axis=-1, keepdims=True), 1e-12)
        yi = yi / jnp.maximum(jnp.linalg.norm(yi, axis=-1, keepdims=True), 1e-12)
    return yt, yi


# ---------------------------------- main ------------------------------------

if __name__ == "__main__":
    B = 2
    VOCAB = 32        # vocab_dim
    EMBED = 32        # shared embedding dim
    CIN, H, W = 4, 16, 16
    COUT = 8
    L2_NORM = True

    key = jax.random.PRNGKey(0)
    k = jax.random.split(key, 8)

    # deterministic synthetic parameters (no checkpoint load)
    params = {
        "text_w": 0.05 * jax.random.normal(k[0], (VOCAB, EMBED), jnp.float32),
        "text_b": 0.01 * jax.random.normal(k[1], (1, EMBED), jnp.float32),
        "conv_w": 0.10 * jax.random.normal(k[2], (3, 3, CIN, COUT), jnp.float32),
        "conv_b": 0.01 * jax.random.normal(k[3], (1, COUT), jnp.float32),
        "proj_w": 0.05 * jax.random.normal(k[4], (COUT, EMBED), jnp.float32),
        "proj_b": 0.01 * jax.random.normal(k[5], (1, EMBED), jnp.float32),
    }

    # inputs: text = bag-of-words-like dense vector, image = NCHW (PyTorch layout)
    text_input = jax.random.normal(k[6], (B, VOCAB), jnp.float32)
    image_input = jax.random.normal(k[7], (B, CIN, H, W), jnp.float32)

    text_out, image_out = combined_model(text_input, image_input, params,
                                         l2_norm=L2_NORM)
    jax.block_until_ready((text_out, image_out))
    assert text_out.shape == (B, EMBED)
    assert image_out.shape == (B, EMBED)

    # correctness vs pure-JAX f32 reference (bf16 MXU operands -> loose tolerance)
    ref_t, ref_i = reference_model(text_input, image_input, params, l2_norm=L2_NORM)
    assert jnp.allclose(text_out, ref_t, atol=0.02, rtol=0.05)
    assert jnp.allclose(image_out, ref_i, atol=0.02, rtol=0.05)

    print("KERNEL_OK")
</pallas_src>

<mosaic_0001>
module attributes {stable_mosaic.version = 11 : i64} {
  func.func @combined_kernel(%arg0: memref<2x32xbf16, #tpu.memory_space<vmem>>, %arg1: memref<728x4xbf16, #tpu.memory_space<vmem>>, %arg2: memref<36x128xbf16, #tpu.memory_space<vmem>>, %arg3: memref<160x128xbf16, #tpu.memory_space<vmem>>, %arg4: memref<3x128xf32, #tpu.memory_space<vmem>>, %arg5: memref<4x128xf32, #tpu.memory_space<vmem>>) attributes {dimension_semantics = [], scalar_prefetch = 0 : i64, scratch_operands = 0 : i64, tpu.core_type = #tpu.core_type<tc>} {
    %c0 = arith.constant 0 : index
    %c0_0 = arith.constant 0 : index
    %0 = vector.load %arg1[%c0, %c0_0] : memref<728x4xbf16, #tpu.memory_space<vmem>>, vector<688x4xbf16>
    %c1 = arith.constant 1 : index
    %c0_1 = arith.constant 0 : index
    %1 = vector.load %arg1[%c1, %c0_1] : memref<728x4xbf16, #tpu.memory_space<vmem>>, vector<688x4xbf16>
    %c2 = arith.constant 2 : index
    %c0_2 = arith.constant 0 : index
    %2 = vector.load %arg1[%c2, %c0_2] : memref<728x4xbf16, #tpu.memory_space<vmem>>, vector<688x4xbf16>
    %c18 = arith.constant 18 : index
    %c0_3 = arith.constant 0 : index
    %3 = vector.load %arg1[%c18, %c0_3] : memref<728x4xbf16, #tpu.memory_space<vmem>>, vector<688x4xbf16>
    %c19 = arith.constant 19 : index
    %c0_4 = arith.constant 0 : index
    %4 = vector.load %arg1[%c19, %c0_4] : memref<728x4xbf16, #tpu.memory_space<vmem>>, vector<688x4xbf16>
    %c20 = arith.constant 20 : index
    %c0_5 = arith.constant 0 : index
    %5 = vector.load %arg1[%c20, %c0_5] : memref<728x4xbf16, #tpu.memory_space<vmem>>, vector<688x4xbf16>
    %c36 = arith.constant 36 : index
    %c0_6 = arith.constant 0 : index
    %6 = vector.load %arg1[%c36, %c0_6] : memref<728x4xbf16, #tpu.memory_space<vmem>>, vector<688x4xbf16>
    %c37 = arith.constant 37 : index
    %c0_7 = arith.constant 0 : index
    %7 = vector.load %arg1[%c37, %c0_7] : memref<728x4xbf16, #tpu.memory_space<vmem>>, vector<688x4xbf16>
    %c38 = arith.constant 38 : index
    %c0_8 = arith.constant 0 : index
    %8 = vector.load %arg1[%c38, %c0_8] : memref<728x4xbf16, #tpu.memory_space<vmem>>, vector<688x4xbf16>
    %9 = tpu.concatenate %0, %1, %2, %3, %4, %5, %6, %7, %8 in 1 : vector<688x4xbf16>, vector<688x4xbf16>, vector<688x4xbf16>, vector<688x4xbf16>, vector<688x4xbf16>, vector<688x4xbf16>, vector<688x4xbf16>, vector<688x4xbf16>, vector<688x4xbf16> -> vector<688x36xbf16>
    %c0_9 = arith.constant 0 : index
    %c0_10 = arith.constant 0 : index
    %10 = vector.load %arg2[%c0_9, %c0_10] : memref<36x128xbf16, #tpu.memory_space<vmem>>, vector<36x128xbf16>
    %cst = arith.constant dense<0.000000e+00> : vector<688x128xf32>
    %11 = tpu.matmul %9, %10, %cst {dimension_numbers = #tpu.dot_dimension_numbers<[1], [0], [0], [1], [0, 0, 1, 1], [], []>} : vector<688x36xbf16>, vector<36x128xbf16>, vector<688x128xf32> -> vector<688x128xf32>
    %c1_11 = arith.constant 1 : index
    %c0_12 = arith.constant 0 : index
    %12 = vector.load %arg4[%c1_11, %c0_12] : memref<3x128xf32, #tpu.memory_space<vmem>>, vector<1x128xf32>
    %13 = vector.broadcast %12 : vector<1x128xf32> to vector<688x128xf32>
    %14 = arith.addf %11, %13 : vector<688x128xf32>
    %cst_13 = arith.constant 0.000000e+00 : f32
    %15 = vector.broadcast %cst_13 : f32 to vector<688x128xf32>
    %16 = arith.maximumf %14, %15 : vector<688x128xf32>
    %17 = tpu.iota {dimensions = array<i32: 0>} : vector<344x1xi32>
    %18 = arith.sitofp %17 : vector<344x1xi32> to vector<344x1xf32>
    %cst_14 = arith.constant 1.800000e+01 : f32
    %19 = vector.broadcast %cst_14 : f32 to vector<344x1xf32>
    %20 = arith.divf %18, %19 : vector<344x1xf32>
    %21 = math.floor %20 : vector<344x1xf32>
    %cst_15 = arith.constant 1.800000e+01 : f32
    %22 = vector.broadcast %cst_15 : f32 to vector<344x1xf32>
    %23 = arith.mulf %21, %22 : vector<344x1xf32>
    %24 = arith.subf %18, %23 : vector<344x1xf32>
    %cst_16 = arith.constant 1.600000e+01 : f32
    %25 = vector.broadcast %cst_16 : f32 to vector<344x1xf32>
    %26 = arith.cmpf olt, %21, %25 : vector<344x1xf32>
    %cst_17 = arith.constant 1.600000e+01 : f32
    %27 = vector.broadcast %cst_17 : f32 to vector<344x1xf32>
    %28 = arith.cmpf olt, %24, %27 : vector<344x1xf32>
    %29 = arith.andi %26, %28 : vector<344x1xi1>
    %cst_18 = arith.constant 3.906250e-03 : f32
    %cst_19 = arith.constant 0.000000e+00 : f32
    %30 = vector.broadcast %cst_18 : f32 to vector<344x1xf32>
    %31 = vector.broadcast %cst_19 : f32 to vector<344x1xf32>
    %32 = arith.select %29, %30, %31 : vector<344x1xi1>, vector<344x1xf32>
    %33 = vector.shape_cast %16 : vector<688x128xf32> to vector<2x344x128xf32>
    %34 = vector.shape_cast %32 : vector<344x1xf32> to vector<1x344x1xf32>
    %35 = vector.broadcast %34 : vector<1x344x1xf32> to vector<2x344x128xf32>
    %36 = arith.mulf %33, %35 : vector<2x344x128xf32>
    %cst_20 = arith.constant dense<0.000000e+00> : vector<2x128xf32>
    %37 = vector.multi_reduction <add>, %36, %cst_20 [1] : vector<2x344x128xf32> to vector<2x128xf32>
    %c0_21 = arith.constant 0 : index
    %c0_22 = arith.constant 0 : index
    %38 = vector.load %arg0[%c0_21, %c0_22] : memref<2x32xbf16, #tpu.memory_space<vmem>>, vector<2x32xbf16>
    %c0_23 = arith.constant 0 : index
    %c0_24 = arith.constant 0 : index
    %39 = vector.load %arg3[%c0_23, %c0_24] : memref<160x128xbf16, #tpu.memory_space<vmem>>, vector<32x128xbf16>
    %cst_25 = arith.constant dense<0.000000e+00> : vector<2x128xf32>
    %40 = tpu.matmul %38, %39, %cst_25 {dimension_numbers = #tpu.dot_dimension_numbers<[1], [0], [0], [1], [0, 0, 1, 1], [], []>} : vector<2x32xbf16>, vector<32x128xbf16>, vector<2x128xf32> -> vector<2x128xf32>
    %c0_26 = arith.constant 0 : index
    %c0_27 = arith.constant 0 : index
    %41 = vector.load %arg4[%c0_26, %c0_27] : memref<3x128xf32, #tpu.memory_space<vmem>>, vector<1x128xf32>
    %42 = vector.broadcast %41 : vector<1x128xf32> to vector<2x128xf32>
    %43 = arith.addf %40, %42 : vector<2x128xf32>
    %44 = arith.truncf %37 : vector<2x128xf32> to vector<2x128xbf16>
    %c32 = arith.constant 32 : index
    %c0_28 = arith.constant 0 : index
    %45 = vector.load %arg3[%c32, %c0_28] : memref<160x128xbf16, #tpu.memory_space<vmem>>, vector<128x128xbf16>
    %cst_29 = arith.constant dense<0.000000e+00> : vector<2x128xf32>
    %46 = tpu.matmul %44, %45, %cst_29 {dimension_numbers = #tpu.dot_dimension_numbers<[1], [0], [0], [1], [0, 0, 1, 1], [], []>} : vector<2x128xbf16>, vector<128x128xbf16>, vector<2x128xf32> -> vector<2x128xf32>
    %c2_30 = arith.constant 2 : index
    %c0_31 = arith.constant 0 : index
    %47 = vector.load %arg4[%c2_30, %c0_31] : memref<3x128xf32, #tpu.memory_space<vmem>>, vector<1x128xf32>
    %48 = vector.broadcast %47 : vector<1x128xf32> to vector<2x128xf32>
    %49 = arith.addf %46, %48 : vector<2x128xf32>
    %50 = arith.mulf %43, %43 : vector<2x128xf32>
    %cst_32 = arith.constant dense<0.000000e+00> : vector<2xf32>
    %51 = vector.multi_reduction <add>, %50, %cst_32 [1] : vector<2x128xf32> to vector<2xf32>
    %52 = vector.shape_cast %51 : vector<2xf32> to vector<2x1xf32>
    %cst_33 = arith.constant 1.000000e-24 : f32
    %53 = vector.broadcast %cst_33 : f32 to vector<2x1xf32>
    %54 = arith.maximumf %52, %53 : vector<2x1xf32>
    %55 = math.rsqrt %54 : vector<2x1xf32>
    %56 = vector.broadcast %55 : vector<2x1xf32> to vector<2x128xf32>
    %57 = arith.mulf %43, %56 : vector<2x128xf32>
    %58 = arith.mulf %49, %49 : vector<2x128xf32>
    %cst_34 = arith.constant dense<0.000000e+00> : vector<2xf32>
    %59 = vector.multi_reduction <add>, %58, %cst_34 [1] : vector<2x128xf32> to vector<2xf32>
    %60 = vector.shape_cast %59 : vector<2xf32> to vector<2x1xf32>
    %cst_35 = arith.constant 1.000000e-24 : f32
    %61 = vector.broadcast %cst_35 : f32 to vector<2x1xf32>
    %62 = arith.maximumf %60, %61 : vector<2x1xf32>
    %63 = math.rsqrt %62 : vector<2x1xf32>
    %64 = vector.broadcast %63 : vector<2x1xf32> to vector<2x128xf32>
    %65 = arith.mulf %49, %64 : vector<2x128xf32>
    %c0_36 = arith.constant 0 : index
    %c0_37 = arith.constant 0 : index
    %66 = vector.load %arg5[%c0_36, %c0_37] : memref<4x128xf32, #tpu.memory_space<vmem>>, vector<2x128xf32>
    tpu.vector_store %arg5[%c0_36, %c0_37], %57 {strides = array<i32>} : memref<4x128xf32, #tpu.memory_space<vmem>>, vector<2x128xf32>,
    %c2_38 = arith.constant 2 : index
    %c0_39 = arith.constant 0 : index
    %67 = vector.load %arg5[%c2_38, %c0_39] : memref<4x128xf32, #tpu.memory_space<vmem>>, vector<2x128xf32>
    tpu.vector_store %arg5[%c2_38, %c0_39], %65 {strides = array<i32>} : memref<4x128xf32, #tpu.memory_space<vmem>>, vector<2x128xf32>,
    return
  }
}

</mosaic_0001>

<bundles_post_ra>
// kernel: tpu_custom_call.1
= control target key start
LH: loop header
LB: loop body
LE: loop exit
PB: predicated region body
PF: predicated region fallthrough
CT: control target
= control target key end

     0   :  { %vm8968_vm0 = vcmask 1046528   ;;  %vm9039_vm1 = vcmask 1045504   ;;  %s4700_s15 = smov 12   ;;  %s4701_s16 = smov 8   ;;  %vm8970_vm2 = vsmask.f32 6400  ;;  %s8954_s0 = inlined_call_operand.vmem [shape: bf16[2,32], index: 0, kind: input, shape index: {}]   ;;  %s8955_s1 = inlined_call_operand.vmem [shape: bf16[728,4], index: 1, kind: input, shape index: {}]   ;;  %s8956_s2 = inlined_call_operand.vmem [shape: bf16[36,128], index: 2, kind: input, shape index: {}]   ;;  %s8957_s3 = inlined_call_operand.vmem [shape: bf16[160,128], index: 3, kind: input, shape index: {}]   ;;  %s8958_s4 = inlined_call_operand.vmem [shape: f32[3,128], index: 4, kind: input, shape index: {}]   ;;  %s8959_s5 = inlined_call_operand.hbm [shape: f32[4,128], index: 5, kind: output, shape index: {}]  }
   0x1   :  { %v25_v0 = vld [vmem:[%s8955_s1 + $0xc] sm:$0xf]  ;;  %v26_v1 = vld [vmem:[%s8955_s1 + $0x10] sm:$0xf]  ;;  %v27_v2 = vld [vmem:[%s8955_s1 + $0x14] sm:$0xf] }
   0x2   :  { %v110_v3 = vld [vmem:[%s8955_s1 + $0x8] sm:$0xe]  ;;  %v4753_v4 = vcombine.low %v26_v1, %v27_v2  ;;  %v23_v5 = vld [vmem:[%s8955_s1 + $0x4] sm:$0xf]  ;;  %v109_v8 = vld [vmem:[%s8955_s1] sm:$0xe] }
   0x3   :  { %v4220_v6 = vcombine.low %v110_v3, %v25_v0  ;;  %v24_v7 = vld [vmem:[%s8955_s1 + $0x8] sm:$0xf]  ;;  %v4767_v9 = vld [vmem:[%s8955_s1 + $0x18] sm:$0xff]   ;;  %v4219_v12 = vcombine.low %v109_v8, %v23_v5  ;;  %v22_v13 = vld [vmem:[%s8955_s1] sm:$0xf]  ;;  %s4702_s19 = smov 24  }
   0x4   :  { %v4770_v10 = vrot.slane %v4753_v4, 1  ;;  %v4772_v11 = vcombine.low %v24_v7, %v25_v0  ;;  %v4777_v15 = vcombine.low %v22_v13, %v23_v5  ;;  %v116_v16 = vld [vmem:[%s8955_s1 + $0x10] sm:$0xc]  ;;  %v4783_v17 = vrot.slane %v4767_v9, 2  ;;  %v115_v21 = vld [vmem:[%s8955_s1 + $0x8] sm:$0xc] }
   0x5   :  { %v963_v14 = vrot.slane %v4220_v6, 1  ;;  %v779_v18 = vrot.slane %v4219_v12, 1  ;;  %v4225_v20 = vcombine.low %v116_v16, %v27_v2  ;;  %v1340_v22 = vrot.slane %v4753_v4, 2  ;;  %v121_v34 = vld [vmem:[%s8955_s1 + $0x10] sm:$0x8]  ;;  %s4703_s20 = smov 20  }
   0x6   :  { %v780_v19 = vrot.slane %v4772_v11, 1  ;;  %v4224_v24 = vcombine.low %v115_v21, %v25_v0  ;;  %v357_v25 = vshll.u32 %v4753_v4, 16  ;;  %v361_v26 = vshrl.u32 %v4753_v4, 16  ;;  %s4704_s21 = smov 16   ;;  %s4705_s22 = smov 4   ;;  %v4834_v5 = vld [vmem:[%s8955_s1 + $0x20] sm:$0xff]  }
   0x7   :  { %v964_v23 = vsel %vm8968_vm0, %v963_v14, %v4770_v10  ;;  %v1523_v28 = vrot.slane %v4225_v20, 2  ;;  %v1060_v29 = vshrl.u32 %v4220_v6, 16  ;;  %v1063_v31 = vshll.u32 %v4220_v6, 16  ;;  %s4706_s25 = smov 32   ;;  %s4707_s26 = smov 28  }
   0x8   :  { %969 = vrot.lane.b32.xlu1 %v964_v23, %s4700_s15  ;;  %v781_v27 = vsel %vm8968_vm0, %v779_v18, %v780_v19  ;;  %v1339_v30 = vrot.slane %v4224_v24, 2  ;;  %v1067_v32 = vrot.slane %v361_v26, 1  ;;  %v1068_v33 = vrot.slane %v357_v25, 2 }
   0x9   :  { %866 = vrot.lane.b32.xlu0 %v781_v27, %s4701_s16  ;;  %v1524_v35 = vsel %vm9039_vm1, %v1523_v28, %v4783_v17  ;;  %v1062_v36 = vrot.slane %v1060_v29, 1  ;;  %v342_v37 = vshrl.u32 %v4777_v15, 16  ;;  %v1065_v39 = vrot.slane %v1063_v31, 2 }
   0xa   :  { %v1341_v38 = vsel %vm9039_vm1, %v1339_v30, %v1340_v22  ;;  %v1069_v40 = vor.u32 %v1068_v33, %v1067_v32  ;;  %v344_v41 = vshll.u32 %v4777_v15, 16  ;;  %vm340_vm3 = vsmask.f32 7424 }
   0xb   :  { %v349_v42 = vshll.u32 %v4772_v11, 16  ;;  %v4229_v43 = vcombine.low %v121_v34, %v27_v2  ;;  %v1900_v44 = vrot.slane %v4767_v9, 3  ;;  %v1066_v45 = vor.u32 %v1065_v39, %v1062_v36 }
   0xc   :  { %1529 = vrot.lane.b32.xlu1 %v1524_v35, %s4702_s19  ;;  %v346_v46 = vrot.slane %v344_v41, 1  ;;  %v4816_v47 = vshll.u32 %v4767_v9, 16  ;;  %v4819_v48 = vshrl.u32 %v4767_v9, 16  ;;  %vm8969_vm4 = vcmask 1044480  }
   0xd   :  { %1426 = vrot.lane.b32.xlu0 %v1341_v38, %s4703_s20  ;;  %v351_v49 = vrot.slane %v349_v42, 1  ;;  %v1899_v50 = vrot.slane %v4229_v43, 3  ;;  %v1620_v51 = vshrl.u32 %v4225_v20, 16  ;;  %v1070_v52 = vsel %vm8970_vm2, %v1066_v45, %v1069_v40  ;;  %v4586_v41 = vld [vmem:[%s8956_s2 + $0x10] ss:$0 sps:$4 sm:$0x33]  }
   0xe   :  { %v347_v53 = vor.u32 %v346_v46, %v342_v37  ;;  %v1623_v54 = vshll.u32 %v4225_v20, 16  ;;  %v1627_v55 = vrot.slane %v4819_v48, 2  ;;  %v1628_v57 = vrot.slane %v4816_v47, 3 }
   0xf   :  { %v1622_v56 = vrot.slane %v1620_v51, 2  ;;  %v1901_v59 = vsel %vm8969_vm4, %v1899_v50, %v1900_v44  ;;  %v353_v61 = vshrl.u32 %v4772_v11, 16  ;;  %vm1618_vm5 = vsmask.f32 5376  ;;  %v4588_v51 = vld [vmem:[%s8956_s2 + $0x8] sm:$0xff]  }
  0x10   :  { %1249 = vrot.lane.b32.xlu1 %v1070_v52, %s4704_s21  ;;  %v352_v58 = vsel %vm340_vm3, %v347_v53, %v351_v49  ;;  %v1625_v60 = vrot.slane %v1623_v54, 3  ;;  %v1629_v62 = vor.u32 %v1628_v57, %v1627_v55  ;;  %v1071_v63 = vrot.slane %v4819_v48, 1  ;;  %v4923_v55 = vld [vmem:[%s8955_s1 + $0x30] sm:$0xff]  }
  0x11   :  { %689 = vrot.lane.b32.xlu0 %v352_v58, %s4705_s22  ;;  %v1072_v0 = vrot.slane %v4816_v47, 2  ;;  %v355_v2 = vor.u32 %v353_v61, %v351_v49  ;;  %v359_v3 = vrot.slane %v357_v25, 1  ;;  %v783_v7 = vsel %vm8968_vm0, %v780_v19, %v4770_v10 }
  0x12   :  { %v1626_v1 = vor.u32 %v1625_v60, %v1622_v56  ;;  %v784_v13 = vrot.slane %v4767_v9, 1  ;;  %v4846_v14 = vshll.u32 %v4834_v5, 16  ;;  %v4849_v16 = vshrl.u32 %v4834_v5, 16 }
  0x13   :  { %v1073_v8 = vor.u32 %v1072_v0, %v1071_v63  ;;  %v360_v12 = vsel %vm340_vm3, %v355_v2, %v359_v3  ;;  %v1344_v19 = vrot.slane %v4834_v5, 2  ;;  %v1902_v24 = vrot.slane %v4834_v5, 3 }
  0x14   :  { %1986 = vrot.lane.b32.xlu1 %v1901_v59, %s4706_s25  ;;  %v1630_v6 = vsel %vm1618_vm5, %v1626_v1, %v1629_v62  ;;  %v785_v20 = vsel %vm8968_vm0, %v4770_v10, %v784_v13  ;;  %v1631_v21 = vrot.slane %v4849_v16, 2  ;;  %v1632_v9 = vrot.slane %v4846_v14, 3 }
  0x15   :  { %1809 = vrot.lane.b32.xlu0 %v1630_v6, %s4707_s26  ;;  %v1074_v18 = vsel %vm8970_vm2, %v1069_v40, %v1073_v8  ;;  %v1345_v23 = vsel %vm9039_vm1, %v4783_v17, %v1344_v19  ;;  %v1343_v25 = vsel %vm9039_vm1, %v1340_v22, %v4783_v17  ;;  %v1903_v10 = vsel %vm8969_vm4, %v1900_v44, %v1902_v24  ;;  %v4880_v17 = vld [vmem:[%s8955_s1 + $0x28] sm:$0xff]  }
  0x16   :  { %v1633_v27 = vor.u32 %v1632_v9, %v1631_v21  ;;  %v1075_v28 = vrot.slane %v4849_v16, 1  ;;  %v1076_v29 = vrot.slane %v4846_v14, 2  ;;  %v363_v31 = vor.u32 %v361_v26, %v359_v3 }
  0x17   :  { %v367_v32 = vrot.slane %v4816_v47, 1  ;;  %v786_v33 = vrot.slane %v4834_v5, 1  ;;  %v4887_v35 = vshll.u32 %v4880_v17, 16  ;;  %v4890_v26 = vshrl.u32 %v4880_v17, 16 }
  0x18   :  { %868 = vrot.lane.b32.xlu1 %v783_v7, %s4701_s16  ;;  %v1634_v30 = vsel %vm1618_vm5, %v1629_v62, %v1633_v27  ;;  %v1077_v22 = vor.u32 %v1076_v29, %v1075_v28  ;;  %v1346_v37 = vrot.slane %v4880_v17, 2  ;;  %v1904_v43 = vrot.slane %v4880_v17, 3 }
  0x19   :  { %691 = vrot.lane.b32.xlu0 %v360_v12, %s4705_s22  ;;  %v368_v34 = vsel %vm340_vm3, %v363_v31, %v367_v32  ;;  %v787_v38 = vsel %vm8968_vm0, %v784_v13, %v786_v33  ;;  %v1635_v39 = vrot.slane %v4890_v26, 2  ;;  %v1636_v40 = vrot.slane %v4887_v35, 3 }
  0x1a   :  { %v1078_v36 = vsel %vm8970_vm2, %v1073_v8, %v1077_v22  ;;  %v1347_v42 = vsel %vm9039_vm1, %v1344_v19, %v1346_v37  ;;  %v1079_v45 = vrot.slane %v4890_v26, 1  ;;  %vm8960_vm6 = vcmask 1041408  }
  0x1b   :  { %v1637_v44 = vor.u32 %v1636_v40, %v1635_v39  ;;  %v1905_v46 = vsel %vm8969_vm4, %v1902_v24, %v1904_v43  ;;  %v1080_v47 = vrot.slane %v4887_v35, 2  ;;  %v8978_v49 = vmov 0.0  }
  0x1c   :  { %1251 = vrot.lane.b32.xlu1 %v1074_v18, %s4704_s21  ;;  %4348 = vmatprep.subr.bf16.mxu0 %v8978_v49  ;;  %v2882_v50 = vsel %vm8960_vm6, %v4586_v41, 0  ;;  %v371_v53 = vor.u32 %v4819_v48, %v367_v32  ;;  %v375_v54 = vrot.slane %v4846_v14, 1  ;;  %v4589_v48 = vld [vmem:[%s8956_s2] sm:$0xff]   ;;  %v788_v58 = vrot.slane %v4880_v17, 1  ;;  %v4967_v14 = vld [vmem:[%s8955_s1 + $0x38] sm:$0xff]  }
  0x1d   :  { %971 = vrot.lane.b32.xlu0 %v785_v20, %s4700_s15  ;;  %4554 = vmatprep.subr.bf16.mxu1 %v8978_v49  ;;  %v1638_v52 = vsel %vm1618_vm5, %v1633_v27, %v1637_v44  ;;  %v1081_v56 = vor.u32 %v1080_v47, %v1079_v45  ;;  %v4935_v59 = vshll.u32 %v4923_v55, 16  ;;  %v4938_v60 = vshrl.u32 %v4923_v55, 16 }
  0x1e   :  { %4349 = vmatpush3.bf16.msra.mxu0 %v2882_v50  ;;  %4557 = vmatpush3.bf16.msra.mxu1 %v2882_v50  ;;  %v376_v57 = vsel %vm340_vm3, %v371_v53, %v375_v54  ;;  %vm4709_vm7 = vmmov 0   ;;  %v1348_v62 = vrot.slane %v4923_v55, 2  ;;  %v789_v63 = vsel %vm8968_vm0, %v786_v33, %v788_v58 }
  0x1f   :  { %4350 = vmatprep.subr.bf16.mxu0 %v8978_v49  ;;  %4555 = vmatprep.subr.bf16.mxu1 %v8978_v49  ;;  %v1082_v61 = vsel %vm8970_vm2, %v1077_v22, %v1081_v56  ;;  %v1639_v0 = vrot.slane %v4938_v60, 2  ;;  %v1640_v1 = vrot.slane %v4935_v59, 3  ;;  %v1906_v3 = vrot.slane %v4923_v55, 3 }
  0x20   :  { %1531 = vrot.lane.b32.xlu1 %v1345_v23, %s4702_s19  ;;  %4354 = vmatprep.mubr.msk.bf16.mxu0 %vm4709_vm7, %v8978_v49  ;;  %v1349_v2 = vsel %vm9039_vm1, %v1346_v37, %v1348_v62  ;;  %v1083_v8 = vrot.slane %v4938_v60, 1  ;;  %v1084_v12 = vrot.slane %v4935_v59, 2  ;;  %v383_v13 = vrot.slane %v4887_v35, 1 }
  0x21   :  { %1428 = vrot.lane.b32.xlu0 %v1343_v25, %s4703_s20  ;;  %4450 = vmatprep.mubr.msk.bf16.mxu1 %vm4709_vm7, %v8978_v49  ;;  %v1641_v6 = vor.u32 %v1640_v1, %v1639_v0  ;;  %v1907_v7 = vsel %vm8969_vm4, %v1904_v43, %v1906_v3  ;;  %v379_v19 = vor.u32 %v4849_v16, %v375_v54  ;;  %v790_v21 = vrot.slane %v4923_v55, 1 }
  0x22   :  { %4351 = vmatpush3.bf16.msra.mxu0 %v4588_v51  ;;  %4558 = vmatpush3.bf16.msra.mxu1 %v4588_v51  ;;  %v4979_v24 = vshrl.u32 %v4967_v14, 16  ;;  %v1350_v16 = vrot.slane %v4967_v14, 2 }
  0x23   :  { %4352 = vmatprep.subr.bf16.mxu0 %v8978_v49  ;;  %4556 = vmatprep.subr.bf16.mxu1 %v8978_v49  ;;  %v1642_v18 = vsel %vm1618_vm5, %v1637_v44, %v1641_v6  ;;  %v384_v9 = vsel %vm340_vm3, %v379_v19, %v383_v13  ;;  %v791_v27 = vsel %vm8968_vm0, %v788_v58, %v790_v21 }
  0x24   :  { %1988 = vrot.lane.b32.xlu1 %v1903_v10, %s4706_s25  ;;  %v1643_v10 = vrot.slane %v4979_v24, 2  ;;  %v1351_v29 = vsel %vm9039_vm1, %v1348_v62, %v1350_v16 }
  0x25   :  { %1811 = vrot.lane.b32.xlu0 %v1634_v30, %s4707_s26  ;;  %v1908_v30 = vrot.slane %v4967_v14, 3 }
  0x26   :  { %4353 = vmatpush3.bf16.msra.mxu0 %v4589_v48  ;;  %4559 = vmatpush3.bf16.msra.mxu1 %v4589_v48 }
  0x27   :  { %4526 = vmatprep.subr.bf16.mxu1 %v8978_v49 }
  0x28   :  { %870 = vrot.lane.b32.xlu1 %v785_v20, %s4701_s16  ;;  %v1085_v20 = vor.u32 %v1084_v12, %v1083_v8 }
  0x29   :  { %693 = vrot.lane.b32.xlu0 %v368_v34, %s4705_s22 }
  0x2a   :  { %v1086_v25 = vsel %vm8970_vm2, %v1081_v56, %v1085_v20 }
  0x2c   :  { %1253 = vrot.lane.b32.xlu1 %v1078_v36, %s4704_s21 }
  0x2d   :  { %973 = vrot.lane.b32.xlu0 %v787_v38, %s4700_s15 }
  0x30   :  { %1533 = vrot.lane.b32.xlu1 %v1347_v42, %s4702_s19 }
  0x31   :  { %1430 = vrot.lane.b32.xlu0 %v1345_v23, %s4703_s20  ;;  %v4976_v23 = vshll.u32 %v4967_v14, 16 }
  0x33   :  { %v1644_v28 = vrot.slane %v4976_v23, 3 }
  0x34   :  { %1990 = vrot.lane.b32.xlu1 %v1905_v46, %s4706_s25 }
  0x35   :  { %1813 = vrot.lane.b32.xlu0 %v1638_v52, %s4707_s26  ;;  %v1645_v31 = vor.u32 %v1644_v28, %v1643_v10 }
  0x38   :  { %872 = vrot.lane.b32.xlu1 %v787_v38, %s4701_s16 }
  0x39   :  { %695 = vrot.lane.b32.xlu0 %v376_v57, %s4705_s22 }
  0x3c   :  { %1255 = vrot.lane.b32.xlu1 %v1082_v61, %s4704_s21 }
  0x3d   :  { %975 = vrot.lane.b32.xlu0 %v789_v63, %s4700_s15 }
  0x40   :  { %1535 = vrot.lane.b32.xlu1 %v1349_v2, %s4702_s19 }
  0x41   :  { %1432 = vrot.lane.b32.xlu0 %v1347_v42, %s4703_s20 }
  0x44   :  { %1992 = vrot.lane.b32.xlu1 %v1907_v7, %s4706_s25 }
  0x45   :  { %1815 = vrot.lane.b32.xlu0 %v1642_v18, %s4707_s26 }
  0x48   :  { %874 = vrot.lane.b32.xlu1 %v789_v63, %s4701_s16 }
  0x49   :  { %697 = vrot.lane.b32.xlu0 %v384_v9, %s4705_s22 }
  0x4c   :  { %1257 = vrot.lane.b32.xlu1 %v1086_v25, %s4704_s21 }
  0x4d   :  { %977 = vrot.lane.b32.xlu0 %v791_v27, %s4700_s15 }
  0x4e   :  { %10 = vsyncpa [#allocation3], 0  ;;  %v1909_v32 = vsel %vm8969_vm4, %v1906_v3, %v1908_v30  ;;  %v1087_v22 = vrot.slane %v4979_v24, 1  ;;  %v1088_v33 = vrot.slane %v4976_v23, 2  ;;  %v1646_v34 = vsel %vm1618_vm5, %v1641_v6, %v1645_v31  ;;  %v5003_v37 = vld [vmem:[%s8955_s1 + $0x40] sm:$0xff]   ;;  %v5037_v58 = vld [vmem:[%s8955_s1 + $0x48] sm:$0xff]  }
  0x4f   :  { %v387_v35 = vor.u32 %v4890_v26, %v383_v13  ;;  %v391_v36 = vrot.slane %v4935_v59, 1  ;;  %v792_v40 = vrot.slane %v4967_v14, 1  ;;  %v5010_v41 = vshll.u32 %v5003_v37, 16  ;;  %s4710_s14 = smov [#allocation2]  }
  0x50   :  { %1537 = vrot.lane.b32.xlu1 %v1351_v29, %s4702_s19  ;;  %v1089_v38 = vor.u32 %v1088_v33, %v1087_v22  ;;  %v5013_v26 = vshrl.u32 %v5003_v37, 16  ;;  %v1352_v43 = vrot.slane %v5003_v37, 2  ;;  %v1910_v50 = vrot.slane %v5003_v37, 3  ;;  %s4167_s17 = sshll.u32 %s4710_s14, 4  ;;  %s4168_s17 = int_to_ptr.vmem [resolvable:$true] %s4167_s17 }
  0x51   :  { %1434 = vrot.lane.b32.xlu0 %v1349_v2, %s4703_s20  ;;  %v392_v39 = vsel %vm340_vm3, %v387_v35, %v391_v36  ;;  %v793_v44 = vsel %vm8968_vm0, %v790_v21, %v792_v40  ;;  %v1648_v46 = vrot.slane %v5010_v41, 3  ;;  %v1092_v54 = vrot.slane %v5010_v41, 2  ;;  %s4678_s18 = scalar_lea.vmem %s4168_s17, 64  ;;  %p4683_p1 = scmp.lt.s32.totalorder %s4168_s17, %s4168_s17 }
  0x52   :  { %v1090_v42 = vsel %vm8970_vm2, %v1085_v20, %v1089_v38  ;;  %v1647_v45 = vrot.slane %v5013_v26, 2  ;;  %v1353_v47 = vsel %vm9039_vm1, %v1350_v16, %v1352_v43  ;;  %v1911_v52 = vsel %vm8969_vm4, %v1908_v30, %v1910_v50  ;;  %p4679_p0 = scmp.ne.s32.totalorder %s4168_s17, %s4678_s18  ;;  %p4684_p2 = scmp.lt.s32.totalorder %s4678_s18, %s4678_s18 }
  0x53   :  { %v1091_v53 = vrot.slane %v5013_v26, 1  ;;  %v395_v48 = vor.u32 %v4938_v60, %v391_v36  ;;  %v399_v57 = vrot.slane %v4976_v23, 1  ;;  %v794_v62 = vrot.slane %v5003_v37, 1  ;;  %v5071_v23 = vld [vmem:[%s8955_s1 + $0x50] sm:$0xff]  }
  0x54   :  { %1994 = vrot.lane.b32.xlu1 %v1909_v32, %s4706_s25  ;;  %v1649_v51 = vor.u32 %v1648_v46, %v1647_v45  ;;  %v5044_v63 = vshll.u32 %v5037_v58, 16  ;;  %v5047_v60 = vshrl.u32 %v5037_v58, 16  ;;  %v1354_v1 = vrot.slane %v5037_v58, 2  ;;  %p4685_p3 = por %p4684_p2, %p4683_p1 }
  0x55   :  { %1817 = vrot.lane.b32.xlu0 %v1646_v34, %s4707_s26  ;;  %v1093_v59 = vor.u32 %v1092_v54, %v1091_v53  ;;  %v400_v61 = vsel %vm340_vm3, %v395_v48, %v399_v57  ;;  %v795_v2 = vsel %vm8968_vm0, %v792_v40, %v794_v62  ;;  %v1912_v8 = vrot.slane %v5037_v58, 3 }
  0x56   :  { %v1650_v56 = vsel %vm1618_vm5, %v1645_v31, %v1649_v51  ;;  %v1651_v3 = vrot.slane %v5047_v60, 2  ;;  %v1652_v6 = vrot.slane %v5044_v63, 3  ;;  %v1355_v7 = vsel %vm9039_vm1, %v1352_v43, %v1354_v1  ;;  %p4686_p4 = pnand %p4685_p3, %p4679_p0 }
  0x57   :  { %v1094_v0 = vsel %vm8970_vm2, %v1089_v38, %v1093_v59  ;;  %v1913_v13 = vsel %vm8969_vm4, %v1910_v50, %v1912_v8  ;;  %v1095_v18 = vrot.slane %v5047_v60, 1  ;;  %v1096_v19 = vrot.slane %v5044_v63, 2 }
  0x58   :  { %876 = vrot.lane.b32.xlu1 %v791_v27, %s4701_s16  ;;  %v1653_v12 = vor.u32 %v1652_v6, %v1651_v3  ;;  %v403_v21 = vor.u32 %v4979_v24, %v399_v57  ;;  %v407_v9 = vrot.slane %v5010_v41, 1  ;;  %v796_v27 = vrot.slane %v5037_v58, 1 }
  0x59   :  { %699 = vrot.lane.b32.xlu0 %v392_v39, %s4705_s22  ;;  %v1097_v25 = vor.u32 %v1096_v19, %v1095_v18  ;;  %v5078_v10 = vshll.u32 %v5071_v23, 16  ;;  %v5081_v24 = vshrl.u32 %v5071_v23, 16  ;;  %v1914_v35 = vrot.slane %v5071_v23, 3 }
  0x5a   :  { %v1654_v20 = vsel %vm1618_vm5, %v1649_v51, %v1653_v12  ;;  %v408_v16 = vsel %vm340_vm3, %v403_v21, %v407_v9  ;;  %v797_v32 = vsel %vm8968_vm0, %v794_v62, %v796_v27  ;;  %vm8973_vm8 = vcmask 31744  }
  0x5b   :  { %v1098_v28 = vsel %vm8970_vm2, %v1093_v59, %v1097_v25  ;;  %v1655_v22 = vrot.slane %v5081_v24, 2  ;;  %v1656_v33 = vrot.slane %v5078_v10, 3  ;;  %v1915_v40 = vsel %vm8969_vm4, %v1912_v8, %v1914_v35 }
  0x5c   :  { %1259 = vrot.lane.b32.xlu1 %v1090_v42, %s4704_s21  ;;  %v1099_v41 = vrot.slane %v5081_v24, 1  ;;  %v1100_v42 = vrot.slane %v5078_v10, 2  ;;  %vm2159_vm9 = vcmask 64512   ;;  %v411_v45 = vor.u32 %v5013_v26, %v407_v9 }
  0x5d   :  { %979 = vrot.lane.b32.xlu0 %v793_v44, %s4700_s15  ;;  %v5098_v39 = vor.u32 %v1656_v33, %v1655_v22  ;;  %v415_v46 = vrot.slane %v5044_v63, 1  ;;  %vm2246_vm10 = vcmask 97280   ;;  %vm2333_vm11 = vcmask 130048   ;;  %v5176_v33 = vld [vmem:[%s8955_s1 + $0x60] sm:$0xff]  }
  0x5e   :  { %vm2420_vm12 = vcmask 162816   ;;  %vm2507_vm13 = vcmask 195584   ;;  %v798_v54 = vrot.slane %v5071_v23, 1  ;;  %vm8981_vm14 = vcmask 228352  }
  0x5f   :  { %v416_v48 = vsel %vm340_vm3, %v411_v45, %v415_v46  ;;  %vm8971_vm15 = vcmask 261120   ;;  %vm8972_vm6 = vcmask 293888   ;;  %v423_v22 = vrot.slane %v5078_v10, 1 }
  0x60   :  { %1539 = vrot.lane.b32.xlu1 %v1353_v47, %s4702_s19  ;;  %v799_v6 = vsel %vm8968_vm0, %v796_v27, %v798_v54 }
  0x61   :  { %1436 = vrot.lane.b32.xlu0 %v1351_v29, %s4703_s20  ;;  %v1356_v29 = vrot.slane %v5071_v23, 2 }
  0x63   :  { %v5094_v34 = vsel %vm9039_vm1, %v1354_v1, %v1356_v29 }
  0x64   :  { %1996 = vrot.lane.b32.xlu1 %v1911_v52, %s4706_s25  ;;  %v5120_v52 = vor.u32 %v1100_v42, %v1099_v41  ;;  %v5188_v41 = vshrl.u32 %v5176_v33, 16 }
  0x65   :  { %1819 = vrot.lane.b32.xlu0 %v1650_v56, %s4707_s26 }
  0x66   :  { %v1102_v63 = vsel %vm8970_vm2, %v1097_v25, %v5120_v52 }
  0x68   :  { %878 = vrot.lane.b32.xlu1 %v793_v44, %s4701_s16  ;;  %v1658_v44 = vsel %vm1618_vm5, %v1653_v12, %v5098_v39 }
  0x69   :  { %701 = vrot.lane.b32.xlu0 %v400_v61, %s4705_s22 }
  0x6c   :  { %1261 = vrot.lane.b32.xlu1 %v1094_v0, %s4704_s21 }
  0x6d   :  { %981 = vrot.lane.b32.xlu0 %v795_v2, %s4700_s15 }
  0x70   :  { %1541 = vrot.lane.b32.xlu1 %v1355_v7, %s4702_s19 }
  0x71   :  { %1438 = vrot.lane.b32.xlu0 %v1353_v47, %s4703_s20  ;;  %v5115_v47 = vld [vmem:[%s8955_s1 + $0x58] sm:$0xff]  }
  0x72   :  { %v5128_v57 = vshll.u32 %v5115_v47, 16  ;;  %v1358_v0 = vrot.slane %v5115_v47, 2  ;;  %v800_v10 = vrot.slane %v5115_v47, 1 }
  0x74   :  { %1998 = vrot.lane.b32.xlu1 %v1913_v13, %s4706_s25  ;;  %v1660_v8 = vrot.slane %v5128_v57, 3  ;;  %v1359_v19 = vsel %vm9039_vm1, %v1356_v29, %v1358_v0  ;;  %v1104_v29 = vrot.slane %v5128_v57, 2 }
  0x75   :  { %1821 = vrot.lane.b32.xlu0 %v1654_v20, %s4707_s26  ;;  %v1916_v20 = vrot.slane %v5115_v47, 3 }
  0x77   :  { %v1917_v27 = vsel %vm8969_vm4, %v1914_v35, %v1916_v20 }
  0x78   :  { %880 = vrot.lane.b32.xlu1 %v795_v2, %s4701_s16 }
  0x79   :  { %703 = vrot.lane.b32.xlu0 %v408_v16, %s4705_s22 }
  0x7a   :  { %v970_v30 = vpop.permute.xlu1 %969 }
  0x7b   :  { %v867_v31 = vpop.permute.xlu0 %866 }
  0x7c   :  { %1263 = vrot.lane.b32.xlu1 %v1098_v28, %s4704_s21 }
  0x7d   :  { %983 = vrot.lane.b32.xlu0 %v797_v32, %s4700_s15 }
  0x7e   :  { %v1530_v36 = vpop.permute.xlu1 %1529 }
  0x7f   :  { %v1427_v38 = vpop.permute.xlu0 %1426 }
  0x80   :  { %1543 = vrot.lane.b32.xlu1 %v5094_v34, %s4702_s19 }
  0x81   :  { %1440 = vrot.lane.b32.xlu0 %v1355_v7, %s4703_s20 }
  0x82   :  { %v1250_v43 = vpop.permute.xlu1 %1249 }
  0x83   :  { %v690_v50 = vpop.permute.xlu0 %689 }
  0x84   :  { %2000 = vrot.lane.b32.xlu1 %v1915_v40, %s4706_s25  ;;  %v2074_v51 = vsel %vm8973_vm8, %v4777_v15, %v690_v50  ;;  %v5131_v15 = vshrl.u32 %v5115_v47, 16  ;;  %v5185_v40 = vshll.u32 %v5176_v33, 16 }
  0x85   :  { %v2161_v53 = vsel %vm2159_vm9, %v2074_v51, %v867_v31  ;;  %1823 = vrot.lane.b32.xlu0 %v1658_v44, %s4707_s26  ;;  %v801_v51 = vsel %vm8968_vm0, %v798_v54, %v800_v10 }
  0x86   :  { %v1987_v26 = vpop.permute.xlu1 %1986  ;;  %v2248_v56 = vsel %vm2246_vm10, %v2161_v53, %v970_v30  ;;  %v1659_v7 = vrot.slane %v5131_v15, 2  ;;  %v1103_v28 = vrot.slane %v5131_v15, 1  ;;  %v1663_v53 = vrot.slane %v5188_v41, 2 }
  0x87   :  { %v2335_v59 = vsel %vm2333_vm11, %v2248_v56, %v1250_v43  ;;  %v1810_v61 = vpop.permute.xlu0 %1809 }
  0x88   :  { %882 = vrot.lane.b32.xlu1 %v797_v32, %s4701_s16  ;;  %v2422_v62 = vsel %vm2420_vm12, %v2335_v59, %v1427_v38  ;;  %v1661_v9 = vor.u32 %v1660_v8, %v1659_v7  ;;  %v419_v32 = vor.u32 %v5047_v60, %v415_v46  ;;  %v1105_v38 = vor.u32 %v1104_v29, %v1103_v28 }
  0x89   :  { %v2509_v1 = vsel %vm2507_vm13, %v2422_v62, %v1530_v36  ;;  %705 = vrot.lane.b32.xlu0 %v416_v48, %s4705_s22  ;;  %v1360_v46 = vrot.slane %v5176_v33, 2  ;;  %v1918_v59 = vrot.slane %v5176_v33, 3  ;;  %v427_v7 = vor.u32 %v5081_v24, %v423_v22 }
  0x8a   :  { %v869_v2 = vpop.permute.xlu1 %868  ;;  %v2596_v3 = vsel %vm8981_vm14, %v2509_v1, %v1810_v61  ;;  %v1662_v31 = vsel %vm1618_vm5, %v5098_v39, %v1661_v9  ;;  %v424_v60 = vsel %vm340_vm3, %v419_v32, %v423_v22  ;;  %v1106_v45 = vsel %vm8970_vm2, %v5120_v52, %v1105_v38 }
  0x8b   :  { %v692_v12 = vpop.permute.xlu0 %691  ;;  %v2683_v13 = vsel %vm8971_vm15, %v2596_v3, %v1987_v26  ;;  %v1664_v26 = vrot.slane %v5185_v40, 3  ;;  %v1361_v48 = vsel %vm9039_vm1, %v1358_v0, %v1360_v46  ;;  %v1107_v3 = vrot.slane %v5188_v41, 1 }
  0x8c   :  { %1265 = vrot.lane.b32.xlu1 %v1102_v63, %s4704_s21  ;;  %v2076_v18 = vsel %vm8973_vm8, %v4772_v11, %v692_v12  ;;  %4355 = vmatmul.mubr.msk.bf16.vlgmr.msra.gmra.mxu0 %vm8972_vm6, %v2683_v13  ;;  %v431_v8 = vrot.slane %v5128_v57, 1  ;;  %v5225_v12 = vld [vmem:[%s8955_s1 + $0x68] sm:$0xff]   ;;  %v802_v57 = vrot.slane %v5176_v33, 1 }
  0x8d   :  { %985 = vrot.lane.b32.xlu0 %v799_v6, %s4700_s15  ;;  %4358 = vmatprep.mubr.msk.bf16.mxu0 %vm4709_vm7, %v8978_v49  ;;  %v2163_v25 = vsel %vm2159_vm9, %v2076_v18, %v869_v2  ;;  %v1665_v61 = vor.u32 %v1664_v26, %v1663_v53  ;;  %v1919_v2 = vsel %vm8969_vm4, %v1916_v20, %v1918_v59  ;;  %v1362_v29 = vrot.slane %v5225_v12, 2 }
  0x8e   :  { %v1252_v21 = vpop.permute.xlu1 %1251  ;;  %v432_v24 = vsel %vm340_vm3, %v427_v7, %v431_v8  ;;  %v803_v32 = vsel %vm8968_vm0, %v800_v10, %v802_v57  ;;  %v435_v53 = vor.u32 %v5131_v15, %v431_v8  ;;  %v439_v26 = vrot.slane %v5185_v40, 1 }
  0x8f   :  { %v972_v16 = vpop.permute.xlu0 %971 }
  0x90   :  { %1545 = vrot.lane.b32.xlu1 %v1359_v19, %s4702_s19  ;;  %v2250_v11 = vsel %vm2246_vm10, %v2163_v25, %v972_v16  ;;  %v5237_v25 = vshrl.u32 %v5225_v12, 16  ;;  %v440_v15 = vsel %vm340_vm3, %v435_v53, %v439_v26 }
  0x91   :  { %1442 = vrot.lane.b32.xlu0 %v5094_v34, %s4703_s20  ;;  %v2337_v35 = vsel %vm2333_vm11, %v2250_v11, %v1252_v21 }
  0x92   :  { %v1532_v30 = vpop.permute.xlu1 %1531  ;;  %v1667_v22 = vrot.slane %v5237_v25, 2 }
  0x93   :  { %v1429_v36 = vpop.permute.xlu0 %1428 }
  0x94   :  { %2002 = vrot.lane.b32.xlu1 %v1917_v27, %s4706_s25  ;;  %v2424_v34 = vsel %vm2420_vm12, %v2337_v35, %v1429_v36  ;;  %v4643_v36 = vld [vmem:[%s8955_s1 + $0x18] sm:$0xff]  }
  0x95   :  { %1825 = vrot.lane.b32.xlu0 %v1662_v31, %s4707_s26  ;;  %v2511_v42 = vsel %vm2507_vm13, %v2424_v34, %v1532_v30 }
  0x96   :  { %v1989_v39 = vpop.permute.xlu1 %1988 }
  0x97   :  { %v1812_v43 = vpop.permute.xlu0 %1811 }
  0x98   :  { %884 = vrot.lane.b32.xlu1 %v799_v6, %s4701_s16  ;;  %v2598_v44 = vsel %vm8981_vm14, %v2511_v42, %v1812_v43  ;;  %v1666_v6 = vsel %vm1618_vm5, %v1661_v9, %v1665_v61  ;;  %v5234_v9 = vshll.u32 %v5225_v12, 16 }
  0x99   :  { %707 = vrot.lane.b32.xlu0 %v424_v60, %s4705_s22  ;;  %v2685_v47 = vsel %vm8971_vm15, %v2598_v44, %v1989_v39  ;;  %v1920_v39 = vrot.slane %v5225_v12, 3 }
  0x9a   :  { %v871_v50 = vpop.permute.xlu1 %870  ;;  %4359 = vmatmul.mubr.msk.bf16.gmra.mxu0 %vm8972_vm6, %v2685_v47  ;;  %v1668_v33 = vrot.slane %v5234_v9, 3  ;;  %v1111_v47 = vrot.slane %v5237_v25, 1 }
  0x9b   :  { %v694_v56 = vpop.permute.xlu0 %693  ;;  %4362 = vmatprep.mubr.msk.bf16.mxu0 %vm4709_vm7, %v8978_v49 }
  0x9c   :  { %1267 = vrot.lane.b32.xlu1 %v1106_v45, %s4704_s21  ;;  %v2078_v52 = vsel %vm8973_vm8, %v4753_v4, %v694_v56  ;;  %v1108_v4 = vrot.slane %v5185_v40, 2  ;;  %v1669_v10 = vor.u32 %v1668_v33, %v1667_v22  ;;  %v1921_v45 = vsel %vm8969_vm4, %v1918_v59, %v1920_v39  ;;  %v5273_v56 = vld [vmem:[%s8955_s1 + $0x70] sm:$0xff]   ;;  %v5319_v33 = vld [vmem:[%s8955_s1 + $0x78] sm:$0xff]  }
  0x9d   :  { %987 = vrot.lane.b32.xlu0 %v801_v51, %s4700_s15  ;;  %v2165_v62 = vsel %vm2159_vm9, %v2078_v52, %v871_v50  ;;  %v1112_v50 = vrot.slane %v5234_v9, 2  ;;  %v804_v40 = vrot.slane %v5225_v12, 1  ;;  %v447_v22 = vrot.slane %v5234_v9, 1 }
  0x9e   :  { %v1254_v54 = vpop.permute.xlu1 %1253  ;;  %v806_v9 = vrot.slane %v5273_v56, 1 }
  0x9f   :  { %v974_v63 = vpop.permute.xlu0 %973  ;;  %v805_v8 = vsel %vm8968_vm0, %v802_v57, %v804_v40 }
  0xa0   :  { %1547 = vrot.lane.b32.xlu1 %v1361_v48, %s4702_s19  ;;  %v2252_v1 = vsel %vm2246_vm10, %v2165_v62, %v974_v63  ;;  %v5282_v62 = vshll.u32 %v5273_v56, 16  ;;  %v5285_v63 = vshrl.u32 %v5273_v56, 16 }
  0xa1   :  { %1444 = vrot.lane.b32.xlu0 %v1359_v19, %s4703_s20  ;;  %v2339_v13 = vsel %vm2333_vm11, %v2252_v1, %v1254_v54  ;;  %v1109_v19 = vor.u32 %v1108_v4, %v1107_v3 }
  0xa2   :  { %v1534_v0 = vpop.permute.xlu1 %1533  ;;  %v1671_v12 = vrot.slane %v5285_v63, 2 }
  0xa3   :  { %v1431_v18 = vpop.permute.xlu0 %1430  ;;  %v1110_v28 = vsel %vm8970_vm2, %v1105_v38, %v1109_v19  ;;  %v1363_v38 = vsel %vm9039_vm1, %v1360_v46, %v1362_v29 }
  0xa4   :  { %2004 = vrot.lane.b32.xlu1 %v1919_v2, %s4706_s25  ;;  %v2426_v20 = vsel %vm2420_vm12, %v2339_v13, %v1431_v18  ;;  %v1672_v13 = vrot.slane %v5282_v62, 3 }
  0xa5   :  { %1827 = vrot.lane.b32.xlu0 %v1666_v6, %s4707_s26  ;;  %v2513_v16 = vsel %vm2507_vm13, %v2426_v20, %v1534_v0  ;;  %v1364_v0 = vrot.slane %v5273_v56, 2 }
  0xa6   :  { %v1991_v21 = vpop.permute.xlu1 %1990  ;;  %v1673_v57 = vor.u32 %v1672_v13, %v1671_v12 }
  0xa7   :  { %v1814_v11 = vpop.permute.xlu0 %1813 }
  0xa8   :  { %886 = vrot.lane.b32.xlu1 %v801_v51, %s4701_s16  ;;  %v2600_v27 = vsel %vm8981_vm14, %v2513_v16, %v1814_v11  ;;  %v1670_v51 = vsel %vm1618_vm5, %v1665_v61, %v1669_v10 }
  0xa9   :  { %709 = vrot.lane.b32.xlu0 %v432_v24, %s4705_s22  ;;  %v2687_v30 = vsel %vm8971_vm15, %v2600_v27, %v1991_v21  ;;  %v1922_v21 = vrot.slane %v5273_v56, 3 }
  0xaa   :  { %v873_v31 = vpop.permute.xlu1 %872  ;;  %4363 = vmatmul.mubr.msk.bf16.gmra.mxu0 %vm8972_vm6, %v2687_v30  ;;  %v1115_v30 = vrot.slane %v5285_v63, 1 }
  0xab   :  { %v696_v35 = vpop.permute.xlu0 %695  ;;  %4366 = vmatprep.mubr.msk.bf16.mxu0 %vm4709_vm7, %v8978_v49 }
  0xac   :  { %1269 = vrot.lane.b32.xlu1 %v1110_v28, %s4704_s21  ;;  %v2080_v34 = vsel %vm8973_vm8, %v4643_v36, %v696_v35  ;;  %v1923_v28 = vsel %vm8969_vm4, %v1920_v39, %v1922_v21 }
  0xad   :  { %989 = vrot.lane.b32.xlu0 %v803_v32, %s4700_s15  ;;  %v2167_v42 = vsel %vm2159_vm9, %v2080_v34, %v873_v31  ;;  %v1674_v31 = vsel %vm1618_vm5, %v1669_v10, %v1673_v57  ;;  %v5331_v10 = vshrl.u32 %v5319_v33, 16 }
  0xae   :  { %v1256_v60 = vpop.permute.xlu1 %1255 }
  0xaf   :  { %v976_v43 = vpop.permute.xlu0 %975  ;;  %v1675_v53 = vrot.slane %v5331_v10, 2 }
  0xb0   :  { %1549 = vrot.lane.b32.xlu1 %v1363_v38, %s4702_s19  ;;  %v2254_v44 = vsel %vm2246_vm10, %v2167_v42, %v976_v43 }
  0xb1   :  { %1446 = vrot.lane.b32.xlu0 %v1361_v48, %s4703_s20  ;;  %v2341_v52 = vsel %vm2333_vm11, %v2254_v44, %v1256_v60  ;;  %v1113_v48 = vor.u32 %v1112_v50, %v1111_v47  ;;  %v5328_v60 = vshll.u32 %v5319_v33, 16  ;;  %v1366_v47 = vrot.slane %v5319_v33, 2 }
  0xb2   :  { %v1536_v46 = vpop.permute.xlu1 %1535 }
  0xb3   :  { %v1433_v59 = vpop.permute.xlu0 %1432  ;;  %v1114_v4 = vsel %vm8970_vm2, %v1109_v19, %v1113_v48  ;;  %v1365_v19 = vsel %vm9039_vm1, %v1362_v29, %v1364_v0 }
  0xb4   :  { %2006 = vrot.lane.b32.xlu1 %v1921_v45, %s4706_s25  ;;  %v2428_v54 = vsel %vm2420_vm12, %v2341_v52, %v1433_v59  ;;  %v1367_v59 = vsel %vm9039_vm1, %v1364_v0, %v1366_v47 }
  0xb5   :  { %1829 = vrot.lane.b32.xlu0 %v1670_v51, %s4707_s26  ;;  %v2515_v1 = vsel %vm2507_vm13, %v2428_v54, %v1536_v46  ;;  %v807_v51 = vsel %vm8968_vm0, %v804_v40, %v806_v9  ;;  %v1924_v54 = vrot.slane %v5319_v33, 3 }
  0xb6   :  { %v1993_v61 = vpop.permute.xlu1 %1992 }
  0xb7   :  { %v1816_v2 = vpop.permute.xlu0 %1815 }
  0xb8   :  { %888 = vrot.lane.b32.xlu1 %v803_v32, %s4701_s16  ;;  %v2602_v3 = vsel %vm8981_vm14, %v2515_v1, %v1816_v2  ;;  %v443_v32 = vor.u32 %v5188_v41, %v439_v26  ;;  %v1676_v26 = vrot.slane %v5328_v60, 3  ;;  %v1925_v2 = vsel %vm8969_vm4, %v1922_v21, %v1924_v54 }
  0xb9   :  { %711 = vrot.lane.b32.xlu0 %v440_v15, %s4705_s22  ;;  %v2689_v6 = vsel %vm8971_vm15, %v2602_v3, %v1993_v61  ;;  %v1119_v3 = vrot.slane %v5331_v10, 1 }
  0xba   :  { %v875_v7 = vpop.permute.xlu1 %874  ;;  %4367 = vmatmul.mubr.msk.bf16.gmra.mxu0 %vm8972_vm6, %v2689_v6  ;;  %v448_v41 = vsel %vm340_vm3, %v443_v32, %v447_v22  ;;  %v1677_v61 = vor.u32 %v1676_v26, %v1675_v53  ;;  %v451_v6 = vor.u32 %v5237_v25, %v447_v22  ;;  %v5428_v53 = vld [vmem:[%s8955_s1 + $0xc8] sm:$0xff]  }
  0xbb   :  { %v698_v18 = vpop.permute.xlu0 %697  ;;  %4370 = vmatprep.mubr.msk.bf16.mxu0 %vm4709_vm7, %v8978_v49 }
  0xbc   :  { %1271 = vrot.lane.b32.xlu1 %v1114_v4, %s4704_s21  ;;  %v2082_v20 = vsel %vm8973_vm8, %v4834_v5, %v698_v18  ;;  %v1116_v5 = vrot.slane %v5282_v62, 2  ;;  %v1678_v0 = vsel %vm1618_vm5, %v1673_v57, %v1677_v61 }
  0xbd   :  { %991 = vrot.lane.b32.xlu0 %v805_v8, %s4700_s15  ;;  %v2169_v16 = vsel %vm2159_vm9, %v2082_v20, %v875_v7  ;;  %v455_v7 = vrot.slane %v5282_v62, 1  ;;  %v808_v62 = vrot.slane %v5319_v33, 1 }
  0xbe   :  { %v1258_v24 = vpop.permute.xlu1 %1257 }
  0xbf   :  { %v978_v11 = vpop.permute.xlu0 %977  ;;  %v456_v25 = vsel %vm340_vm3, %v451_v6, %v455_v7 }
  0xc0   :  { %1551 = vrot.lane.b32.xlu1 %v1365_v19, %s4702_s19  ;;  %v2256_v27 = vsel %vm2246_vm10, %v2169_v16, %v978_v11 }
  0xc1   :  { %1448 = vrot.lane.b32.xlu0 %v1363_v38, %s4703_s20  ;;  %v2343_v35 = vsel %vm2333_vm11, %v2256_v27, %v1258_v24  ;;  %v1117_v38 = vor.u32 %v1116_v5, %v1115_v30 }
  0xc2   :  { %v1538_v29 = vpop.permute.xlu1 %1537 }
  0xc3   :  { %v1435_v36 = vpop.permute.xlu0 %1434  ;;  %v1118_v45 = vsel %vm8970_vm2, %v1113_v48, %v1117_v38 }
  0xc4   :  { %2008 = vrot.lane.b32.xlu1 %v1923_v28, %s4706_s25  ;;  %v2430_v34 = vsel %vm2420_vm12, %v2343_v35, %v1435_v36 }
  0xc5   :  { %1831 = vrot.lane.b32.xlu0 %v1674_v31, %s4707_s26  ;;  %v2517_v42 = vsel %vm2507_vm13, %v2430_v34, %v1538_v29  ;;  %v809_v29 = vsel %vm8968_vm0, %v806_v9, %v808_v62 }
  0xc6   :  { %v1995_v39 = vpop.permute.xlu1 %1994 }
  0xc7   :  { %v1818_v43 = vpop.permute.xlu0 %1817 }
  0xc8   :  { %890 = vrot.lane.b32.xlu1 %v805_v8, %s4701_s16  ;;  %v2604_v44 = vsel %vm8981_vm14, %v2517_v42, %v1818_v43  ;;  %v5365_v8 = vld [vmem:[%s8955_s1 + $0x80] sm:$0xff]  }
  0xc9   :  { %713 = vrot.lane.b32.xlu0 %v448_v41, %s4705_s22  ;;  %v2691_v50 = vsel %vm8971_vm15, %v2604_v44, %v1995_v39  ;;  %v5374_v21 = vshll.u32 %v5365_v8, 16  ;;  %v5377_v24 = vshrl.u32 %v5365_v8, 16  ;;  %v1368_v28 = vrot.slane %v5365_v8, 2  ;;  %v5409_v41 = vld [vmem:[%s8955_s1 + $0xc0] sm:$0xff]  }
  0xca   :  { %v877_v46 = vpop.permute.xlu1 %876  ;;  %4371 = vmatmul.mubr.msk.bf16.gmra.mxu0 %vm8972_vm6, %v2691_v50  ;;  %v1926_v34 = vrot.slane %v5365_v8, 3  ;;  %v459_v50 = vor.u32 %v5285_v63, %v455_v7  ;;  %v5431_v26 = vshll.u32 %v5409_v41, 16 }
  0xcb   :  { %v700_v56 = vpop.permute.xlu0 %699  ;;  %4374 = vmatprep.mubr.msk.bf16.mxu0 %vm4709_vm7, %v8978_v49  ;;  %v1679_v31 = vrot.slane %v5377_v24, 2  ;;  %v1680_v32 = vrot.slane %v5374_v21, 3  ;;  %v5400_v36 = vsel %vm9039_vm1, %v1366_v47, %v1368_v28  ;;  %v1123_v44 = vrot.slane %v5377_v24, 1 }
  0xcc   :  { %1273 = vrot.lane.b32.xlu1 %v1118_v45, %s4704_s21  ;;  %v2084_v52 = vsel %vm8973_vm8, %v4880_v17, %v700_v56  ;;  %v1120_v17 = vrot.slane %v5328_v60, 2  ;;  %v1927_v43 = vsel %vm8969_vm4, %v1924_v54, %v1926_v34  ;;  %v1124_v45 = vrot.slane %v5374_v21, 2  ;;  %v5441_v54 = vld [vmem:[%s8955_s1 + $0x88] sm:$0xff]  }
  0xcd   :  { %993 = vrot.lane.b32.xlu0 %v807_v51, %s4700_s15  ;;  %v2171_v15 = vsel %vm2159_vm9, %v2084_v52, %v877_v46  ;;  %v5404_v39 = vor.u32 %v1680_v32, %v1679_v31  ;;  %v463_v46 = vrot.slane %v5328_v60, 1  ;;  %v5461_v6 = vshll.u32 %v5441_v54, 16 }
  0xce   :  { %v1260_v48 = vpop.permute.xlu1 %1259  ;;  %v1121_v20 = vor.u32 %v1120_v17, %v1119_v3  ;;  %v5464_v7 = vshrl.u32 %v5441_v54, 16 }
  0xcf   :  { %v980_v40 = vpop.permute.xlu0 %979 }
  0xd0   :  { %1553 = vrot.lane.b32.xlu1 %v1367_v59, %s4702_s19  ;;  %v2258_v1 = vsel %vm2246_vm10, %v2171_v15, %v980_v40  ;;  %v1122_v27 = vsel %vm8970_vm2, %v1117_v38, %v1121_v20  ;;  %v810_v15 = vrot.slane %v5365_v8, 1  ;;  %v8962_v40 = vrot.slane %v5431_v26, 1 }
  0xd1   :  { %1450 = vrot.lane.b32.xlu0 %v1365_v19, %s4703_s20  ;;  %v2345_v12 = vsel %vm2333_vm11, %v2258_v1, %v1260_v48  ;;  %v5450_v1 = vshrl.u32 %v5409_v41, 16 }
  0xd2   :  { %v1540_v4 = vpop.permute.xlu1 %1539 }
  0xd3   :  { %v1437_v13 = vpop.permute.xlu0 %1436 }
  0xd4   :  { %2010 = vrot.lane.b32.xlu1 %v1925_v2, %s4706_s25  ;;  %v2432_v18 = vsel %vm2420_vm12, %v2345_v12, %v1437_v13  ;;  %v5453_v2 = vshll.u32 %v5428_v53, 16 }
  0xd5   :  { %1833 = vrot.lane.b32.xlu0 %v1678_v0, %s4707_s26  ;;  %v2519_v57 = vsel %vm2507_vm13, %v2432_v18, %v1540_v4  ;;  %v5474_v18 = vsel %vm8968_vm0, %v808_v62, %v810_v15  ;;  %v1370_v62 = vrot.slane %v5441_v54, 2 }
  0xd6   :  { %v1997_v19 = vpop.permute.xlu1 %1996 }
  0xd7   :  { %v1820_v16 = vpop.permute.xlu0 %1819 }
  0xd8   :  { %892 = vrot.lane.b32.xlu1 %v807_v51, %s4701_s16  ;;  %v2606_v11 = vsel %vm8981_vm14, %v2519_v57, %v1820_v16  ;;  %v1682_v51 = vsel %vm1618_vm5, %v1677_v61, %v5404_v39  ;;  %v464_v61 = vsel %vm340_vm3, %v459_v50, %v463_v46  ;;  %v1683_v16 = vrot.slane %v5464_v7, 2 }
  0xd9   :  { %715 = vrot.lane.b32.xlu0 %v456_v25, %s4705_s22  ;;  %v2693_v30 = vsel %vm8971_vm15, %v2606_v11, %v1997_v19  ;;  %v543_v19 = vrot.slane %v5453_v2, 1  ;;  %v5483_v25 = vld [vmem:[%s8955_s1 + $0xd0] sm:$0xff]   ;;  %v1684_v11 = vrot.slane %v5461_v6, 3 }
  0xda   :  { %v879_v5 = vpop.permute.xlu1 %878  ;;  %4375 = vmatmul.mubr.msk.bf16.gmra.mxu0 %vm8972_vm6, %v2693_v30  ;;  %9052 = vst [vmem:[#allocation5_spill] sm:$0xff] %v5483_v25  ;;  %v8964_v30 = vrot.slane %v5409_v41, 1  ;;  %v5504_v31 = vshll.u32 %v5483_v25, 16  ;;  %v5507_v32 = vshrl.u32 %v5483_v25, 16 }
  0xdb   :  { %v702_v22 = vpop.permute.xlu0 %701  ;;  %4378 = vmatprep.mubr.msk.bf16.mxu0 %vm4709_vm7, %v8978_v49 }
  0xdc   :  { %1275 = vrot.lane.b32.xlu1 %v1122_v27, %s4704_s21  ;;  %v2086_v35 = vsel %vm8973_vm8, %v4923_v55, %v702_v22 }
  0xdd   :  { %995 = vrot.lane.b32.xlu0 %v809_v29, %s4700_s15  ;;  %v2173_v9 = vsel %vm2159_vm9, %v2086_v35, %v879_v5  ;;  %v828_v5 = vrot.slane %v5428_v53, 1 }
  0xde   :  { %v1262_v38 = vpop.permute.xlu1 %1261 }
  0xdf   :  { %v982_v55 = vpop.permute.xlu0 %981 }
  0xe0   :  { %1555 = vrot.lane.b32.xlu1 %v5400_v36, %s4702_s19  ;;  %v2260_v42 = vsel %vm2246_vm10, %v2173_v9, %v982_v55  ;;  %v5518_v9 = vsel %vm9039_vm1, %v1368_v28, %v1370_v62  ;;  %v5520_v55 = vor.u32 %v1684_v11, %v1683_v16  ;;  %v1164_v28 = vrot.slane %v5504_v31, 2 }
  0xe1   :  { %1452 = vrot.lane.b32.xlu0 %v1367_v59, %s4703_s20  ;;  %v2347_v56 = vsel %vm2333_vm11, %v2260_v42, %v1262_v38  ;;  %v5436_v59 = vor.u32 %v1124_v45, %v1123_v44  ;;  %v1160_v45 = vrot.slane %v5453_v2, 2 }
  0xe2   :  { %v1542_v47 = vpop.permute.xlu1 %1541 }
  0xe3   :  { %v1439_v52 = vpop.permute.xlu0 %1438  ;;  %v1126_v0 = vsel %vm8970_vm2, %v1121_v20, %v5436_v59  ;;  %v539_v20 = vor.u32 %v5450_v1, %v8962_v40 }
  0xe4   :  { %2012 = vrot.lane.b32.xlu1 %v1927_v43, %s4706_s25  ;;  %v2434_v63 = vsel %vm2420_vm12, %v2347_v56, %v1439_v52  ;;  %v5526_v43 = vsel %vm8968_vm0, %v8964_v30, %v828_v5  ;;  %v1686_v52 = vsel %vm1618_vm5, %v5404_v39, %v5520_v55 }
  0xe5   :  { %1835 = vrot.lane.b32.xlu0 %v1682_v51, %s4707_s26  ;;  %v2521_v3 = vsel %vm2507_vm13, %v2434_v63, %v1542_v47  ;;  %v1163_v47 = vrot.slane %v5507_v32, 1  ;;  %v1928_v63 = vrot.slane %v5441_v54, 3 }
  0xe6   :  { %v1999_v48 = vpop.permute.xlu1 %1998 }
  0xe7   :  { %v1822_v17 = vpop.permute.xlu0 %1821 }
  0xe8   :  { %894 = vrot.lane.b32.xlu1 %v809_v29, %s4701_s16  ;;  %v2608_v4 = vsel %vm8981_vm14, %v2521_v3, %v1822_v17  ;;  %v544_v29 = vsel %vm340_vm3, %v539_v20, %v543_v19 }
  0xe9   :  { %717 = vrot.lane.b32.xlu0 %v464_v61, %s4705_s22  ;;  %v2695_v12 = vsel %vm8971_vm15, %v2608_v4, %v1999_v48  ;;  %v5544_v48 = vld [vmem:[%s8955_s1 + $0xd8] sm:$0xff]   ;;  %v5555_v4 = vor.u32 %v1164_v28, %v1163_v47 }
  0xea   :  { %v881_v13 = vpop.permute.xlu1 %880  ;;  %4379 = vmatmul.mubr.msk.bf16.gmra.mxu0 %vm8972_vm6, %v2695_v12  ;;  %v8963_v12 = vrot.slane %v5428_v53, 2  ;;  %v5571_v16 = vshrl.u32 %v5544_v48, 16 }
  0xeb   :  { %v704_v57 = vpop.permute.xlu0 %703  ;;  %4382 = vmatprep.mubr.msk.bf16.mxu0 %vm4709_vm7, %v8978_v49 }
  0xec   :  { %1277 = vrot.lane.b32.xlu1 %v1126_v0, %s4704_s21  ;;  %v2088_v33 = vsel %vm8973_vm8, %v4967_v14, %v704_v57  ;;  %v5501_v14 = vshrl.u32 %v5428_v53, 16  ;;  %v1929_v57 = vsel %vm8969_vm4, %v1926_v34, %v1928_v63  ;;  %v467_v34 = vor.u32 %v5331_v10, %v463_v46 }
  0xed   :  { %997 = vrot.lane.b32.xlu0 %v5474_v18, %s4700_s15  ;;  %v2175_v22 = vsel %vm2159_vm9, %v2088_v33, %v881_v13  ;;  %v1388_v13 = vrot.slane %v5483_v25, 2  ;;  %v5568_v33 = vshll.u32 %v5544_v48, 16  ;;  %v1720_v10 = vrot.slane %v5504_v31, 3 }
  0xee   :  { %v1264_v27 = vpop.permute.xlu1 %1263  ;;  %v1159_v44 = vrot.slane %v5501_v14, 1  ;;  %v1723_v46 = vrot.slane %v5571_v16, 2 }
  0xef   :  { %v984_v35 = vpop.permute.xlu0 %983 }
  0xf0   :  { %1454 = vrot.lane.b32.xlu1 %v5400_v36, %s4703_s20  ;;  %v2262_v38 = vsel %vm2246_vm10, %v2175_v22, %v984_v35  ;;  %v830_v36 = vrot.slane %v5483_v25, 1  ;;  %v5553_v17 = vor.u32 %v1160_v45, %v1159_v44  ;;  %v5588_v35 = vsel %vm9039_vm1, %v8963_v12, %v1388_v13 }
  0xf1   :  { %737 = vrot.lane.b32.xlu0 %v544_v29, %s4705_s22  ;;  %v2349_v50 = vsel %vm2333_vm11, %v2262_v38, %v1264_v27  ;;  %v471_v29 = vrot.slane %v5374_v21, 1  ;;  %v1390_v38 = vrot.slane %v5544_v48, 2  ;;  %v1724_v44 = vrot.slane %v5568_v33, 3 }
  0xf2   :  { %v1544_v42 = vpop.permute.xlu1 %1543  ;;  %v5551_v3 = vsel %vm8968_vm0, %v828_v5, %v830_v36  ;;  %v1166_v5 = vsel %vm8970_vm2, %v5553_v17, %v5555_v4 }
  0xf3   :  { %v1441_v51 = vpop.permute.xlu0 %1440  ;;  %v472_v47 = vsel %vm340_vm3, %v467_v34, %v471_v29  ;;  %v1948_v34 = vrot.slane %v5544_v48, 3 }
  0xf4   :  { %1557 = vrot.lane.b32.xlu1 %v5518_v9, %s4702_s19  ;;  %v2436_v56 = vsel %vm2420_vm12, %v2349_v50, %v1441_v51  ;;  %v5610_v51 = vsel %vm9039_vm1, %v1388_v13, %v1390_v38 }
  0xf5   :  { %914 = vrot.lane.b32.xlu0 %v5526_v43, %s4701_s16  ;;  %v2523_v39 = vsel %vm2507_vm13, %v2436_v56, %v1544_v42  ;;  %v1719_v42 = vrot.slane %v5507_v32, 2 }
  0xf6   :  { %v2001_v61 = vpop.permute.xlu1 %2000 }
  0xf7   :  { %v1824_v0 = vpop.permute.xlu0 %1823  ;;  %v5612_v56 = vor.u32 %v1720_v10, %v1719_v42 }
  0xf8   :  { %1837 = vrot.lane.b32.xlu1 %v1686_v52, %s4707_s26  ;;  %v2610_v20 = vsel %vm8981_vm14, %v2523_v39, %v1824_v0  ;;  %v5614_v52 = vor.u32 %v1724_v44, %v1723_v46  ;;  %v812_v39 = vrot.slane %v5441_v54, 1  ;;  %v1127_v0 = vrot.slane %v5464_v7, 1 }
  0xf9   :  { %1017 = vrot.lane.b32.xlu0 %v5551_v3, %s4700_s15  ;;  %v2697_v11 = vsel %vm8971_vm15, %v2610_v20, %v2001_v61  ;;  %9053 = vst [vmem:[#allocation6_spill] sm:$0xff] %v5612_v56  ;;  %v1128_v20 = vrot.slane %v5461_v6, 2 }
  0xfa   :  { %v883_v27 = vpop.permute.xlu1 %882  ;;  %4383 = vmatmul.mubr.msk.bf16.gmra.mxu0 %vm8972_vm6, %v2697_v11 }
  0xfb   :  { %v706_v22 = vpop.permute.xlu0 %705  ;;  %4386 = vmatprep.mubr.msk.bf16.mxu0 %vm4709_vm7, %v8978_v49  ;;  %v5643_v10 = vor.u32 %v1128_v20, %v1127_v0 }
  0xfc   :  { %2014 = vrot.lane.b32.xlu1 %v1929_v57, %s4706_s25  ;;  %v2090_v60 = vsel %vm8973_vm8, %v5003_v37, %v706_v22  ;;  %v5632_v22 = vld [vmem:[%s8955_s1 + $0x90] sm:$0xff]  }
  0xfd   :  { %1297 = vrot.lane.b32.xlu0 %v1166_v5, %s4704_s21  ;;  %v2177_v28 = vsel %vm2159_vm9, %v2090_v60, %v883_v27  ;;  %v1726_v27 = vsel %vm1618_vm5, %v5612_v56, %v5614_v52  ;;  %v8961_v5 = vrot.slane %v5483_v25, 3  ;;  %v5641_v60 = vsel %vm8968_vm0, %v810_v15, %v812_v39 }
  0xfe   :  { %v1266_v45 = vpop.permute.xlu1 %1265  ;;  %v5654_v8 = vshll.u32 %v5632_v22, 16  ;;  %v5657_v15 = vshrl.u32 %v5632_v22, 16 }
  0xff   :  { %v986_v50 = vpop.permute.xlu0 %985 }
 0x100   :  { %1474 = vrot.lane.b32.xlu1 %v5588_v35, %s4703_s20  ;;  %v2264_v37 = vsel %vm2246_vm10, %v2177_v28, %v986_v50  ;;  %v1130_v50 = vsel %vm8970_vm2, %v5436_v59, %v5643_v10  ;;  %v1688_v59 = vrot.slane %v5654_v8, 3 }
 0x101   :  { %719 = vrot.lane.b32.xlu0 %v472_v47, %s4705_s22  ;;  %v2351_v57 = vsel %vm2333_vm11, %v2264_v37, %v1266_v45  ;;  %v547_v37 = vor.u32 %v5501_v14, %v543_v19 }
 0x102   :  { %v1546_v61 = vpop.permute.xlu1 %1545 }
 0x103   :  { %v1443_v11 = vpop.permute.xlu0 %1442 }
 0x104   :  { %1577 = vrot.lane.b32.xlu1 %v5610_v51, %s4702_s19  ;;  %v2438_v13 = vsel %vm2420_vm12, %v2351_v57, %v1443_v11  ;;  %v1372_v57 = vrot.slane %v5632_v22, 2  ;;  %v1687_v11 = vrot.slane %v5657_v15, 2 }
 0x105   :  { %896 = vrot.lane.b32.xlu0 %v5474_v18, %s4701_s16  ;;  %v2525_v46 = vsel %vm2507_vm13, %v2438_v13, %v1546_v61  ;;  %v1949_v18 = vsel %vm8969_vm4, %v8961_v5, %v1948_v34  ;;  %v551_v61 = vrot.slane %v5504_v31, 1 }
 0x106   :  { %v2003_v42 = vpop.permute.xlu1 %2002 }
 0x107   :  { %v1826_v44 = vpop.permute.xlu0 %1825  ;;  %v552_v13 = vsel %vm340_vm3, %v547_v37, %v551_v61 }
 0x108   :  { %1857 = vrot.lane.b32.xlu1 %v1726_v27, %s4707_s26  ;;  %v2612_v45 = vsel %vm8981_vm14, %v2525_v46, %v1826_v44  ;;  %v5691_v46 = vsel %vm9039_vm1, %v1370_v62, %v1372_v57  ;;  %v5693_v44 = vor.u32 %v1688_v59, %v1687_v11 }
 0x109   :  { %999 = vrot.lane.b32.xlu0 %v5641_v60, %s4700_s15  ;;  %v2699_v47 = vsel %vm8971_vm15, %v2612_v45, %v2003_v42 }
 0x10a   :  { %v885_v28 = vpop.permute.xlu1 %884  ;;  %4387 = vmatmul.mubr.msk.bf16.gmra.mxu0 %vm8972_vm6, %v2699_v47  ;;  %v1167_v47 = vrot.slane %v5571_v16, 1  ;;  %v1690_v37 = vsel %vm1618_vm5, %v5520_v55, %v5693_v44 }
 0x10b   :  { %v708_v0 = vpop.permute.xlu0 %707  ;;  %4390 = vmatprep.mubr.msk.bf16.mxu0 %vm4709_vm7, %v8978_v49 }
 0x10c   :  { %2034 = vrot.lane.b32.xlu1 %v1949_v18, %s4706_s25  ;;  %v2092_v20 = vsel %vm8973_vm8, %v5037_v58, %v708_v0  ;;  %v832_v18 = vrot.slane %v5544_v48, 1  ;;  %v1930_v0 = vrot.slane %v5632_v22, 3 }
 0x10d   :  { %1279 = vrot.lane.b32.xlu0 %v1130_v50, %s4704_s21  ;;  %v2179_v27 = vsel %vm2159_vm9, %v2092_v20, %v885_v28  ;;  %v5710_v20 = vld [vmem:[%s8955_s1 + $0xe0] sm:$0xff]  }
 0x10e   :  { %v1268_v19 = vpop.permute.xlu1 %1267  ;;  %v5719_v59 = vsel %vm8968_vm0, %v830_v36, %v832_v18  ;;  %v5735_v36 = vshrl.u32 %v5710_v20, 16 }
 0x10f   :  { %v988_v42 = vpop.permute.xlu0 %987 }
 0x110   :  { %1456 = vrot.lane.b32.xlu1 %v5518_v9, %s4703_s20  ;;  %v2266_v58 = vsel %vm2246_vm10, %v2179_v27, %v988_v42  ;;  %v1168_v9 = vrot.slane %v5568_v33, 2  ;;  %v5732_v42 = vshll.u32 %v5710_v20, 16 }
 0x111   :  { %739 = vrot.lane.b32.xlu0 %v552_v13, %s4705_s22  ;;  %v2353_v28 = vsel %vm2333_vm11, %v2266_v58, %v1268_v19 }
 0x112   :  { %v1548_v45 = vpop.permute.xlu1 %1547  ;;  %v5721_v19 = vor.u32 %v1168_v9, %v1167_v47  ;;  %v479_v9 = vrot.slane %v5461_v6, 1 }
 0x113   :  { %v1445_v50 = vpop.permute.xlu0 %1444 }
 0x114   :  { %1559 = vrot.lane.b32.xlu1 %v5691_v46, %s4702_s19  ;;  %v2440_v62 = vsel %vm2420_vm12, %v2353_v28, %v1445_v50  ;;  %v1170_v47 = vsel %vm8970_vm2, %v5555_v4, %v5721_v19  ;;  %v1728_v4 = vrot.slane %v5732_v42, 3 }
 0x115   :  { %916 = vrot.lane.b32.xlu0 %v5551_v3, %s4701_s16  ;;  %v2527_v55 = vsel %vm2507_vm13, %v2440_v62, %v1548_v45  ;;  %v1931_v3 = vsel %vm8969_vm4, %v1928_v63, %v1930_v0  ;;  %v475_v63 = vor.u32 %v5377_v24, %v471_v29  ;;  %v1392_v62 = vrot.slane %v5710_v20, 2 }
 0x116   :  { %v2005_v11 = vpop.permute.xlu1 %2004 }
 0x117   :  { %v1828_v13 = vpop.permute.xlu0 %1827  ;;  %v480_v24 = vsel %vm340_vm3, %v475_v63, %v479_v9 }
 0x118   :  { %1839 = vrot.lane.b32.xlu1 %v1690_v37, %s4707_s26  ;;  %v2614_v27 = vsel %vm8981_vm14, %v2527_v55, %v1828_v13  ;;  %v1727_v37 = vrot.slane %v5735_v36, 2  ;;  %v5769_v55 = vsel %vm9039_vm1, %v1390_v38, %v1392_v62 }
 0x119   :  { %1019 = vrot.lane.b32.xlu0 %v5719_v59, %s4700_s15  ;;  %v2701_v58 = vsel %vm8971_vm15, %v2614_v27, %v2005_v11 }
 0x11a   :  { %v887_v45 = vpop.permute.xlu1 %886  ;;  %4391 = vmatmul.mubr.msk.bf16.gmra.mxu0 %vm8972_vm6, %v2701_v58  ;;  %v5771_v13 = vor.u32 %v1728_v4, %v1727_v37  ;;  %v1131_v58 = vrot.slane %v5657_v15, 1 }
 0x11b   :  { %v710_v28 = vpop.permute.xlu0 %709  ;;  %4394 = vmatprep.mubr.msk.bf16.mxu0 %vm4709_vm7, %v8978_v49 }
 0x11c   :  { %2016 = vrot.lane.b32.xlu1 %v1931_v3, %s4706_s25  ;;  %v2094_v50 = vsel %vm8973_vm8, %v5071_v23, %v710_v28  ;;  %v814_v3 = vrot.slane %v5632_v22, 1  ;;  %v1730_v63 = vsel %vm1618_vm5, %v5614_v52, %v5771_v13  ;;  %v1950_v28 = vrot.slane %v5710_v20, 3 }
 0x11d   :  { %1299 = vrot.lane.b32.xlu0 %v1170_v47, %s4704_s21  ;;  %v2181_v29 = vsel %vm2159_vm9, %v2094_v50, %v887_v45  ;;  %v5788_v50 = vld [vmem:[%s8955_s1 + $0x98] sm:$0xff]  }
 0x11e   :  { %v1270_v21 = vpop.permute.xlu1 %1269  ;;  %v5797_v4 = vsel %vm8968_vm0, %v812_v39, %v814_v3  ;;  %v5810_v54 = vshll.u32 %v5788_v50, 16  ;;  %v5813_v39 = vshrl.u32 %v5788_v50, 16  ;;  %v8975_v12 = vrot.slane %v5788_v50, 1 }
 0x11f   :  { %v990_v11 = vpop.permute.xlu0 %989 }
 0x120   :  { %1476 = vrot.lane.b32.xlu1 %v5610_v51, %s4703_s20  ;;  %v2268_v23 = vsel %vm2246_vm10, %v2181_v29, %v990_v11  ;;  %v1132_v51 = vrot.slane %v5654_v8, 2  ;;  %v1691_v31 = vrot.slane %v5813_v39, 2  ;;  %v1135_v40 = vrot.slane %v5813_v39, 1 }
 0x121   :  { %721 = vrot.lane.b32.xlu0 %v480_v24, %s4705_s22  ;;  %v2355_v45 = vsel %vm2333_vm11, %v2268_v23, %v1270_v21 }
 0x122   :  { %v1550_v27 = vpop.permute.xlu1 %1549  ;;  %v5799_v21 = vor.u32 %v1132_v51, %v1131_v58  ;;  %v559_v58 = vrot.slane %v5568_v33, 1  ;;  %v8976_v33 = vrot.slane %v5732_v42, 1 }
 0x123   :  { %v1447_v47 = vpop.permute.xlu0 %1446 }
 0x124   :  { %1579 = vrot.lane.b32.xlu1 %v5769_v55, %s4702_s19  ;;  %v2442_v38 = vsel %vm2420_vm12, %v2355_v45, %v1447_v47  ;;  %v1374_v45 = vrot.slane %v5788_v50, 2  ;;  %v4644_v47 = vld [vmem:[%s8955_s1 + $0x58] sm:$0xff]  }
 0x125   :  { %898 = vrot.lane.b32.xlu0 %v5641_v60, %s4701_s16  ;;  %v2529_v52 = vsel %vm2507_vm13, %v2442_v38, %v1550_v27  ;;  %v1951_v60 = vsel %vm8969_vm4, %v1948_v34, %v1950_v28  ;;  %v1134_v27 = vsel %vm8970_vm2, %v5643_v10, %v5799_v21  ;;  %v555_v34 = vor.u32 %v5507_v32, %v551_v61 }
 0x126   :  { %v2007_v37 = vpop.permute.xlu1 %2006  ;;  %v1692_v32 = vrot.slane %v5810_v54, 3  ;;  %v3347_v61 = vlaneseq }
 0x127   :  { %v1830_v24 = vpop.permute.xlu0 %1829 }
 0x128   :  { %1859 = vrot.lane.b32.xlu1 %v1730_v63, %s4707_s26  ;;  %v2616_v29 = vsel %vm8981_vm14, %v2529_v52, %v1830_v24  ;;  %v560_v63 = vsel %vm340_vm3, %v555_v34, %v559_v58  ;;  %v1172_v34 = vrot.slane %v5732_v42, 2 }
 0x129   :  { %1001 = vrot.lane.b32.xlu0 %v5797_v4, %s4700_s15  ;;  %v2703_v11 = vsel %vm8971_vm15, %v2616_v29, %v2007_v37  ;;  %v5849_v29 = vsel %vm9039_vm1, %v1372_v57, %v1374_v45 }
 0x12a   :  { %v889_v23 = vpop.permute.xlu1 %888  ;;  %4395 = vmatmul.mubr.msk.bf16.gmra.mxu0 %vm8972_vm6, %v2703_v11  ;;  %v5853_v11 = vshrl.u32 %v3347_v61, 7  ;;  %v5873_v61 = vld [vmem:[%s8955_s1 + $0xe8] sm:$0xff]  }
 0x12b   :  { %v712_v51 = vpop.permute.xlu0 %711  ;;  %4398 = vmatprep.mubr.msk.bf16.mxu0 %vm4709_vm7, %v8978_v49 }
 0x12c   :  { %2036 = vrot.lane.b32.xlu1 %v1951_v60, %s4706_s25  ;;  %v2096_v10 = vsel %vm8973_vm8, %v4644_v47, %v712_v51  ;;  %v5851_v60 = vor.u32 %v1692_v32, %v1691_v31  ;;  %v5860_v51 = vadd.s32 8, %v5853_v11  ;;  %v8967_v32 = vrot.slane %v5788_v50, 3 }
 0x12d   :  { %1281 = vrot.lane.b32.xlu0 %v1134_v27, %s4704_s21  ;;  %v2183_v37 = vsel %vm2159_vm9, %v2096_v10, %v889_v23  ;;  %v834_v27 = vrot.slane %v5710_v20, 1  ;;  %v5928_v5 = vadd.s32 16, %v5853_v11  ;;  %v6195_v56 = vadd.s32 56, %v5853_v11 }
 0x12e   :  { %v1272_v38 = vpop.permute.xlu1 %1271  ;;  %v1694_v31 = vsel %vm1618_vm5, %v5693_v44, %v5851_v60  ;;  %v1933_v48 = vsel %vm8969_vm4, %v1930_v0, %v8967_v32  ;;  %v483_v0 = vor.u32 %v5464_v7, %v479_v9 }
 0x12f   :  { %v992_v52 = vpop.permute.xlu0 %991 }
 0x130   :  { %1458 = vrot.lane.b32.xlu1 %v5691_v46, %s4703_s20  ;;  %v2270_v24 = vsel %vm2246_vm10, %v2183_v37, %v992_v52  ;;  %v1171_v46 = vrot.slane %v5735_v36, 1  ;;  %v5883_v37 = vsel %vm8968_vm0, %v832_v18, %v834_v27  ;;  %v3392_v52 = vcvt.s32.f32 %v5860_v51 }
 0x131   :  { %741 = vrot.lane.b32.xlu0 %v560_v63, %s4705_s22  ;;  %v2357_v47 = vsel %vm2333_vm11, %v2270_v24, %v1272_v38  ;;  %v3391_v63 = vcvt.s32.f32 %v5853_v11  ;;  %v5897_v18 = vshll.u32 %v5873_v61, 16 }
 0x132   :  { %v1552_v23 = vpop.permute.xlu1 %1551  ;;  %v5885_v44 = vor.u32 %v1172_v34, %v1171_v46  ;;  %v5900_v46 = vshrl.u32 %v5873_v61, 16 }
 0x133   :  { %v1449_v57 = vpop.permute.xlu0 %1448  ;;  %v3435_v51 = vmul.f32 0.055555556, %v3391_v63  ;;  %v1732_v7 = vrot.slane %v5897_v18, 3 }
 0x134   :  { %1561 = vrot.lane.b32.xlu1 %v5849_v29, %s4702_s19  ;;  %v2444_v10 = vsel %vm2420_vm12, %v2357_v47, %v1449_v57  ;;  %v1174_v57 = vsel %vm8970_vm2, %v5721_v19, %v5885_v44  ;;  %v8966_v19 = vrot.slane %v5873_v61, 2  ;;  %v1731_v6 = vrot.slane %v5900_v46, 2 }
 0x135   :  { %918 = vrot.lane.b32.xlu0 %v5719_v59, %s4701_s16  ;;  %v2531_v24 = vsel %vm2507_vm13, %v2444_v10, %v1552_v23  ;;  %v8965_v10 = vrot.slane %v5654_v8, 1 }
 0x136   :  { %v2009_v38 = vpop.permute.xlu1 %2008 }
 0x137   :  { %v1832_v47 = vpop.permute.xlu0 %1831 }
 0x138   :  { %1841 = vrot.lane.b32.xlu1 %v1694_v31, %s4707_s26  ;;  %v2618_v59 = vsel %vm8981_vm14, %v2531_v24, %v1832_v47  ;;  %v3436_v31 = vmul.f32 0.055555556, %v3392_v52 }
 0x139   :  { %1021 = vrot.lane.b32.xlu0 %v5883_v37, %s4700_s15  ;;  %v2705_v23 = vsel %vm8971_vm15, %v2618_v59, %v2009_v38  ;;  %v4645_v38 = vld [vmem:[%s8955_s1 + $0x60] sm:$0xff]   ;;  %v3478_v59 = vfloor.f32 %v3435_v51 }
 0x13a   :  { %v891_v34 = vpop.permute.xlu1 %890  ;;  %4399 = vmatmul.mubr.msk.bf16.gmra.mxu0 %vm8972_vm6, %v2705_v23  ;;  %v3479_v23 = vfloor.f32 %v3436_v31  ;;  %v5943_v31 = vor.u32 %v1732_v7, %v1731_v6 }
 0x13b   :  { %v714_v24 = vpop.permute.xlu0 %713  ;;  %4402 = vmatprep.mubr.msk.bf16.mxu0 %vm4709_vm7, %v8978_v49 }
 0x13c   :  { %2018 = vrot.lane.b32.xlu1 %v1933_v48, %s4706_s25  ;;  %v2098_v47 = vsel %vm8973_vm8, %v4645_v38, %v714_v24  ;;  %v488_v48 = vsel %vm340_vm3, %v483_v0, %v8965_v10  ;;  %v5941_v0 = vsel %vm9039_vm1, %v1392_v62, %v8966_v19  ;;  %v3522_v30 = vmul.f32 18.0, %v3479_v23  ;;  %v5964_v19 = vld [vmem:[%s8955_s1 + $0xa0] sm:$0xff]  }
 0x13d   :  { %1301 = vrot.lane.b32.xlu0 %v1174_v57, %s4704_s21  ;;  %v2185_v24 = vsel %vm2159_vm9, %v2098_v47, %v891_v34  ;;  %v1136_v57 = vrot.slane %v5810_v54, 2  ;;  %v3521_v47 = vmul.f32 18.0, %v3478_v59  ;;  %v8974_v62 = vrot.slane %v5873_v61, 3 }
 0x13e   :  { %v1274_v9 = vpop.permute.xlu1 %1273 }
 0x13f   :  { %v994_v38 = vpop.permute.xlu0 %993  ;;  %v5955_v6 = vor.u32 %v1136_v57, %v1135_v40  ;;  %v5974_v40 = vsel %vm8968_vm0, %v814_v3, %v8975_v12  ;;  %vm5991_vm0 = vcmp.lt.f32.partialorder %v3478_v59, 16.0 }
 0x140   :  { %1478 = vrot.lane.b32.xlu1 %v5769_v55, %s4703_s20  ;;  %v2272_v51 = vsel %vm2246_vm10, %v2185_v24, %v994_v38  ;;  %v5947_v55 = vadd.s32 24, %v5853_v11  ;;  %v3393_v24 = vcvt.s32.f32 %v5928_v5 }
 0x141   :  { %723 = vrot.lane.b32.xlu0 %v488_v48, %s4705_s22  ;;  %v2359_v38 = vsel %vm2333_vm11, %v2272_v51, %v1274_v9  ;;  %v1734_v48 = vsel %vm1618_vm5, %v5771_v13, %v5943_v31  ;;  %v3564_v51 = vsub.f32 %v3391_v63, %v3521_v47  ;;  %v3565_v13 = vsub.f32 %v3392_v52, %v3522_v30  ;;  %v6015_v47 = vld [vmem:[%s8958_s4 + $0x1] ss:$0 sm:$0xff] }
 0x142   :  { %v1554_v34 = vpop.permute.xlu1 %1553  ;;  %v3394_v32 = vcvt.s32.f32 %v5947_v55  ;;  %v1138_v22 = vsel %vm8970_vm2, %v5799_v21, %v5955_v6  ;;  %v5996_v63 = vshll.u32 %v5964_v19, 16  ;;  %v5999_v52 = vshrl.u32 %v5964_v19, 16 }
 0x143   :  { %v1451_v10 = vpop.permute.xlu0 %1450  ;;  %v563_v21 = vor.u32 %v5571_v16, %v559_v58  ;;  %vm6017_vm2 = vcmp.lt.f32.partialorder %v3479_v23, 16.0  ;;  %v4646_v23 = vld [vmem:[%s8955_s1 + $0x68] sm:$0xff]  }
 0x144   :  { %1581 = vrot.lane.b32.xlu1 %v5941_v0, %s4702_s19  ;;  %v2446_v7 = vsel %vm2420_vm12, %v2359_v38, %v1451_v10  ;;  %v5978_v10 = vmul.f32 0.055555556, %v3393_v24  ;;  %v6009_v59 = vmul.f32 0.055555556, %v3394_v32 }
 0x145   :  { %900 = vrot.lane.b32.xlu0 %v5797_v4, %s4701_s16  ;;  %v2533_v57 = vsel %vm2507_vm13, %v2446_v7, %v1554_v34  ;;  %v1953_v4 = vsel %vm8969_vm4, %v1950_v28, %v8974_v62  ;;  %vm3650_vm4 = vcmp.lt.f32.partialorder %v3564_v51, 16.0 }
 0x146   :  { %v2011_v9 = vpop.permute.xlu1 %2010  ;;  %v3480_v16 = vfloor.f32 %v5978_v10  ;;  %v1695_v10 = vrot.slane %v5999_v52, 2  ;;  %v3481_v51 = vfloor.f32 %v6009_v59 }
 0x147   :  { %v1834_v38 = vpop.permute.xlu0 %1833 }
 0x148   :  { %1861 = vrot.lane.b32.xlu1 %v1734_v48, %s4707_s26  ;;  %v2620_v30 = vsel %vm8981_vm14, %v2533_v57, %v1834_v38  ;;  %v8977_v48 = vrot.slane %v5964_v19, 2  ;;  %v1696_v38 = vrot.slane %v5996_v63, 3 }
 0x149   :  { %1003 = vrot.lane.b32.xlu0 %v5974_v40, %s4700_s15  ;;  %v2707_v28 = vsel %vm8971_vm15, %v2620_v30, %v2011_v9  ;;  %vm3651_vm15 = vcmp.lt.f32.partialorder %v3565_v13, 16.0 }
 0x14a   :  { %v893_v34 = vpop.permute.xlu1 %892  ;;  %4403 = vmatmul.mubr.msk.bf16.gmra.mxu0 %vm8972_vm6, %v2707_v28  ;;  %vm3693_vm6 = vmand %vm5991_vm0, %vm3650_vm4  ;;  %v6059_v13 = vsel %vm9039_vm1, %v1374_v45, %v8977_v48  ;;  %v6065_v7 = vor.u32 %v1696_v38, %v1695_v10  ;;  %v6071_v45 = vadd.s32 40, %v5853_v11  ;;  %v1175_v10 = vrot.slane %v5900_v46, 1 }
 0x14b   :  { %v716_v58 = vpop.permute.xlu0 %715  ;;  %4406 = vmatprep.mubr.msk.bf16.mxu0 %vm4709_vm7, %v8978_v49  ;;  %v6049_v62 = vsel %vm3693_vm6, 0.00390625, %v8978_v49  ;;  %v1176_v38 = vrot.slane %v5897_v18, 2  ;;  %vm9060_vm0 = vcmask 1046528   ;;  %vm9062_vm6 = vcmask 1044480  }
 0x14c   :  { %2038 = vrot.lane.b32.xlu1 %v1953_v4, %s4706_s25  ;;  %v2100_v9 = vsel %vm8973_vm8, %v4646_v23, %v716_v58  ;;  %v2918_v57 = vpop.f32.mrf.mxu0  ;;  %v6037_v4 = vadd.s32 32, %v5853_v11  ;;  %vm3694_vm8 = vmand %vm6017_vm2, %vm3651_vm15  ;;  %v568_v58 = vsel %vm340_vm3, %v563_v21, %v8976_v33  ;;  %v3523_v23 = vmul.f32 18.0, %v3480_v16  ;;  %9058 = vst [vmem:[#allocation7_spill] sm:$0xff] %v6049_v62 }
 0x14d   :  { %v2919_v30 = vadd.f32 %v6015_v47, %v2918_v57  ;;  %1283 = vrot.lane.b32.xlu0 %v1138_v22, %s4704_s21  ;;  %v2187_v57 = vsel %vm2159_vm9, %v2100_v9, %v893_v34  ;;  %v6063_v59 = vsel %vm3694_vm8, 0.00390625, %v8978_v49  ;;  %v3524_v33 = vmul.f32 18.0, %v3481_v51 }
 0x14e   :  { %v1276_v28 = vpop.permute.xlu1 %1275  ;;  %v4356_v3 = vpop.f32.mrf.mxu0  ;;  %9059 = vst [vmem:[#allocation8_spill] sm:$0xff] %v6063_v59  ;;  %v8980_v34 = vcvt.s32.f32 %v6037_v4  ;;  %v1698_v5 = vsel %vm1618_vm5, %v5851_v60, %v6065_v7  ;;  %vm3609_vm2 = vcmp.lt.f32.partialorder %v3480_v16, 16.0  ;;  %vm9065_vm15 = vcmask 261120  }
 0x14f   :  { %v996_v12 = vpop.permute.xlu0 %995  ;;  %v3261_v9 = vmax.f32 %v2919_v30, 0.0  ;;  %v3567_v60 = vsub.f32 %v3394_v32, %v3524_v33  ;;  %v9061_v32 = vrot.slane %v5788_v50, 3 }
 0x150   :  { %1460 = vrot.lane.b32.xlu1 %v5849_v29, %s4703_s20  ;;  %v2274_v22 = vsel %vm2246_vm10, %v2187_v57, %v996_v12  ;;  %v2921_v21 = vpop.f32.mrf.mxu0  ;;  %v8983_v12 = vrot.slane %v5873_v61, 1  ;;  %v3566_v57 = vsub.f32 %v3393_v24, %v3523_v23  ;;  %v6089_v24 = vld [vmem:[%s8955_s1 + $0xf0] sm:$0xff]  }
 0x151   :  { %v2922_v29 = vadd.f32 %v6015_v47, %v2921_v21  ;;  %743 = vrot.lane.b32.xlu0 %v568_v58, %s4705_s22  ;;  %v2361_v21 = vsel %vm2333_vm11, %v2274_v22, %v1276_v28  ;;  %v8982_v58 = vrot.slane %v5964_v19, 3  ;;  %v6093_v28 = vmul.f32 0.055555556, %v8980_v34 }
 0x152   :  { %v1556_v3 = vpop.permute.xlu1 %1555  ;;  %v4357_v48 = vpop.f32.mrf.mxu0  ;;  %v3779_v23 = vmul.f32 %v6049_v62, %v3261_v9  ;;  %vm3652_vm4 = vcmp.lt.f32.partialorder %v3566_v57, 16.0  ;;  %v6109_v9 = vor.u32 %v1176_v38, %v1175_v10  ;;  %v6123_v33 = vshrl.u32 %v6089_v24, 16 }
 0x153   :  { %v3262_v30 = vmax.f32 %v2922_v29, 0.0  ;;  %v1453_v49 = vpop.permute.xlu0 %1452  ;;  %v8985_v29 = vcvt.s32.f32 %v6071_v45  ;;  %v1935_v55 = vsel %vm9062_vm6, %v9061_v32, %v8982_v58  ;;  %v3482_v16 = vfloor.f32 %v6093_v28  ;;  %vm6128_vm8 = vmand %vm3609_vm2, %vm3652_vm4 }
 0x154   :  { %1563 = vrot.lane.b32.xlu1 %v6059_v13, %s4702_s19  ;;  %v2448_v48 = vsel %vm2420_vm12, %v2361_v21, %v1453_v49  ;;  %v6107_v21 = vsel %vm9060_vm0, %v834_v27, %v8983_v12  ;;  %v6120_v27 = vshll.u32 %v6089_v24, 16  ;;  %vm6135_vm0 = vcmp.lt.f32.partialorder %v3481_v51, 16.0 }
 0x155   :  { %v3780_v22 = vmul.f32 %v6063_v59, %v3262_v30  ;;  %920 = vrot.lane.b32.xlu0 %v5883_v37, %s4701_s16  ;;  %v2535_v37 = vsel %vm2507_vm13, %v2448_v48, %v1556_v3  ;;  %vm3653_vm6 = vcmp.lt.f32.partialorder %v3567_v60, 16.0  ;;  %v6141_v38 = vmul.f32 0.055555556, %v8985_v29 }
 0x156   :  { %v2013_v49 = vpop.permute.xlu1 %2012  ;;  %vm9069_vm2 = vsmask.f32 6400  ;;  %v9070_v28 = vrot.slane %v5654_v8, 1  ;;  %v8984_v51 = vrot.slane %v5810_v54, 1  ;;  %v8991_v60 = vrot.slane %v6089_v24, 2 }
 0x157   :  { %v3865_v30 = vadd.f32 %v3780_v22, %v3779_v23  ;;  %v1836_v34 = vpop.permute.xlu0 %1835  ;;  %v1736_v32 = vrot.slane %v6120_v27, 3  ;;  %v1139_v29 = vrot.slane %v5999_v52, 1  ;;  %vm9076_vm4 = vcmask 31744  }
 0x158   :  { %1843 = vrot.lane.b32.xlu1 %v1698_v5, %s4707_s26  ;;  %v2622_v20 = vsel %vm8981_vm14, %v2535_v37, %v1836_v34  ;;  %vm9068_vm14 = vcmask 293888   ;;  %v1178_v5 = vsel %vm9069_vm2, %v5885_v44, %v6109_v9  ;;  %v491_v23 = vor.u32 %v5657_v15, %v9070_v28 }
 0x159   :  { %1023 = vrot.lane.b32.xlu0 %v6107_v21, %s4700_s15  ;;  %v2709_v57 = vsel %vm9065_vm15, %v2622_v20, %v2013_v49  ;;  %v9071_v37 = vmov 0.0   ;;  %v1735_v15 = vrot.slane %v6123_v33, 2  ;;  %v3525_v20 = vmul.f32 18.0, %v3482_v16 }
 0x15a   :  { %v6133_v10 = vpop.permute.xlu1 %894  ;;  %v2926_v48 = vpop.f32.mrf.mxu0  ;;  %4407 = vmatmul.mubr.msk.bf16.gmra.mxu0 %vm9068_vm14, %v2709_v57  ;;  %v6159_v44 = vsel %vm6128_vm8, 0.00390625, %v9071_v37  ;;  %vm3696_vm14 = vmand %vm6135_vm0, %vm3653_vm6  ;;  %v496_v3 = vsel %vm340_vm3, %v491_v23, %v8984_v51  ;;  %vm6211_vm8 = vcmp.lt.f32.partialorder %v3482_v16, 16.0  ;;  %vm9081_vm0 = vcmask 1046528  }
 0x15b   :  { %v2927_v22 = vadd.f32 %v6015_v47, %v2926_v48  ;;  %v718_v49 = vpop.permute.xlu0 %717  ;;  %4410 = vmatprep.mubr.msk.bf16.mxu0 %vm4709_vm7, %v9071_v37  ;;  %9072 = vst [vmem:[#allocation9_spill] sm:$0xff] %v6159_v44  ;;  %v3483_v48 = vfloor.f32 %v6141_v38  ;;  %v6176_v12 = vsel %vm3696_vm14, 0.00390625, %v9071_v37  ;;  %v9074_v38 = vrot.slane %v5873_v61, 2 }
 0x15c   :  { %2020 = vrot.lane.b32.xlu1 %v1935_v55, %s4706_s25  ;;  %v4360_v8 = vpop.f32.mrf.mxu0  ;;  %9073 = vst [vmem:[#allocation10_spill] sm:$0xff] %v6176_v12  ;;  %v6187_v51 = vor.u32 %v1736_v32, %v1735_v15  ;;  %vm9085_vm2 = vcmask 1044480   ;;  %vm9086_vm14 = vsmask.f32 6400 }
 0x15d   :  { %v3263_v55 = vmax.f32 %v2927_v22, 0.0  ;;  %1303 = vrot.lane.b32.xlu0 %v1178_v5, %s4704_s21  ;;  %v6171_v8 = vadd.s32 48, %v5853_v11  ;;  %v6185_v5 = vsel %vm9039_vm1, %v9074_v38, %v8991_v60  ;;  %v3526_v25 = vmul.f32 18.0, %v3483_v48 }
 0x15e   :  { %v1278_v57 = vpop.permute.xlu1 %1277  ;;  %v2929_v28 = vpop.f32.mrf.mxu0  ;;  %v8993_v38 = vrot.slane %v5964_v19, 1 }
 0x15f   :  { %v3781_v34 = vmul.f32 %v6159_v44, %v3263_v55  ;;  %v2930_v58 = vadd.f32 %v6015_v47, %v2929_v28  ;;  %v998_v22 = vpop.permute.xlu0 %997  ;;  %v9075_v55 = vcvt.s32.f32 %v6037_v4  ;;  %v1140_v44 = vrot.slane %v5996_v63, 2  ;;  %v4647_v4 = vld [vmem:[%s8955_s1 + $0x70] sm:$0xff]  }
 0x160   :  { %1480 = vrot.lane.b32.xlu1 %v5941_v0, %s4703_s20  ;;  %v4361_v23 = vpop.f32.mrf.mxu0  ;;  %v8995_v15 = vcvt.s32.f32 %v6171_v8  ;;  %v2102_v32 = vsel %vm9076_vm4, %v4647_v4, %v718_v49  ;;  %v8994_v4 = vcvt.s32.f32 %v6195_v56  ;;  %vm6267_vm4 = vcmp.lt.f32.partialorder %v3483_v48, 16.0 }
 0x161   :  { %v3568_v28 = vsub.f32 %v9075_v55, %v3525_v20  ;;  %v3866_v59 = vadd.f32 %v3865_v30, %v3781_v34  ;;  %v3264_v62 = vmax.f32 %v2930_v58, 0.0  ;;  %725 = vrot.lane.b32.xlu0 %v496_v3, %s4705_s22  ;;  %v1738_v20 = vsel %vm1618_vm5, %v5943_v31, %v6187_v51 }
 0x162   :  { %v1455_v0 = vpop.permute.xlu1 %1454  ;;  %v8992_v34 = vrot.slane %v6089_v24, 3  ;;  %v6216_v23 = vor.u32 %v1140_v44, %v1139_v29  ;;  %v9079_v31 = vcvt.s32.f32 %v6071_v45  ;;  %v2189_v29 = vsel %vm2159_vm9, %v2102_v32, %v6133_v10 }
 0x163   :  { %v3782_v30 = vmul.f32 %v6176_v12, %v3264_v62  ;;  %v6204_v58 = vpop.permute.xlu0 %737  ;;  %v6221_v62 = vld [vmem:[%s8955_s1 + $0xa8] sm:$0xff]   ;;  %vm3654_vm15 = vcmp.lt.f32.partialorder %v3568_v28, 16.0  ;;  %v9080_v44 = vrot.slane %v5788_v50, 1  ;;  %v9084_v50 = vrot.slane %v5873_v61, 3 }
 0x164   :  { %1583 = vrot.lane.b32.xlu1 %v6185_v5, %s4702_s19  ;;  %v3569_v16 = vsub.f32 %v9079_v31, %v3526_v25  ;;  %vm6247_vm6 = vmand %vm6211_vm8, %vm3654_vm15  ;;  %v6257_v28 = vshll.u32 %v6221_v62, 16  ;;  %v6273_v3 = vmul.f32 0.055555556, %v8994_v4 }
 0x165   :  { %v3867_v49 = vadd.f32 %v3866_v59, %v3782_v30  ;;  %902 = vrot.lane.b32.xlu0 %v5974_v40, %s4701_s16  ;;  %v6235_v60 = vsel %vm9081_vm0, %v9080_v44, %v8993_v38  ;;  %v6239_v40 = vmul.f32 0.055555556, %v8995_v15  ;;  %v2276_v59 = vsel %vm2246_vm10, %v2189_v29, %v998_v22 }
 0x166   :  { %v1558_v55 = vpop.permute.xlu1 %1557  ;;  %v1955_v10 = vsel %vm9085_vm2, %v9084_v50, %v8992_v34  ;;  %v6260_v22 = vshrl.u32 %v6221_v62, 16  ;;  %v1142_v30 = vsel %vm9086_vm14, %v5955_v6, %v6216_v23  ;;  %vm3655_vm8 = vcmp.lt.f32.partialorder %v3569_v16, 16.0 }
 0x167   :  { %v6242_v45 = vpop.permute.xlu0 %914  ;;  %v2363_v31 = vsel %vm2333_vm11, %v2276_v59, %v1278_v57  ;;  %v9089_v44 = vrot.slane %v5732_v42, 1  ;;  %v8996_v34 = vrot.slane %v5897_v18, 1  ;;  %v3484_v6 = vfloor.f32 %v6239_v40  ;;  %vm3698_vm15 = vmand %vm6267_vm4, %vm3655_vm8 }
 0x168   :  { %1863 = vrot.lane.b32.xlu1 %v1738_v20, %s4707_s26  ;;  %v2450_v48 = vsel %vm2420_vm12, %v2363_v31, %v1455_v0  ;;  %v6286_v4 = vsel %vm6247_vm6, 0.00390625, %v9071_v37  ;;  %v8997_v42 = vrot.slane %v6221_v62, 2  ;;  %v1699_v0 = vrot.slane %v6260_v22, 2 }
 0x169   :  { %1005 = vrot.lane.b32.xlu0 %v6235_v60, %s4700_s15  ;;  %v571_v50 = vor.u32 %v5735_v36, %v9089_v44  ;;  %9090 = vst [vmem:[#allocation11_spill] sm:$0xff] %v6286_v4  ;;  %v2537_v36 = vsel %vm2507_vm13, %v2450_v48, %v1558_v55  ;;  %v1700_v40 = vrot.slane %v6257_v28, 3  ;;  %v6299_v59 = vadd.s32 64, %v5853_v11 }
 0x16a   :  { %v1838_v32 = vpop.permute.xlu1 %1837  ;;  %v2934_v29 = vpop.f32.mrf.mxu0  ;;  %vm9091_vm0 = vcmask 228352   ;;  %v3485_v55 = vfloor.f32 %v6273_v3  ;;  %vm9092_vm6 = vcmask 261120   ;;  %v3527_v44 = vmul.f32 18.0, %v3484_v6 }
 0x16b   :  { %v2935_v38 = vadd.f32 %v6015_v47, %v2934_v29  ;;  %v6288_v15 = vpop.permute.xlu0 %1017  ;;  %v2624_v31 = vsel %vm9091_vm0, %v2537_v36, %v1838_v32  ;;  %v576_v20 = vsel %vm340_vm3, %v571_v50, %v8996_v34  ;;  %vm9094_vm2 = vcmask 293888  }
 0x16c   :  { %2040 = vrot.lane.b32.xlu1 %v1955_v10, %s4706_s25  ;;  %v4364_v57 = vpop.f32.mrf.mxu0  ;;  %v6323_v36 = vor.u32 %v1700_v40, %v1699_v0  ;;  %v3528_v34 = vmul.f32 18.0, %v3485_v55  ;;  %v9096_v40 = vcvt.s32.f32 %v6171_v8  ;;  %v9098_v0 = vcvt.s32.f32 %v6195_v56 }
 0x16d   :  { %v3265_v25 = vmax.f32 %v2935_v38, 0.0  ;;  %1285 = vrot.lane.b32.xlu0 %v1142_v30, %s4704_s21  ;;  %v6311_v38 = vsel %vm3698_vm15, 0.00390625, %v9071_v37  ;;  %v9095_v30 = vrot.slane %v5964_v19, 2  ;;  %vm9101_vm14 = vcmask 1046528  }
 0x16e   :  { %v2015_v10 = vpop.permute.xlu1 %2014  ;;  %v2937_v29 = vpop.f32.mrf.mxu0  ;;  %9093 = vst [vmem:[#allocation12_spill] sm:$0xff] %v6311_v38  ;;  %vm3613_vm4 = vcmp.lt.f32.partialorder %v3484_v6, 16.0  ;;  %vm9102_vm15 = vcmask 31744   ;;  %vm9104_vm0 = vcmask 1044480  }
 0x16f   :  { %v2711_v16 = vsel %vm9092_vm6, %v2624_v31, %v2015_v10  ;;  %v3783_v48 = vmul.f32 %v6286_v4, %v3265_v25  ;;  %v2938_v57 = vadd.f32 %v6015_v47, %v2937_v29  ;;  %v1298_v32 = vpop.permute.xlu0 %1297  ;;  %v6321_v3 = vsel %vm9039_vm1, %v9095_v30, %v8997_v42 }
 0x170   :  { %1462 = vrot.lane.b32.xlu1 %v6059_v13, %s4703_s20  ;;  %4411 = vmatmul.mubr.msk.bf16.gmra.mxu0 %vm9094_vm2, %v2711_v16  ;;  %v4365_v50 = vpop.f32.mrf.mxu0  ;;  %v1179_v25 = vrot.slane %v6123_v33, 1  ;;  %v1180_v31 = vrot.slane %v6120_v27, 2  ;;  %v6332_v30 = vadd.s32 72, %v5853_v11  ;;  %vm9105_vm6 = vsmask.f32 6400 }
 0x171   :  { %4414 = vmatprep.mubr.msk.bf16.mxu0 %vm4709_vm7, %v9071_v37  ;;  %v3868_v13 = vadd.f32 %v3867_v49, %v3783_v48  ;;  %v3266_v29 = vmax.f32 %v2938_v57, 0.0  ;;  %745 = vrot.lane.b32.xlu0 %v576_v20, %s4705_s22  ;;  %v3570_v50 = vsub.f32 %v9096_v40, %v3527_v44  ;;  %v6345_v49 = vld [vmem:[%s8955_s1 + $0xf8] sm:$0xff]   ;;  %v1702_v20 = vsel %vm1618_vm5, %v6065_v7, %v6323_v36 }
 0x172   :  { %v1475_v16 = vpop.permute.xlu1 %1474  ;;  %v9000_v48 = vrot.slane %v6221_v62, 3  ;;  %v6351_v8 = vor.u32 %v1180_v31, %v1179_v25  ;;  %v9097_v44 = vcvt.s32.f32 %v6299_v59  ;;  %v9002_v4 = vcvt.s32.f32 %v6332_v30 }
 0x173   :  { %v3784_v42 = vmul.f32 %v6311_v38, %v3266_v29  ;;  %v6338_v10 = vpop.permute.xlu0 %719  ;;  %v3571_v38 = vsub.f32 %v9098_v0, %v3528_v34  ;;  %v9099_v7 = vrot.slane %v6089_v24, 1  ;;  %v9100_v25 = vrot.slane %v5873_v61, 1 }
 0x174   :  { %1565 = vrot.lane.b32.xlu1 %v6321_v3, %s4702_s19  ;;  %v6355_v57 = vmul.f32 0.055555556, %v9097_v44  ;;  %vm3656_vm8 = vcmp.lt.f32.partialorder %v3570_v50, 16.0  ;;  %v6383_v61 = vshll.u32 %v6345_v49, 16  ;;  %v6386_v34 = vshrl.u32 %v6345_v49, 16 }
 0x175   :  { %v6357_v29 = vadd.f32 %v3868_v13, %v3784_v42  ;;  %922 = vrot.lane.b32.xlu0 %v6107_v21, %s4701_s16  ;;  %v6369_v31 = vsel %vm9101_vm14, %v9100_v25, %v9099_v7  ;;  %v6374_v42 = vld [vmem:[%s8955_s1 + $0xc0] sm:$0xff]   ;;  %v9103_v13 = vrot.slane %v5964_v19, 3  ;;  %vm6403_vm2 = vmand %vm3613_vm4, %vm3656_vm8  ;;  %vm6407_vm14 = vcmp.lt.f32.partialorder %v3485_v55, 16.0 }
 0x176   :  { %v1578_v40 = vpop.permute.xlu1 %1577  ;;  %v2122_v56 = vsel %vm9102_vm15, %v6374_v42, %v6204_v58  ;;  %v1182_v58 = vsel %vm9105_vm6, %v6109_v9, %v6351_v8  ;;  %v3486_v50 = vfloor.f32 %v6355_v57  ;;  %vm3657_vm15 = vcmp.lt.f32.partialorder %v3571_v38, 16.0 }
 0x177   :  { %v6379_v21 = vpop.permute.xlu0 %896  ;;  %v2209_v6 = vsel %vm2159_vm9, %v2122_v56, %v6242_v45  ;;  %v1937_v0 = vsel %vm9104_vm0, %v9103_v13, %v9000_v48  ;;  %v6413_v9 = vmul.f32 0.055555556, %v9002_v4  ;;  %v9110_v25 = vrot.slane %v5810_v54, 1  ;;  %vm3700_vm4 = vmand %vm6407_vm14, %vm3657_vm15 }
 0x178   :  { %1845 = vrot.lane.b32.xlu1 %v1702_v20, %s4707_s26  ;;  %v2296_v20 = vsel %vm2246_vm10, %v2209_v6, %v6288_v15  ;;  %v9004_v6 = vrot.slane %v5996_v63, 1  ;;  %v9003_v13 = vrot.slane %v6345_v49, 2  ;;  %v1739_v4 = vrot.slane %v6386_v34, 2 }
 0x179   :  { %1025 = vrot.lane.b32.xlu0 %v6369_v31, %s4700_s15  ;;  %v2383_v57 = vsel %vm2333_vm11, %v2296_v20, %v1298_v32  ;;  %v499_v56 = vor.u32 %v5813_v39, %v9110_v25  ;;  %v1740_v32 = vrot.slane %v6383_v61, 3  ;;  %v6432_v39 = vsel %vm6403_vm2, 0.00390625, %v9071_v37 }
 0x17a   :  { %v1858_v44 = vpop.permute.xlu1 %1857  ;;  %v2942_v15 = vpop.f32.mrf.mxu0  ;;  %v2470_v55 = vsel %vm2420_vm12, %v2383_v57, %v1475_v16  ;;  %9111 = vst [vmem:[#allocation13_spill] sm:$0xff] %v6432_v39  ;;  %v3529_v16 = vmul.f32 18.0, %v3486_v50  ;;  %v6438_v57 = vadd.s32 80, %v5853_v11  ;;  %vm9112_vm8 = vcmask 228352  }
 0x17b   :  { %v2943_v48 = vadd.f32 %v6015_v47, %v2942_v15  ;;  %v6423_v12 = vpop.permute.xlu0 %999  ;;  %v2557_v54 = vsel %vm2507_vm13, %v2470_v55, %v1578_v40  ;;  %v3487_v25 = vfloor.f32 %v6413_v9  ;;  %vm9113_vm0 = vcmask 261120  }
 0x17c   :  { %2022 = vrot.lane.b32.xlu1 %v1937_v0, %s4706_s25  ;;  %v4368_v20 = vpop.f32.mrf.mxu0  ;;  %v2644_v15 = vsel %vm9112_vm8, %v2557_v54, %v1858_v44  ;;  %v504_v38 = vsel %vm340_vm3, %v499_v56, %v9004_v6  ;;  %v9114_v7 = vrot.slane %v6089_v24, 2  ;;  %v6457_v9 = vsel %vm3700_vm4, 0.00390625, %v9071_v37 }
 0x17d   :  { %v3267_v0 = vmax.f32 %v2943_v48, 0.0  ;;  %1305 = vrot.lane.b32.xlu0 %v1182_v58, %s4704_s21  ;;  %9115 = vst [vmem:[#allocation14_spill] sm:$0xff] %v6457_v9  ;;  %vm9116_vm6 = vcmask 293888   ;;  %v6462_v56 = vor.u32 %v1740_v32, %v1739_v4  ;;  %v1144_v32 = vrot.slane %v6257_v28, 2 }
 0x17e   :  { %v2035_v40 = vpop.permute.xlu1 %2034  ;;  %v2945_v45 = vpop.f32.mrf.mxu0  ;;  %v6452_v48 = vsel %vm9039_vm1, %v9114_v7, %v9003_v13  ;;  %v1143_v7 = vrot.slane %v6260_v22, 1  ;;  %vm3615_vm2 = vcmp.lt.f32.partialorder %v3486_v50, 16.0  ;;  %v9120_v50 = vrot.slane %v5964_v19, 1 }
 0x17f   :  { %v2731_v55 = vsel %vm9113_vm0, %v2644_v15, %v2035_v40  ;;  %v3785_v44 = vmul.f32 %v6432_v39, %v3267_v0  ;;  %v2946_v58 = vadd.f32 %v6015_v47, %v2945_v45  ;;  %v1280_v54 = vpop.permute.xlu0 %1279  ;;  %v9117_v15 = vcvt.s32.f32 %v6299_v59 }
 0x180   :  { %1482 = vrot.lane.b32.xlu1 %v6185_v5, %s4703_s20  ;;  %4451 = vmatmul.mubr.msk.bf16.vlgmr.msra.gmra.mxu1 %vm9116_vm6, %v2731_v55  ;;  %v4369_v20 = vpop.f32.mrf.mxu0  ;;  %v9007_v0 = vcvt.s32.f32 %v6438_v57  ;;  %v6469_v45 = vadd.s32 88, %v5853_v11  ;;  %v3530_v59 = vmul.f32 18.0, %v3487_v25  ;;  %v6498_v6 = vor.u32 %v1144_v32, %v1143_v7 }
 0x181   :  { %v3572_v40 = vsub.f32 %v9117_v15, %v3529_v16  ;;  %4454 = vmatprep.mubr.msk.bf16.mxu1 %vm4709_vm7, %v9071_v37  ;;  %v3870_v5 = vadd.f32 %v6357_v29, %v3785_v44  ;;  %v3268_v13 = vmax.f32 %v2946_v58, 0.0  ;;  %727 = vrot.lane.b32.xlu0 %v504_v38, %s4705_s22  ;;  %v1742_v29 = vsel %vm1618_vm5, %v6187_v51, %v6462_v56  ;;  %v6489_v38 = vld [vmem:[%s8955_s1 + $0xb0] sm:$0xff]  }
 0x182   :  { %v1457_v4 = vpop.permute.xlu1 %1456  ;;  %v9006_v58 = vcvt.s32.f32 %v6469_v45  ;;  %v9118_v44 = vcvt.s32.f32 %v6332_v30  ;;  %vm9121_vm15 = vcmask 1046528   ;;  %vm9122_vm4 = vcmask 31744  }
 0x183   :  { %v3786_v55 = vmul.f32 %v6457_v9, %v3268_v13  ;;  %v6478_v20 = vpop.permute.xlu0 %739  ;;  %vm3658_vm14 = vcmp.lt.f32.partialorder %v3572_v40, 16.0  ;;  %v6493_v13 = vmul.f32 0.055555556, %v9007_v0  ;;  %v9119_v9 = vrot.slane %v6221_v62, 1 }
 0x184   :  { %1585 = vrot.lane.b32.xlu1 %v6452_v48, %s4702_s19  ;;  %v3573_v16 = vsub.f32 %v9118_v44, %v3530_v59  ;;  %vm3701_vm8 = vmand %vm3615_vm2, %vm3658_vm14  ;;  %v9123_v30 = vrot.slane %v6345_v49, 3  ;;  %v9124_v7 = vrot.slane %v6089_v24, 3  ;;  %vm9125_vm0 = vcmask 1044480  }
 0x185   :  { %v3871_v15 = vadd.f32 %v3870_v5, %v3786_v55  ;;  %904 = vrot.lane.b32.xlu0 %v6235_v60, %s4701_s16  ;;  %v6507_v40 = vsel %vm9121_vm15, %v9120_v50, %v9119_v9  ;;  %v4649_v5 = vld [vmem:[%s8955_s1 + $0x78] sm:$0xff]   ;;  %v6523_v9 = vshrl.u32 %v6489_v38, 16  ;;  %v6528_v59 = vshll.u32 %v6489_v38, 16 }
 0x186   :  { %v1560_v51 = vpop.permute.xlu1 %1559  ;;  %v2104_v60 = vsel %vm9122_vm4, %v4649_v5, %v6338_v10  ;;  %v1957_v19 = vsel %vm9125_vm0, %v9124_v7, %v9123_v30  ;;  %v3488_v10 = vfloor.f32 %v6493_v13  ;;  %vm9126_vm6 = vsmask.f32 6400 }
 0x187   :  { %v6514_v55 = vpop.permute.xlu0 %916  ;;  %v2191_v32 = vsel %vm2159_vm9, %v2104_v60, %v6379_v21  ;;  %v1146_v21 = vsel %vm9126_vm6, %v6216_v23, %v6498_v6  ;;  %vm6542_vm2 = vcmp.lt.f32.partialorder %v3487_v25, 16.0  ;;  %vm3659_vm14 = vcmp.lt.f32.partialorder %v3573_v16, 16.0 }
 0x188   :  { %1865 = vrot.lane.b32.xlu1 %v1742_v29, %s4707_s26  ;;  %v6533_v29 = vmul.f32 0.055555556, %v9006_v58  ;;  %v2278_v44 = vsel %vm2246_vm10, %v2191_v32, %v6423_v12  ;;  %v6548_v30 = vsel %vm3701_vm8, 0.00390625, %v9071_v37  ;;  %v9130_v12 = vrot.slane %v5897_v18, 1  ;;  %vm3702_vm15 = vmand %vm6542_vm2, %vm3659_vm14 }
 0x189   :  { %1007 = vrot.lane.b32.xlu0 %v6507_v40, %s4700_s15  ;;  %v2365_v13 = vsel %vm2333_vm11, %v2278_v44, %v1280_v54  ;;  %9129 = vst [vmem:[#allocation15_spill] sm:$0xff] %v6548_v30  ;;  %v9008_v32 = vrot.slane %v6120_v27, 1  ;;  %v1703_v16 = vrot.slane %v6523_v9, 2  ;;  %v1704_v18 = vrot.slane %v6528_v59, 3 }
 0x18a   :  { %v1840_v50 = vpop.permute.xlu1 %1839  ;;  %v2950_v60 = vpop.f32.mrf.mxu0  ;;  %v579_v7 = vor.u32 %v5900_v46, %v9130_v12  ;;  %v2452_v58 = vsel %vm2420_vm12, %v2365_v13, %v1457_v4  ;;  %v3531_v46 = vmul.f32 18.0, %v3488_v10  ;;  %v3489_v4 = vfloor.f32 %v6533_v29 }
 0x18b   :  { %v2951_v23 = vadd.f32 %v6015_v47, %v2950_v60  ;;  %v6556_v25 = vpop.permute.xlu0 %1019  ;;  %v2539_v44 = vsel %vm2507_vm13, %v2452_v58, %v1560_v51  ;;  %vm9131_vm4 = vcmask 228352   ;;  %v6569_v12 = vadd.s32 96, %v5853_v11 }
 0x18c   :  { %2042 = vrot.lane.b32.xlu1 %v1957_v19, %s4706_s25  ;;  %v4372_v0 = vpop.f32.mrf.mxu0  ;;  %v2626_v60 = vsel %vm9131_vm4, %v2539_v44, %v1840_v50  ;;  %vm9132_vm8 = vcmask 261120   ;;  %v584_v58 = vsel %vm340_vm3, %v579_v7, %v9008_v32  ;;  %v6578_v5 = vsel %vm3702_vm15, 0.00390625, %v9071_v37 }
 0x18d   :  { %v3269_v13 = vmax.f32 %v2951_v23, 0.0  ;;  %1287 = vrot.lane.b32.xlu0 %v1146_v21, %s4704_s21  ;;  %9133 = vst [vmem:[#allocation16_spill] sm:$0xff] %v6578_v5  ;;  %vm9134_vm0 = vcmask 293888   ;;  %v9135_v23 = vrot.slane %v6489_v38, 2  ;;  %v9136_v44 = vrot.slane %v6221_v62, 2 }
 0x18e   :  { %v2017_v19 = vpop.permute.xlu1 %2016  ;;  %v2953_v54 = vpop.f32.mrf.mxu0  ;;  %vm6613_vm6 = vcmp.lt.f32.partialorder %v3488_v10, 16.0  ;;  %vm9142_vm14 = vcmask 1046528   ;;  %vm9143_vm15 = vcmask 31744   ;;  %vm9146_vm4 = vcmask 1044480  }
 0x18f   :  { %v2713_v0 = vsel %vm9132_vm8, %v2626_v60, %v2017_v19  ;;  %v3787_v51 = vmul.f32 %v6548_v30, %v3269_v13  ;;  %v2954_v29 = vadd.f32 %v6015_v47, %v2953_v54  ;;  %v1300_v50 = vpop.permute.xlu0 %1299  ;;  %v6588_v7 = vsel %vm9039_vm1, %v9136_v44, %v9135_v23 }
 0x190   :  { %1464 = vrot.lane.b32.xlu1 %v6321_v3, %s4703_s20  ;;  %4415 = vmatmul.mubr.msk.bf16.gmra.mxu0 %vm9134_vm0, %v2713_v0  ;;  %v4373_v21 = vpop.f32.mrf.mxu0  ;;  %v6590_v13 = vor.u32 %v1704_v18, %v1703_v16  ;;  %v9137_v54 = vcvt.s32.f32 %v6438_v57  ;;  %v3532_v19 = vmul.f32 18.0, %v3489_v4  ;;  %v6599_v30 = vadd.s32 104, %v5853_v11 }
 0x191   :  { %4418 = vmatprep.mubr.msk.bf16.mxu0 %vm4709_vm7, %v9071_v37  ;;  %v3872_v3 = vadd.f32 %v3871_v15, %v3787_v51  ;;  %v3270_v32 = vmax.f32 %v2954_v29, 0.0  ;;  %747 = vrot.lane.b32.xlu0 %v584_v58, %s4705_s22  ;;  %v9012_v21 = vcvt.s32.f32 %v6569_v12  ;;  %v9011_v16 = vrot.slane %v6345_v49, 1 }
 0x192   :  { %v3574_v60 = vsub.f32 %v9137_v54, %v3531_v46  ;;  %v1477_v0 = vpop.permute.xlu1 %1476  ;;  %v1183_v18 = vrot.slane %v6386_v34, 1  ;;  %v1184_v57 = vrot.slane %v6383_v61, 2  ;;  %v1706_v58 = vsel %vm1618_vm5, %v6323_v36, %v6590_v13 }
 0x193   :  { %v3788_v46 = vmul.f32 %v6578_v5, %v3270_v32  ;;  %v6605_v23 = vpop.permute.xlu0 %721  ;;  %v6620_v32 = vld [vmem:[%s8955_s1 + $0x100] sm:$0xff]   ;;  %v9140_v54 = vcvt.s32.f32 %v6469_v45  ;;  %v6630_v36 = vmul.f32 0.055555556, %v9012_v21  ;;  %v9014_v10 = vcvt.s32.f32 %v6599_v30 }
 0x194   :  { %1567 = vrot.lane.b32.xlu1 %v6588_v7, %s4702_s19  ;;  %vm3660_vm2 = vcmp.lt.f32.partialorder %v3574_v60, 16.0  ;;  %v9141_v5 = vrot.slane %v6089_v24, 1  ;;  %v9144_v24 = vrot.slane %v6489_v38, 3  ;;  %vm6667_vm0 = vcmp.lt.f32.partialorder %v3489_v4, 16.0 }
 0x195   :  { %v6622_v29 = vadd.f32 %v3872_v3, %v3788_v46  ;;  %924 = vrot.lane.b32.xlu0 %v6369_v31, %s4701_s16  ;;  %v3575_v15 = vsub.f32 %v9140_v54, %v3532_v19  ;;  %v6640_v46 = vor.u32 %v1184_v57, %v1183_v18  ;;  %v6645_v31 = vld [vmem:[%s8955_s1 + $0xc8] sm:$0xff]   ;;  %vm6663_vm8 = vmand %vm6613_vm6, %vm3660_vm2  ;;  %v3490_v51 = vfloor.f32 %v6630_v36 }
 0x196   :  { %v1580_v44 = vpop.permute.xlu1 %1579  ;;  %v6638_v3 = vsel %vm9142_vm14, %v9141_v5, %v9011_v16  ;;  %v2124_v45 = vsel %vm9143_vm15, %v6645_v31, %v6478_v20  ;;  %v9145_v5 = vrot.slane %v6221_v62, 3  ;;  %v6675_v16 = vshrl.u32 %v6620_v32, 16 }
 0x197   :  { %v6650_v19 = vpop.permute.xlu0 %898  ;;  %v2211_v57 = vsel %vm2159_vm9, %v2124_v45, %v6514_v55  ;;  %vm3661_vm6 = vcmp.lt.f32.partialorder %v3575_v15, 16.0  ;;  %v6684_v4 = vmul.f32 0.055555556, %v9014_v10  ;;  %vm9151_vm2 = vsmask.f32 6400 }
 0x198   :  { %1847 = vrot.lane.b32.xlu1 %v1706_v58, %s4707_s26  ;;  %v1939_v18 = vsel %vm9146_vm4, %v9145_v5, %v9144_v24  ;;  %v6672_v58 = vshll.u32 %v6620_v32, 16  ;;  %v2298_v55 = vsel %vm2246_vm10, %v2211_v57, %v6556_v25  ;;  %v1186_v5 = vsel %vm9151_vm2, %v6351_v8, %v6640_v46  ;;  %vm3704_vm14 = vmand %vm6667_vm0, %vm3661_vm6 }
 0x199   :  { %1027 = vrot.lane.b32.xlu0 %v6638_v3, %s4700_s15  ;;  %v2385_v45 = vsel %vm2333_vm11, %v2298_v55, %v1300_v50  ;;  %v9152_v25 = vrot.slane %v5996_v63, 1  ;;  %v9015_v21 = vrot.slane %v6257_v28, 1  ;;  %v6699_v10 = vsel %vm6663_vm8, 0.00390625, %v9071_v37 }
 0x19a   :  { %v1860_v60 = vpop.permute.xlu1 %1859  ;;  %v2958_v24 = vpop.f32.mrf.mxu0  ;;  %v2472_v39 = vsel %vm2420_vm12, %v2385_v45, %v1477_v0  ;;  %9153 = vst [vmem:[#allocation17_spill] sm:$0xff] %v6699_v10  ;;  %v1743_v0 = vrot.slane %v6675_v16, 2  ;;  %v1744_v55 = vrot.slane %v6672_v58, 3  ;;  %v6712_v54 = vadd.s32 112, %v5853_v11 }
 0x19b   :  { %v507_v57 = vor.u32 %v5999_v52, %v9152_v25  ;;  %v2959_v36 = vadd.f32 %v6015_v47, %v2958_v24  ;;  %v6701_v50 = vpop.permute.xlu0 %1001  ;;  %v2559_v63 = vsel %vm2507_vm13, %v2472_v39, %v1580_v44  ;;  %vm9154_vm15 = vcmask 228352  }
 0x19c   :  { %2024 = vrot.lane.b32.xlu1 %v1939_v18, %s4706_s25  ;;  %v4376_v52 = vpop.f32.mrf.mxu0  ;;  %v2646_v24 = vsel %vm9154_vm15, %v2559_v63, %v1860_v60  ;;  %v3533_v25 = vmul.f32 18.0, %v3490_v51  ;;  %v3491_v39 = vfloor.f32 %v6684_v4  ;;  %vm9155_vm4 = vcmask 261120  }
 0x19d   :  { %v3271_v45 = vmax.f32 %v2959_v36, 0.0  ;;  %1307 = vrot.lane.b32.xlu0 %v1186_v5, %s4704_s21  ;;  %v512_v20 = vsel %vm340_vm3, %v507_v57, %v9015_v21  ;;  %v6724_v36 = vsel %vm3704_vm14, 0.00390625, %v9071_v37  ;;  %vm9157_vm8 = vcmask 293888  }
 0x19e   :  { %v2037_v18 = vpop.permute.xlu1 %2036  ;;  %v2961_v15 = vpop.f32.mrf.mxu0  ;;  %9156 = vst [vmem:[#allocation18_spill] sm:$0xff] %v6724_v36  ;;  %v9158_v4 = vrot.slane %v6620_v32, 2  ;;  %v9159_v5 = vrot.slane %v6345_v49, 2  ;;  %vm3619_vm0 = vcmp.lt.f32.partialorder %v3490_v51, 16.0  ;;  %vm9164_vm2 = vcmask 1046528  }
 0x19f   :  { %v2733_v44 = vsel %vm9155_vm4, %v2646_v24, %v2037_v18  ;;  %v3789_v52 = vmul.f32 %v6699_v10, %v3271_v45  ;;  %v2962_v8 = vadd.f32 %v6015_v47, %v2961_v15  ;;  %v1282_v60 = vpop.permute.xlu0 %1281  ;;  %v6736_v45 = vor.u32 %v1744_v55, %v1743_v0 }
 0x1a0   :  { %1484 = vrot.lane.b32.xlu1 %v6452_v48, %s4703_s20  ;;  %4455 = vmatmul.mubr.msk.bf16.gmra.mxu1 %vm9157_vm8, %v2733_v44  ;;  %v6734_v63 = vsel %vm9039_vm1, %v9159_v5, %v9158_v4  ;;  %v4377_v57 = vpop.f32.mrf.mxu0  ;;  %v1147_v24 = vrot.slane %v6523_v9, 1  ;;  %v1148_v18 = vrot.slane %v6528_v59, 2  ;;  %v9160_v4 = vcvt.s32.f32 %v6569_v12 }
 0x1a1   :  { %4458 = vmatprep.mubr.msk.bf16.mxu1 %vm4709_vm7, %v9071_v37  ;;  %v3874_v48 = vadd.f32 %v6622_v29, %v3789_v52  ;;  %v3272_v44 = vmax.f32 %v2962_v8, 0.0  ;;  %729 = vrot.lane.b32.xlu0 %v512_v20, %s4705_s22  ;;  %v3534_v0 = vmul.f32 18.0, %v3491_v39  ;;  %v9017_v55 = vrot.slane %v6489_v38, 1 }
 0x1a2   :  { %v1459_v21 = vpop.permute.xlu1 %1458  ;;  %v3576_v5 = vsub.f32 %v9160_v4, %v3533_v25  ;;  %v6749_v57 = vadd.s32 120, %v5853_v11  ;;  %v1746_v12 = vsel %vm1618_vm5, %v6462_v56, %v6736_v45  ;;  %v6760_v8 = vor.u32 %v1148_v18, %v1147_v24  ;;  %v6765_v25 = vld [vmem:[%s8955_s1 + $0xb8] sm:$0xff]  }
 0x1a3   :  { %v3790_v15 = vmul.f32 %v6724_v36, %v3272_v44  ;;  %v6752_v10 = vpop.permute.xlu0 %741  ;;  %v9161_v20 = vcvt.s32.f32 %v6712_v54  ;;  %v9162_v56 = vcvt.s32.f32 %v6599_v30  ;;  %v9163_v18 = vrot.slane %v6221_v62, 1 }
 0x1a4   :  { %1587 = vrot.lane.b32.xlu1 %v6734_v63, %s4702_s19  ;;  %vm3662_vm6 = vcmp.lt.f32.partialorder %v3576_v5, 16.0  ;;  %vm9165_vm14 = vcmask 31744   ;;  %v9166_v30 = vrot.slane %v6620_v32, 3  ;;  %v9167_v62 = vrot.slane %v6345_v49, 3 }
 0x1a5   :  { %v6769_v52 = vmul.f32 0.055555556, %v9161_v20  ;;  %v6771_v44 = vadd.f32 %v3874_v48, %v3790_v15  ;;  %906 = vrot.lane.b32.xlu0 %v6507_v40, %s4701_s16  ;;  %v3577_v24 = vsub.f32 %v9162_v56, %v3534_v0  ;;  %v6782_v29 = vsel %vm9164_vm2, %v9163_v18, %v9017_v55  ;;  %v4651_v15 = vld [vmem:[%s8955_s1 + $0x80] sm:$0xff]   ;;  %vm6800_vm4 = vmand %vm3619_vm0, %vm3662_vm6 }
 0x1a6   :  { %v1562_v4 = vpop.permute.xlu1 %1561  ;;  %v9018_v20 = vcvt.s32.f32 %v6749_v57  ;;  %v2106_v40 = vsel %vm9165_vm14, %v4651_v15, %v6605_v23  ;;  %vm9168_vm15 = vcmask 1044480   ;;  %v6805_v56 = vshll.u32 %v6765_v25, 16 }
 0x1a7   :  { %v6790_v51 = vpop.permute.xlu0 %918  ;;  %v1959_v48 = vsel %vm9168_vm15, %v9167_v62, %v9166_v30  ;;  %v2193_v5 = vsel %vm2159_vm9, %v2106_v40, %v6650_v19  ;;  %v6808_v23 = vshrl.u32 %v6765_v25, 16  ;;  %vm9171_vm8 = vsmask.f32 6400 }
 0x1a8   :  { %1867 = vrot.lane.b32.xlu1 %v1746_v12, %s4707_s26  ;;  %v3492_v12 = vfloor.f32 %v6769_v52  ;;  %v2280_v18 = vsel %vm2246_vm10, %v2193_v5, %v6701_v50  ;;  %v1150_v19 = vsel %vm9171_vm8, %v6498_v6, %v6760_v8  ;;  %vm6818_vm0 = vcmp.lt.f32.partialorder %v3491_v39, 16.0 }
 0x1a9   :  { %1009 = vrot.lane.b32.xlu0 %v6782_v29, %s4700_s15  ;;  %vm3663_vm6 = vcmp.lt.f32.partialorder %v3577_v24, 16.0  ;;  %v2367_v30 = vsel %vm2333_vm11, %v2280_v18, %v1282_v60  ;;  %v9174_v52 = vrot.slane %v6120_v27, 1  ;;  %v9019_v5 = vrot.slane %v6383_v61, 1 }
 0x1aa   :  { %v1842_v15 = vpop.permute.xlu1 %1841  ;;  %v2966_v62 = vpop.f32.mrf.mxu0  ;;  %v6829_v55 = vmul.f32 0.055555556, %v9018_v20  ;;  %v2454_v6 = vsel %vm2420_vm12, %v2367_v30, %v1459_v21  ;;  %v6836_v24 = vsel %vm6800_vm4, 0.00390625, %v9071_v37  ;;  %vm3706_vm2 = vmand %vm6818_vm0, %vm3663_vm6  ;;  %v1707_v21 = vrot.slane %v6808_v23, 2 }
 0x1ab   :  { %v587_v50 = vor.u32 %v6123_v33, %v9174_v52  ;;  %v2967_v39 = vadd.f32 %v6015_v47, %v2966_v62  ;;  %9175 = vst [vmem:[#allocation19_spill] sm:$0xff] %v6836_v24  ;;  %v6838_v60 = vpop.permute.xlu0 %1021  ;;  %v2541_v33 = vsel %vm2507_vm13, %v2454_v6, %v1562_v4  ;;  %v1708_v30 = vrot.slane %v6805_v56, 3 }
 0x1ac   :  { %2044 = vrot.lane.b32.xlu1 %v1959_v48, %s4706_s25  ;;  %v4380_v18 = vpop.f32.mrf.mxu0  ;;  %v3535_v62 = vmul.f32 18.0, %v3492_v12  ;;  %vm9176_vm14 = vcmask 228352   ;;  %v6850_v48 = vadd.s32 128, %v5853_v11  ;;  %vm9177_vm15 = vcmask 261120  }
 0x1ad   :  { %v3273_v0 = vmax.f32 %v2967_v39, 0.0  ;;  %v2628_v52 = vsel %vm9176_vm14, %v2541_v33, %v1842_v15  ;;  %1289 = vrot.lane.b32.xlu0 %v1150_v19, %s4704_s21  ;;  %v592_v40 = vsel %vm340_vm3, %v587_v50, %v9019_v5  ;;  %v3493_v6 = vfloor.f32 %v6829_v55 }
 0x1ae   :  { %v2019_v20 = vpop.permute.xlu1 %2018  ;;  %v2969_v27 = vpop.f32.mrf.mxu0  ;;  %v6860_v15 = vsel %vm3706_vm2, 0.00390625, %v9071_v37  ;;  %vm9179_vm4 = vcmask 293888   ;;  %v9181_v33 = vrot.slane %v6489_v38, 2  ;;  %v1188_v5 = vrot.slane %v6672_v58, 2 }
 0x1af   :  { %v2715_v4 = vsel %vm9177_vm15, %v2628_v52, %v2019_v20  ;;  %v3791_v18 = vmul.f32 %v6836_v24, %v3273_v0  ;;  %v2970_v39 = vadd.f32 %v6015_v47, %v2969_v27  ;;  %9178 = vst [vmem:[#allocation20_spill] sm:$0xff] %v6860_v15  ;;  %v1302_v19 = vpop.permute.xlu0 %1301  ;;  %v9180_v20 = vrot.slane %v6765_v25, 2 }
 0x1b0   :  { %1466 = vrot.lane.b32.xlu1 %v6588_v7, %s4703_s20  ;;  %4419 = vmatmul.mubr.msk.bf16.gmra.mxu0 %vm9179_vm4, %v2715_v4  ;;  %v4381_v55 = vpop.f32.mrf.mxu0  ;;  %v6872_v0 = vor.u32 %v1708_v30, %v1707_v21  ;;  %v9182_v47 = vcvt.s32.f32 %v6712_v54  ;;  %v1187_v52 = vrot.slane %v6675_v16, 1  ;;  %v6884_v21 = vadd.s32 136, %v5853_v11 }
 0x1b1   :  { %v6870_v50 = vsel %vm9039_vm1, %v9181_v33, %v9180_v20  ;;  %4422 = vmatprep.mubr.msk.bf16.mxu0 %vm4709_vm7, %v9071_v37  ;;  %v3876_v7 = vadd.f32 %v6771_v44, %v3791_v18  ;;  %v3274_v4 = vmax.f32 %v2970_v39, 0.0  ;;  %749 = vrot.lane.b32.xlu0 %v592_v40, %s4705_s22  ;;  %v9020_v33 = vcvt.s32.f32 %v6850_v48 }
 0x1b2   :  { %v3578_v27 = vsub.f32 %v9182_v47, %v3535_v62  ;;  %v1479_v20 = vpop.permute.xlu1 %1478  ;;  %v9021_v54 = vrot.slane %v6620_v32, 1  ;;  %v3536_v30 = vmul.f32 18.0, %v3493_v6  ;;  %v1710_v40 = vsel %vm1618_vm5, %v6590_v13, %v6872_v0  ;;  %v6905_v47 = vld [vmem:[%s8955_s1 + $0x108] sm:$0xff]  }
 0x1b3   :  { %v3792_v62 = vmul.f32 %v6860_v15, %v3274_v4  ;;  %v6888_v55 = vpop.permute.xlu0 %723  ;;  %vm6896_vm8 = vcmp.lt.f32.partialorder %v3492_v12, 16.0  ;;  %v6900_v39 = vor.u32 %v1188_v5, %v1187_v52  ;;  %v6911_v13 = vmul.f32 0.055555556, %v9020_v33 }
 0x1b4   :  { %1569 = vrot.lane.b32.xlu1 %v6870_v50, %s4702_s19  ;;  %vm3664_vm0 = vcmp.lt.f32.partialorder %v3578_v27, 16.0  ;;  %v9185_v5 = vrot.slane %v6345_v49, 1  ;;  %vm9186_vm6 = vcmask 1046528   ;;  %vm9188_vm2 = vcmask 31744  }
 0x1b5   :  { %v3877_v4 = vadd.f32 %v3876_v7, %v3792_v62  ;;  %926 = vrot.lane.b32.xlu0 %v6638_v3, %s4701_s16  ;;  %v9187_v7 = vcvt.s32.f32 %v6749_v57  ;;  %v4652_v3 = vld [vmem:[%s8955_s1 + $0xd0] sm:$0xff]   ;;  %v9189_v12 = vrot.slane %v6765_v25, 3  ;;  %v9190_v49 = vrot.slane %v6489_v38, 3  ;;  %vm6940_vm15 = vmand %vm6896_vm8, %vm3664_vm0 }
 0x1b6   :  { %v1582_v44 = vpop.permute.xlu1 %1581  ;;  %v6919_v52 = vsel %vm9186_vm6, %v9185_v5, %v9021_v54  ;;  %v2126_v27 = vsel %vm9188_vm2, %v4652_v3, %v6752_v10  ;;  %vm9191_vm14 = vcmask 1044480   ;;  %vm9194_vm4 = vsmask.f32 6400 }
 0x1b7   :  { %v3579_v62 = vsub.f32 %v9187_v7, %v3536_v30  ;;  %v6928_v33 = vpop.permute.xlu0 %900  ;;  %v1941_v5 = vsel %vm9191_vm14, %v9190_v49, %v9189_v12  ;;  %v2213_v57 = vsel %vm2159_vm9, %v2126_v27, %v6790_v51  ;;  %v1190_v10 = vsel %vm9194_vm4, %v6640_v46, %v6900_v39 }
 0x1b8   :  { %1849 = vrot.lane.b32.xlu1 %v1710_v40, %s4707_s26  ;;  %v6948_v40 = vshll.u32 %v6905_v47, 16  ;;  %v6951_v7 = vshrl.u32 %v6905_v47, 16  ;;  %v2300_v12 = vsel %vm2246_vm10, %v2213_v57, %v6838_v60  ;;  %v9195_v18 = vrot.slane %v6257_v28, 1 }
 0x1b9   :  { %1029 = vrot.lane.b32.xlu0 %v6919_v52, %s4700_s15  ;;  %v3494_v27 = vfloor.f32 %v6911_v13  ;;  %v9196_v46 = vcvt.s32.f32 %v6884_v21  ;;  %v2387_v54 = vsel %vm2333_vm11, %v2300_v12, %v1302_v19  ;;  %vm6966_vm8 = vcmp.lt.f32.partialorder %v3493_v6, 16.0 }
 0x1ba   :  { %v1862_v51 = vpop.permute.xlu1 %1861  ;;  %v515_v3 = vor.u32 %v6260_v22, %v9195_v18  ;;  %v2974_v15 = vpop.f32.mrf.mxu0  ;;  %vm3665_vm0 = vcmp.lt.f32.partialorder %v3579_v62, 16.0  ;;  %v9024_v60 = vrot.slane %v6528_v59, 1  ;;  %v2474_v28 = vsel %vm2420_vm12, %v2387_v54, %v1479_v20  ;;  %v6975_v22 = vld [vmem:[%s8958_s4 + $0x1] ss:$0 sm:$0xff] }
 0x1bb   :  { %v6963_v49 = vmul.f32 0.055555556, %v9196_v46  ;;  %v2975_v13 = vadd.f32 %v6975_v22, %v2974_v15  ;;  %v6981_v19 = vsel %vm6940_vm15, 0.00390625, %v9071_v37  ;;  %v6983_v6 = vpop.permute.xlu0 %1003  ;;  %v2561_v57 = vsel %vm2507_vm13, %v2474_v28, %v1582_v44  ;;  %vm3708_vm2 = vmand %vm6966_vm8, %vm3665_vm0 }
 0x1bc   :  { %9199 = vst [vmem:[#allocation21_spill] sm:$0xff] %v6981_v19  ;;  %2026 = vrot.lane.b32.xlu1 %v1941_v5, %s4706_s25  ;;  %v4384_v12 = vpop.f32.mrf.mxu0  ;;  %v1747_v54 = vrot.slane %v6951_v7, 2  ;;  %v1748_v18 = vrot.slane %v6948_v40, 3  ;;  %vm9200_vm6 = vcmask 228352   ;;  %v3537_v5 = vmul.f32 18.0, %v3494_v27 }
 0x1bd   :  { %v3275_v46 = vmax.f32 %v2975_v13, 0.0  ;;  %v2648_v15 = vsel %vm9200_vm6, %v2561_v57, %v1862_v51  ;;  %1309 = vrot.lane.b32.xlu0 %v1190_v10, %s4704_s21  ;;  %v3495_v44 = vfloor.f32 %v6963_v49  ;;  %vm9201_vm14 = vcmask 261120  }
 0x1be   :  { %v2039_v30 = vpop.permute.xlu1 %2038  ;;  %v2977_v28 = vpop.f32.mrf.mxu0  ;;  %v520_v20 = vsel %vm340_vm3, %v515_v3, %v9024_v60  ;;  %v7001_v13 = vadd.s32 144, %v5853_v11  ;;  %vm9202_vm15 = vcmask 293888   ;;  %v7009_v51 = vsel %vm3708_vm2, 0.00390625, %v9071_v37 }
 0x1bf   :  { %v2735_v12 = vsel %vm9201_vm14, %v2648_v15, %v2039_v30  ;;  %v3793_v10 = vmul.f32 %v6981_v19, %v3275_v46  ;;  %v2978_v62 = vadd.f32 %v6975_v22, %v2977_v28  ;;  %v1284_v24 = vpop.permute.xlu0 %1283  ;;  %v9203_v57 = vrot.slane %v6905_v47, 2 }
 0x1c0   :  { %1486 = vrot.lane.b32.xlu1 %v6734_v63, %s4703_s20  ;;  %4459 = vmatmul.mubr.msk.bf16.gmra.mxu1 %vm9202_vm15, %v2735_v12  ;;  %v4385_v49 = vpop.f32.mrf.mxu0  ;;  %v9204_v3 = vrot.slane %v6620_v32, 2  ;;  %v7018_v46 = vor.u32 %v1748_v18, %v1747_v54  ;;  %v9030_v30 = vrot.slane %v6765_v25, 1  ;;  %v3538_v19 = vmul.f32 18.0, %v3495_v44 }
 0x1c1   :  { %4462 = vmatprep.mubr.msk.bf16.mxu1 %vm4709_vm7, %v9071_v37  ;;  %v3878_v63 = vadd.f32 %v3877_v4, %v3793_v10  ;;  %v3276_v28 = vmax.f32 %v2978_v62, 0.0  ;;  %731 = vrot.lane.b32.xlu0 %v520_v20, %s4705_s22  ;;  %v9205_v49 = vcvt.s32.f32 %v6850_v48  ;;  %v1151_v36 = vrot.slane %v6808_v23, 1 }
 0x1c2   :  { %v7016_v15 = vsel %vm9039_vm1, %v9204_v3, %v9203_v57  ;;  %v1461_v12 = vpop.permute.xlu1 %1460  ;;  %v1152_v57 = vrot.slane %v6805_v56, 2  ;;  %v7030_v18 = vadd.s32 152, %v5853_v11  ;;  %v1750_v48 = vsel %vm1618_vm5, %v6736_v45, %v7018_v46 }
 0x1c3   :  { %v3580_v60 = vsub.f32 %v9205_v49, %v3537_v5  ;;  %v3794_v3 = vmul.f32 %v7009_v51, %v3276_v28  ;;  %v7033_v4 = vpop.permute.xlu0 %743  ;;  %v9027_v20 = vrot.slane %v6905_v47, 3  ;;  %vm3623_vm4 = vcmp.lt.f32.partialorder %v3494_v27, 16.0 }
 0x1c4   :  { %1589 = vrot.lane.b32.xlu1 %v7016_v15, %s4702_s19  ;;  %v9206_v62 = vcvt.s32.f32 %v6884_v21  ;;  %v9207_v49 = vrot.slane %v6489_v38, 1  ;;  %vm9208_vm0 = vcmask 1046528   ;;  %v7052_v45 = vor.u32 %v1152_v57, %v1151_v36  ;;  %v4654_v21 = vld [vmem:[%s8955_s1 + $0x88] sm:$0xff]  }
 0x1c5   :  { %v3879_v5 = vadd.f32 %v3878_v63, %v3794_v3  ;;  %908 = vrot.lane.b32.xlu0 %v6782_v29, %s4701_s16  ;;  %vm3666_vm8 = vcmp.lt.f32.partialorder %v3580_v60, 16.0  ;;  %v9209_v63 = vcvt.s32.f32 %v7001_v13  ;;  %v9031_v29 = vcvt.s32.f32 %v7030_v18 }
 0x1c6   :  { %v1564_v10 = vpop.permute.xlu1 %1563  ;;  %v3581_v28 = vsub.f32 %v9206_v62, %v3538_v19  ;;  %v7050_v54 = vsel %vm9208_vm0, %v9207_v49, %v9030_v30  ;;  %vm9210_vm6 = vcmask 31744   ;;  %vm7069_vm2 = vmand %vm3623_vm4, %vm3666_vm8  ;;  %v9213_v19 = vrot.slane %v6620_v32, 3 }
 0x1c7   :  { %v7056_v3 = vmul.f32 0.055555556, %v9209_v63  ;;  %v2108_v27 = vsel %vm9210_vm6, %v4654_v21, %v6888_v55  ;;  %v7064_v60 = vpop.permute.xlu0 %920  ;;  %vm9214_vm14 = vcmask 1044480   ;;  %v9215_v62 = vrot.slane %v6383_v61, 1 }
 0x1c8   :  { %1869 = vrot.lane.b32.xlu1 %v1750_v48, %s4707_s26  ;;  %v2195_v38 = vsel %vm2159_vm9, %v2108_v27, %v6928_v33  ;;  %v1961_v57 = vsel %vm9214_vm14, %v9213_v19, %v9027_v20  ;;  %vm7085_vm15 = vcmp.lt.f32.partialorder %v3495_v44, 16.0  ;;  %vm3667_vm4 = vcmp.lt.f32.partialorder %v3581_v28, 16.0 }
 0x1c9   :  { %v595_v55 = vor.u32 %v6386_v34, %v9215_v62  ;;  %v2282_v48 = vsel %vm2246_vm10, %v2195_v38, %v6983_v6  ;;  %1011 = vrot.lane.b32.xlu0 %v7050_v54, %s4700_s15  ;;  %v9028_v63 = vrot.slane %v6672_v58, 1  ;;  %vm9218_vm8 = vsmask.f32 6400  ;;  %vm7112_vm0 = vmand %vm7085_vm15, %vm3667_vm4 }
 0x1ca   :  { %v1844_v33 = vpop.permute.xlu1 %1843  ;;  %v2369_v21 = vsel %vm2333_vm11, %v2282_v48, %v1284_v24  ;;  %v2982_v27 = vpop.f32.mrf.mxu0  ;;  %v1154_v61 = vsel %vm9218_vm8, %v6760_v8, %v7052_v45  ;;  %v3496_v34 = vfloor.f32 %v7056_v3  ;;  %v7097_v6 = vmul.f32 0.055555556, %v9031_v29 }
 0x1cb   :  { %v2456_v44 = vsel %vm2420_vm12, %v2369_v21, %v1461_v12  ;;  %v2983_v38 = vadd.f32 %v6975_v22, %v2982_v27  ;;  %v7104_v28 = vsel %vm7069_vm2, 0.00390625, %v9071_v37  ;;  %v7106_v24 = vpop.permute.xlu0 %1023  ;;  %v9029_v12 = vrot.slane %v6374_v42, 2 }
 0x1cc   :  { %2046 = vrot.lane.b32.xlu1 %v1961_v57, %s4706_s25  ;;  %v2543_v8 = vsel %vm2507_vm13, %v2456_v44, %v1564_v10  ;;  %v4388_v3 = vpop.f32.mrf.mxu0  ;;  %v1711_v62 = vrot.slane %v5450_v1, 2  ;;  %v1712_v36 = vrot.slane %v5431_v26, 3  ;;  %vm9221_vm6 = vcmask 228352  }
 0x1cd   :  { %v3277_v48 = vmax.f32 %v2983_v38, 0.0  ;;  %v2630_v21 = vsel %vm9221_vm6, %v2543_v8, %v1844_v33  ;;  %1291 = vrot.lane.b32.xlu0 %v1154_v61, %s4704_s21  ;;  %v600_v10 = vsel %vm340_vm3, %v595_v55, %v9028_v63  ;;  %vm9222_vm2 = vcmask 261120  }
 0x1ce   :  { %v2021_v57 = vpop.permute.xlu1 %2020  ;;  %v2985_v49 = vpop.f32.mrf.mxu0  ;;  %v3539_v44 = vmul.f32 18.0, %v3496_v34  ;;  %v3497_v3 = vfloor.f32 %v7097_v6  ;;  %v7127_v20 = vadd.s32 160, %v5853_v11  ;;  %v7134_v61 = vsel %vm7112_vm0, 0.00390625, %v9071_v37 }
 0x1cf   :  { %v2717_v27 = vsel %vm9222_vm2, %v2630_v21, %v2021_v57  ;;  %v3795_v38 = vmul.f32 %v7104_v28, %v3277_v48  ;;  %v2986_v33 = vadd.f32 %v6975_v22, %v2985_v49  ;;  %9223 = vst [vmem:[#allocation22_spill] sm:$0xff] %v7134_v61  ;;  %v1304_v8 = vpop.permute.xlu0 %1303  ;;  %vm9224_vm14 = vcmask 293888  }
 0x1d0   :  { %1468 = vrot.lane.b32.xlu1 %v6870_v50, %s4703_s20  ;;  %4423 = vmatmul.mubr.msk.bf16.gmra.mxu0 %vm9224_vm14, %v2717_v27  ;;  %v4389_v55 = vpop.f32.mrf.mxu0  ;;  %v9225_v6 = vrot.slane %v6765_v25, 2  ;;  %v7146_v21 = vor.u32 %v1712_v36, %v1711_v62  ;;  %v1191_v19 = vrot.slane %v6951_v7, 1  ;;  %v1192_v57 = vrot.slane %v6948_v40, 2 }
 0x1d1   :  { %4426 = vmatprep.mubr.msk.bf16.mxu0 %vm4709_vm7, %v9071_v37  ;;  %v3880_v50 = vadd.f32 %v3879_v5, %v3795_v38  ;;  %v3278_v49 = vmax.f32 %v2986_v33, 0.0  ;;  %751 = vrot.lane.b32.xlu0 %v600_v10, %s4705_s22  ;;  %v9032_v55 = vrot.slane %v6905_v47, 1  ;;  %v9226_v63 = vcvt.s32.f32 %v7001_v13  ;;  %v7174_v10 = vld [vmem:[%s8955_s1 + $0x110] sm:$0xff]  }
 0x1d2   :  { %v7144_v48 = vsel %vm9039_vm1, %v9225_v6, %v9029_v12  ;;  %v1481_v27 = vpop.permute.xlu1 %1480  ;;  %v3540_v12 = vmul.f32 18.0, %v3497_v3  ;;  %v9034_v62 = vcvt.s32.f32 %v7127_v20  ;;  %v7158_v36 = vadd.s32 168, %v5853_v11 }
 0x1d3   :  { %v3582_v6 = vsub.f32 %v9226_v63, %v3539_v44  ;;  %v3796_v30 = vmul.f32 %v7134_v61, %v3278_v49  ;;  %v7161_v29 = vpop.permute.xlu0 %725  ;;  %v9033_v5 = vrot.slane %v6374_v42, 3  ;;  %v1714_v13 = vsel %vm1618_vm5, %v6872_v0, %v7146_v21 }
 0x1d4   :  { %1571 = vrot.lane.b32.xlu1 %v7144_v48, %s4702_s19  ;;  %v7169_v63 = vor.u32 %v1192_v57, %v1191_v19  ;;  %v9227_v33 = vrot.slane %v6620_v32, 1  ;;  %vm9228_vm15 = vcmask 1046528   ;;  %vm7187_vm4 = vcmp.lt.f32.partialorder %v3496_v34, 16.0  ;;  %v4655_v32 = vld [vmem:[%s8955_s1 + $0xd8] sm:$0xff]  }
 0x1d5   :  { %v7176_v44 = vadd.f32 %v3880_v50, %v3796_v30  ;;  %928 = vrot.lane.b32.xlu0 %v6919_v52, %s4701_s16  ;;  %vm3668_vm8 = vcmp.lt.f32.partialorder %v3582_v6, 16.0  ;;  %v9231_v19 = vcvt.s32.f32 %v7030_v18  ;;  %v7195_v57 = vmul.f32 0.055555556, %v9034_v62 }
 0x1d6   :  { %v1584_v38 = vpop.permute.xlu1 %1583  ;;  %v7185_v49 = vsel %vm9228_vm15, %v9227_v33, %v9032_v55  ;;  %v9038_v52 = vcvt.s32.f32 %v7158_v36  ;;  %vm9232_vm0 = vcmask 31744   ;;  %v9233_v18 = vrot.slane %v6765_v25, 3  ;;  %vm7229_vm14 = vmand %vm7187_vm4, %vm3668_vm8 }
 0x1d7   :  { %v3583_v30 = vsub.f32 %v9231_v19, %v3540_v12  ;;  %v2128_v34 = vsel %vm9232_vm0, %v4655_v32, %v7033_v4  ;;  %v7203_v50 = vpop.permute.xlu0 %902  ;;  %vm9234_vm6 = vcmask 1044480   ;;  %vm9235_vm2 = vsmask.f32 6400 }
 0x1d8   :  { %1851 = vrot.lane.b32.xlu1 %v1714_v13, %s4707_s26  ;;  %v1943_v12 = vsel %vm9234_vm6, %v9233_v18, %v9033_v5  ;;  %v2215_v33 = vsel %vm2159_vm9, %v2128_v34, %v7064_v60  ;;  %v1194_v19 = vsel %vm9235_vm2, %v6900_v39, %v7169_v63  ;;  %v7217_v55 = vshll.u32 %v7174_v10, 16 }
 0x1d9   :  { %v7220_v4 = vshrl.u32 %v7174_v10, 16  ;;  %v2302_v13 = vsel %vm2246_vm10, %v2215_v33, %v7106_v24  ;;  %1031 = vrot.lane.b32.xlu0 %v7185_v49, %s4700_s15  ;;  %vm7233_vm15 = vcmp.lt.f32.partialorder %v3497_v3, 16.0  ;;  %v9240_v34 = vrot.slane %v6528_v59, 1 }
 0x1da   :  { %v1864_v39 = vpop.permute.xlu1 %1863  ;;  %v9037_v24 = vrot.slane %v6805_v56, 1  ;;  %v2389_v33 = vsel %vm2333_vm11, %v2302_v13, %v1304_v8  ;;  %v2990_v6 = vpop.f32.mrf.mxu0  ;;  %vm3669_vm0 = vcmp.lt.f32.partialorder %v3583_v30, 16.0  ;;  %v3498_v0 = vfloor.f32 %v7195_v57 }
 0x1db   :  { %v523_v18 = vor.u32 %v6523_v9, %v9240_v34  ;;  %v7245_v5 = vmul.f32 0.055555556, %v9038_v52  ;;  %v2476_v3 = vsel %vm2420_vm12, %v2389_v33, %v1481_v27  ;;  %v2991_v62 = vadd.f32 %v6975_v22, %v2990_v6  ;;  %v1006_v61 = vpop.permute.xlu0 %1005  ;;  %vm3712_vm8 = vmand %vm7233_vm15, %vm3669_vm0 }
 0x1dc   :  { %2028 = vrot.lane.b32.xlu1 %v1943_v12, %s4706_s25  ;;  %v9036_v9 = vrot.slane %v7174_v10, 2  ;;  %v2563_v59 = vsel %vm2507_vm13, %v2476_v3, %v1584_v38  ;;  %v7255_v8 = vsel %vm7229_vm14, 0.00390625, %v9071_v37  ;;  %v4392_v57 = vpop.f32.mrf.mxu0  ;;  %v1751_v13 = vrot.slane %v7220_v4, 2 }
 0x1dd   :  { %v1752_v34 = vrot.slane %v7217_v55, 3  ;;  %v3279_v27 = vmax.f32 %v2991_v62, 0.0  ;;  %vm9241_vm4 = vcmask 228352   ;;  %1311 = vrot.lane.b32.xlu0 %v1194_v19, %s4704_s21  ;;  %v7265_v12 = vadd.s32 176, %v5853_v11 }
 0x1de   :  { %v2650_v33 = vsel %vm9241_vm4, %v2563_v59, %v1864_v39  ;;  %v2041_v38 = vpop.permute.xlu1 %2040  ;;  %v2993_v60 = vpop.f32.mrf.mxu0  ;;  %vm9242_vm6 = vcmask 261120   ;;  %v528_v3 = vsel %vm340_vm3, %v523_v18, %v9037_v24  ;;  %v3541_v62 = vmul.f32 18.0, %v3498_v0 }
 0x1df   :  { %v2737_v6 = vsel %vm9242_vm6, %v2650_v33, %v2041_v38  ;;  %v3499_v39 = vfloor.f32 %v7245_v5  ;;  %v3797_v19 = vmul.f32 %v7255_v8, %v3279_v27  ;;  %v2994_v30 = vadd.f32 %v6975_v22, %v2993_v60  ;;  %v1286_v32 = vpop.permute.xlu0 %1285 }
 0x1e0   :  { %1488 = vrot.lane.b32.xlu1 %v7016_v15, %s4703_s20  ;;  %vm9243_vm2 = vcmask 293888   ;;  %v9244_v59 = vrot.slane %v6905_v47, 2  ;;  %v7285_v18 = vsel %vm3712_vm8, 0.00390625, %v9071_v37  ;;  %v4393_v5 = vpop.f32.mrf.mxu0  ;;  %v7287_v27 = vor.u32 %v1752_v34, %v1751_v13 }
 0x1e1   :  { %4463 = vmatmul.mubr.msk.bf16.gmra.mxu1 %vm9243_vm2, %v2737_v6  ;;  %v1155_v33 = vrot.slane %v5450_v1, 1  ;;  %v1156_v38 = vrot.slane %v5431_v26, 2  ;;  %v3882_v15 = vadd.f32 %v7176_v44, %v3797_v19  ;;  %v3280_v60 = vmax.f32 %v2994_v30, 0.0  ;;  %733 = vrot.lane.b32.xlu0 %v528_v3, %s4705_s22 }
 0x1e2   :  { %v7282_v57 = vsel %vm9039_vm1, %v9244_v59, %v9036_v9  ;;  %4466 = vmatprep.mubr.msk.bf16.mxu1 %vm4709_vm7, %v9071_v37  ;;  %v1463_v6 = vpop.permute.xlu1 %1462  ;;  %v3413_v59 = vcvt.s32.f32 %v7265_v12  ;;  %v9245_v9 = vcvt.s32.f32 %v7127_v20  ;;  %v3542_v13 = vmul.f32 18.0, %v3499_v39 }
 0x1e3   :  { %v7299_v34 = vadd.s32 184, %v5853_v11  ;;  %v3798_v1 = vmul.f32 %v7285_v18, %v3280_v60  ;;  %v7302_v24 = vpop.permute.xlu0 %745  ;;  %v1754_v44 = vsel %vm1618_vm5, %v7018_v46, %v7287_v27  ;;  %v1962_v3 = vrot.slane %v7174_v10, 3 }
 0x1e4   :  { %v3584_v5 = vsub.f32 %v9245_v9, %v3541_v62  ;;  %1591 = vrot.lane.b32.xlu1 %v7282_v57, %s4702_s19  ;;  %v7310_v19 = vor.u32 %v1156_v38, %v1155_v33  ;;  %v9246_v62 = vrot.slane %v5409_v41, 1  ;;  %v9247_v30 = vrot.slane %v6765_v25, 1  ;;  %v4656_v41 = vld [vmem:[%s8955_s1 + $0x90] sm:$0xff]  }
 0x1e5   :  { %v3883_v20 = vadd.f32 %v3882_v15, %v3798_v1  ;;  %910 = vrot.lane.b32.xlu0 %v7050_v54, %s4701_s16  ;;  %vm9248_vm14 = vcmask 1046528   ;;  %v7323_v52 = vmul.f32 0.055555556, %v3413_v59  ;;  %vm3627_vm15 = vcmp.lt.f32.partialorder %v3498_v0, 16.0 }
 0x1e6   :  { %v1566_v9 = vpop.permute.xlu1 %1565  ;;  %v7319_v60 = vsel %vm9248_vm14, %v9247_v30, %v9246_v62  ;;  %vm3670_vm0 = vcmp.lt.f32.partialorder %v3584_v5, 16.0  ;;  %v9249_v46 = vcvt.s32.f32 %v7158_v36  ;;  %v3414_v38 = vcvt.s32.f32 %v7299_v34 }
 0x1e7   :  { %vm9250_vm4 = vcmask 31744   ;;  %v7333_v54 = vpop.permute.xlu0 %922  ;;  %v9251_v36 = vrot.slane %v6905_v47, 3  ;;  %vm9252_vm8 = vcmask 1044480   ;;  %vm9253_vm6 = vsmask.f32 6400  ;;  %vm3713_vm2 = vmand %vm3627_vm15, %vm3670_vm0 }
 0x1e8   :  { %v3585_v33 = vsub.f32 %v9249_v46, %v3542_v13  ;;  %v2110_v25 = vsel %vm9250_vm4, %v4656_v41, %v7161_v29  ;;  %1871 = vrot.lane.b32.xlu1 %v1754_v44, %s4707_s26  ;;  %v1158_v5 = vsel %vm9253_vm6, %v7052_v45, %v7310_v19  ;;  %v9254_v1 = vrot.slane %v6672_v58, 1 }
 0x1e9   :  { %v2197_v0 = vsel %vm2159_vm9, %v2110_v25, %v7203_v50  ;;  %v1963_v15 = vsel %vm9252_vm8, %v9251_v36, %v1962_v3  ;;  %1013 = vrot.lane.b32.xlu0 %v7319_v60, %s4700_s15  ;;  %v607_v44 = vrot.slane %v6948_v40, 1  ;;  %v3500_v62 = vfloor.f32 %v7323_v52 }
 0x1ea   :  { %v2284_v13 = vsel %vm2246_vm10, %v2197_v0, %v1006_v61  ;;  %v1846_v29 = vpop.permute.xlu1 %1845  ;;  %v603_v50 = vor.u32 %v6675_v16, %v9254_v1  ;;  %v2998_v46 = vpop.f32.mrf.mxu0  ;;  %vm7355_vm14 = vcmp.lt.f32.partialorder %v3499_v39, 16.0  ;;  %vm3671_vm4 = vcmp.lt.f32.partialorder %v3585_v33, 16.0 }
 0x1eb   :  { %v2371_v30 = vsel %vm2333_vm11, %v2284_v13, %v1286_v32  ;;  %v7361_v61 = vmul.f32 0.055555556, %v3414_v38  ;;  %v2999_v16 = vadd.f32 %v6975_v22, %v2998_v46  ;;  %v7365_v41 = vpop.permute.xlu0 %1025  ;;  %v7370_v39 = vsel %vm3713_vm2, 0.00390625, %v9071_v37  ;;  %vm3714_vm0 = vmand %vm7355_vm14, %vm3671_vm4 }
 0x1ec   :  { %v2458_v58 = vsel %vm2420_vm12, %v2371_v30, %v1463_v6  ;;  %2048 = vrot.lane.b32.xlu1 %v1963_v15, %s4706_s25  ;;  %v4396_v32 = vpop.f32.mrf.mxu0  ;;  %v1715_v33 = vrot.slane %v5501_v14, 2  ;;  %v1716_v25 = vrot.slane %v5453_v2, 3  ;;  %vm9257_vm15 = vcmask 228352  }
 0x1ed   :  { %v2545_v52 = vsel %vm2507_vm13, %v2458_v58, %v1566_v9  ;;  %v3281_v0 = vmax.f32 %v2999_v16, 0.0  ;;  %1293 = vrot.lane.b32.xlu0 %v1158_v5, %s4704_s21  ;;  %v3543_v15 = vmul.f32 18.0, %v3500_v62  ;;  %vm9258_vm8 = vcmask 261120  }
 0x1ee   :  { %v2632_v36 = vsel %vm9257_vm15, %v2545_v52, %v1846_v29  ;;  %v2023_v6 = vpop.permute.xlu1 %2022  ;;  %v3001_v13 = vpop.f32.mrf.mxu0  ;;  %v608_v1 = vsel %vm340_vm3, %v603_v50, %v607_v44  ;;  %v3501_v14 = vfloor.f32 %v7361_v61  ;;  %v7384_v2 = vadd.s32 192, %v5853_v11 }
 0x1ef   :  { %v2719_v9 = vsel %vm9258_vm8, %v2632_v36, %v2023_v6  ;;  %v3799_v29 = vmul.f32 %v7370_v39, %v3281_v0  ;;  %v3002_v5 = vadd.f32 %v6975_v22, %v3001_v13  ;;  %v1306_v30 = vpop.permute.xlu0 %1305  ;;  %vm9259_vm6 = vcmask 293888  }
 0x1f0   :  { %1470 = vrot.lane.b32.xlu1 %v7144_v48, %s4703_s20  ;;  %4427 = vmatmul.mubr.msk.bf16.gmra.mxu0 %vm9259_vm6, %v2719_v9  ;;  %v7392_v46 = vsel %vm3714_vm0, 0.00390625, %v9071_v37  ;;  %v4397_v45 = vpop.f32.mrf.mxu0  ;;  %v9260_v50 = vrot.slane %v5428_v53, 2  ;;  %v9261_v61 = vrot.slane %v6374_v42, 2  ;;  %v7401_v16 = vor.u32 %v1716_v25, %v1715_v33 }
 0x1f1   :  { %v1195_v52 = vrot.slane %v7220_v4, 1  ;;  %4430 = vmatprep.mubr.msk.bf16.mxu0 %vm4709_vm7, %v9071_v37  ;;  %v3884_v48 = vadd.f32 %v3883_v20, %v3799_v29  ;;  %v3282_v32 = vmax.f32 %v3002_v5, 0.0  ;;  %753 = vrot.lane.b32.xlu0 %v608_v1, %s4705_s22  ;;  %v3586_v53 = vsub.f32 %v3413_v59, %v3543_v15  ;;  %v7427_v15 = vld [vmem:[%s8955_s1 + $0x118] sm:$0xff]  }
 0x1f2   :  { %v7399_v58 = vsel %vm9039_vm1, %v9261_v61, %v9260_v50  ;;  %v1483_v0 = vpop.permute.xlu1 %1482  ;;  %v1196_v36 = vrot.slane %v7217_v55, 2  ;;  %v846_v6 = vrot.slane %v7174_v10, 1  ;;  %v3544_v13 = vmul.f32 18.0, %v3501_v14 }
 0x1f3   :  { %v3415_v33 = vcvt.s32.f32 %v7384_v2  ;;  %v7413_v25 = vadd.s32 200, %v5853_v11  ;;  %v3800_v9 = vmul.f32 %v7392_v46, %v3282_v32  ;;  %v7416_v20 = vpop.permute.xlu0 %727  ;;  %v1718_v12 = vsel %vm1618_vm5, %v7146_v21, %v7401_v16 }
 0x1f4   :  { %1573 = vrot.lane.b32.xlu1 %v7399_v58, %s4702_s19  ;;  %v1944_v59 = vrot.slane %v6645_v31, 3  ;;  %vm3629_vm2 = vcmp.lt.f32.partialorder %v3500_v62, 16.0  ;;  %vm3672_vm14 = vcmp.lt.f32.partialorder %v3586_v53, 16.0  ;;  %v7431_v5 = vor.u32 %v1196_v36, %v1195_v52  ;;  %v4657_v62 = vld [vmem:[%s8955_s1 + $0xe0] sm:$0xff]  }
 0x1f5   :  { %v3885_v1 = vadd.f32 %v3884_v48, %v3800_v9  ;;  %930 = vrot.lane.b32.xlu0 %v7185_v49, %s4701_s16  ;;  %v9262_v21 = vrot.slane %v6905_v47, 1  ;;  %vm9263_vm4 = vcmask 1046528   ;;  %v3587_v50 = vsub.f32 %v3414_v38, %v3544_v13  ;;  %vm7457_vm0 = vmand %vm3629_vm2, %vm3672_vm14 }
 0x1f6   :  { %v1586_v29 = vpop.permute.xlu1 %1585  ;;  %v7444_v61 = vmul.f32 0.055555556, %v3415_v33  ;;  %v3416_v49 = vcvt.s32.f32 %v7413_v25  ;;  %vm9264_vm15 = vcmask 31744   ;;  %v9267_v48 = vrot.slane %v6374_v42, 3 }
 0x1f7   :  { %v7438_v45 = vsel %vm9263_vm4, %v9262_v21, %v846_v6  ;;  %v2130_v52 = vsel %vm9264_vm15, %v4657_v62, %v7302_v24  ;;  %v7452_v47 = vpop.permute.xlu0 %904  ;;  %vm9268_vm8 = vcmask 1044480   ;;  %v7467_v53 = vshll.u32 %v7427_v15, 16 }
 0x1f8   :  { %1853 = vrot.lane.b32.xlu1 %v1718_v12, %s4707_s26  ;;  %v2217_v34 = vsel %vm2159_vm9, %v2130_v52, %v7333_v54  ;;  %v1945_v32 = vsel %vm9268_vm8, %v9267_v48, %v1944_v59  ;;  %v7470_v24 = vshrl.u32 %v7427_v15, 16  ;;  %vm9269_vm6 = vsmask.f32 6400 }
 0x1f9   :  { %v2304_v36 = vsel %vm2246_vm10, %v2217_v34, %v7365_v41  ;;  %1033 = vrot.lane.b32.xlu0 %v7438_v45, %s4700_s15  ;;  %v1198_v13 = vsel %vm9269_vm6, %v7169_v63, %v7431_v5  ;;  %vm7479_vm2 = vcmp.lt.f32.partialorder %v3501_v14, 16.0  ;;  %v9272_v9 = vrot.slane %v6805_v56, 1 }
 0x1fa   :  { %v1866_v54 = vpop.permute.xlu1 %1865  ;;  %v2391_v21 = vsel %vm2333_vm11, %v2304_v36, %v1306_v30  ;;  %v3006_v62 = vpop.f32.mrf.mxu0  ;;  %vm3673_vm14 = vcmp.lt.f32.partialorder %v3587_v50, 16.0  ;;  %v3502_v41 = vfloor.f32 %v7444_v61  ;;  %v7490_v52 = vmul.f32 0.055555556, %v3416_v49 }
 0x1fb   :  { %v531_v12 = vor.u32 %v6808_v23, %v9272_v9  ;;  %v2478_v63 = vsel %vm2420_vm12, %v2391_v21, %v1483_v0  ;;  %v3007_v14 = vadd.f32 %v6975_v22, %v3006_v62  ;;  %v7497_v56 = vsel %vm7457_vm0, 0.00390625, %v9071_v37  ;;  %v1008_v23 = vpop.permute.xlu0 %1007  ;;  %vm3716_vm15 = vmand %vm7479_vm2, %vm3673_vm14 }
 0x1fc   :  { %2030 = vrot.lane.b32.xlu1 %v1945_v32, %s4706_s25  ;;  %v2565_v30 = vsel %vm2507_vm13, %v2478_v63, %v1586_v29  ;;  %v4400_v34 = vpop.f32.mrf.mxu0  ;;  %v1406_v61 = vrot.slane %v7427_v15, 2  ;;  %v1755_v48 = vrot.slane %v7470_v24, 2  ;;  %v1756_v36 = vrot.slane %v7467_v53, 3 }
 0x1fd   :  { %v3283_v0 = vmax.f32 %v3007_v14, 0.0  ;;  %vm9273_vm4 = vcmask 228352   ;;  %1313 = vrot.lane.b32.xlu0 %v1198_v13, %s4704_s21  ;;  %v9274_v32 = vrot.slane %v5431_v26, 1  ;;  %vm9275_vm0 = vcmask 261120  }
 0x1fe   :  { %v2652_v9 = vsel %vm9273_vm4, %v2565_v30, %v1866_v54  ;;  %v2043_v38 = vpop.permute.xlu1 %2042  ;;  %v3009_v21 = vpop.f32.mrf.mxu0  ;;  %v3545_v63 = vmul.f32 18.0, %v3502_v41  ;;  %v3503_v34 = vfloor.f32 %v7490_v52  ;;  %v7515_v14 = vadd.s32 208, %v5853_v11 }
 0x1ff   :  { %v536_v29 = vsel %vm340_vm3, %v531_v12, %v9274_v32  ;;  %v2739_v62 = vsel %vm9275_vm0, %v2652_v9, %v2043_v38  ;;  %v3801_v54 = vmul.f32 %v7497_v56, %v3283_v0  ;;  %v3010_v50 = vadd.f32 %v6975_v22, %v3009_v21  ;;  %v1288_v13 = vpop.permute.xlu0 %1287 }
 0x200   :  { %1490 = vrot.lane.b32.xlu1 %v7282_v57, %s4703_s20  ;;  %vm9276_vm8 = vcmask 293888   ;;  %v7523_v26 = vsel %vm3716_vm15, 0.00390625, %v9071_v37  ;;  %v4401_v42 = vpop.f32.mrf.mxu0  ;;  %v9277_v12 = vrot.slane %v7174_v10, 2  ;;  %v7532_v30 = vor.u32 %v1756_v36, %v1755_v48  ;;  %v4659_v10 = vld [vmem:[%s8955_s1 + $0xe8] sm:$0xff]  }
 0x201   :  { %4467 = vmatmul.mubr.msk.bf16.gmra.mxu1 %vm9276_vm8, %v2739_v62  ;;  %v3886_v0 = vadd.f32 %v3885_v1, %v3801_v54  ;;  %v3284_v57 = vmax.f32 %v3010_v50, 0.0  ;;  %735 = vrot.lane.b32.xlu0 %v536_v29, %s4705_s22  ;;  %v3588_v38 = vsub.f32 %v3415_v33, %v3545_v63  ;;  %v3546_v32 = vmul.f32 18.0, %v3503_v34 }
 0x202   :  { %v7530_v52 = vsel %vm9039_vm1, %v9277_v12, %v1406_v61  ;;  %4470 = vmatprep.mubr.msk.bf16.mxu1 %vm4709_vm7, %v9071_v37  ;;  %v1465_v9 = vpop.permute.xlu1 %1464  ;;  %v3417_v21 = vcvt.s32.f32 %v7515_v14  ;;  %v7541_v62 = vadd.s32 216, %v5853_v11  ;;  %v1758_v1 = vsel %vm1618_vm5, %v7287_v27, %v7532_v30  ;;  %v4658_v27 = vld [vmem:[%s8955_s1 + $0x98] sm:$0xff]  }
 0x203   :  { %v3802_v48 = vmul.f32 %v7523_v26, %v3284_v57  ;;  %v7544_v36 = vpop.permute.xlu0 %747  ;;  %v1964_v2 = vrot.slane %v7427_v15, 3  ;;  %vm3631_vm6 = vcmp.lt.f32.partialorder %v3502_v41, 16.0  ;;  %vm3674_vm2 = vcmp.lt.f32.partialorder %v3588_v38, 16.0 }
 0x204   :  { %1593 = vrot.lane.b32.xlu1 %v7530_v52, %s4702_s19  ;;  %v3589_v63 = vsub.f32 %v3416_v49, %v3546_v32  ;;  %v7558_v54 = vmul.f32 0.055555556, %v3417_v21  ;;  %v3418_v50 = vcvt.s32.f32 %v7541_v62  ;;  %vm9278_vm14 = vcmask 31744   ;;  %vm3717_vm0 = vmand %vm3631_vm6, %vm3674_vm2 }
 0x205   :  { %v3887_v33 = vadd.f32 %v3886_v0, %v3802_v48  ;;  %912 = vrot.lane.b32.xlu0 %v7319_v60, %s4701_s16  ;;  %v2112_v42 = vsel %vm9278_vm14, %v4658_v27, %v7416_v20  ;;  %vm9279_vm4 = vcmask 1044480   ;;  %vm9280_vm15 = vsmask.f32 6400 }
 0x206   :  { %v1568_v29 = vpop.permute.xlu1 %1567  ;;  %v2199_v25 = vsel %vm2159_vm9, %v2112_v42, %v7452_v47  ;;  %v1965_v49 = vsel %vm9279_vm4, %v1962_v3, %v1964_v2  ;;  %v1162_v41 = vsel %vm9280_vm15, %v7310_v19, %v5553_v17  ;;  %vm7582_vm8 = vcmp.lt.f32.partialorder %v3503_v34, 16.0 }
 0x207   :  { %v7566_v60 = vpop.permute.xlu0 %924  ;;  %v2286_v12 = vsel %vm2246_vm10, %v2199_v25, %v1008_v23  ;;  %v611_v47 = vor.u32 %v6951_v7, %v607_v44  ;;  %v615_v3 = vrot.slane %v7217_v55, 1  ;;  %vm3675_vm14 = vcmp.lt.f32.partialorder %v3589_v63, 16.0 }
 0x208   :  { %1873 = vrot.lane.b32.xlu1 %v1758_v1, %s4707_s26  ;;  %v2373_v57 = vsel %vm2333_vm11, %v2286_v12, %v1288_v13  ;;  %v3504_v19 = vfloor.f32 %v7558_v54  ;;  %v7601_v7 = vsel %vm3717_vm0, 0.00390625, %v9071_v37  ;;  %vm9283_vm6 = vcmask 228352   ;;  %vm3718_vm2 = vmand %vm7582_vm8, %vm3675_vm14 }
 0x209   :  { %1015 = vrot.lane.b32.xlu0 %v5526_v43, %s4700_s15  ;;  %v7594_v43 = vmul.f32 0.055555556, %v3418_v50  ;;  %v2460_v23 = vsel %vm2420_vm12, %v2373_v57, %v1465_v9  ;;  %vm9284_vm4 = vcmask 261120   ;;  %vm9285_vm15 = vcmask 293888  }
 0x20a   :  { %v1848_v20 = vpop.permute.xlu1 %1847  ;;  %v3014_v17 = vpop.f32.mrf.mxu0  ;;  %v2547_v40 = vsel %vm2507_vm13, %v2460_v23, %v1568_v29  ;;  %v616_v29 = vsel %vm340_vm3, %v611_v47, %v615_v3  ;;  %v3547_v63 = vmul.f32 18.0, %v3504_v19  ;;  %v848_v12 = vrot.slane %v7427_v15, 1  ;;  %v7631_v23 = vld [vmem:[%s8955_s1 + $0x120] sm:$0xff]  }
 0x20b   :  { %v3015_v34 = vadd.f32 %v6975_v22, %v3014_v17  ;;  %v1028_v38 = vpop.permute.xlu0 %1027  ;;  %v2634_v32 = vsel %vm9283_vm6, %v2547_v40, %v1848_v20  ;;  %v3505_v54 = vfloor.f32 %v7594_v43  ;;  %v1199_v57 = vrot.slane %v7470_v24, 1 }
 0x20c   :  { %2050 = vrot.lane.b32.xlu1 %v1965_v49, %s4706_s25  ;;  %v4404_v44 = vpop.f32.mrf.mxu0  ;;  %v7618_v49 = vsel %vm3718_vm2, 0.00390625, %v9071_v37  ;;  %v3590_v17 = vsub.f32 %v3417_v21, %v3547_v63  ;;  %v7639_v40 = vadd.s32 224, %v5853_v11  ;;  %vm9287_vm0 = vcmask 1046528  }
 0x20d   :  { %v3285_v13 = vmax.f32 %v3015_v34, 0.0  ;;  %1295 = vrot.lane.b32.xlu0 %v1162_v41, %s4704_s21  ;;  %v3548_v43 = vmul.f32 18.0, %v3505_v54  ;;  %v9286_v44 = vld [vmem:[#allocation6_spill] sm:$0xff]  ;;  %vm7653_vm8 = vcmp.lt.f32.partialorder %v3504_v19, 16.0  ;;  %vm9290_vm6 = vcmask 31744  }
 0x20e   :  { %v2025_v9 = vpop.permute.xlu1 %2024  ;;  %v3017_v48 = vpop.f32.mrf.mxu0  ;;  %v1722_v14 = vsel %vm1618_vm5, %v7401_v16, %v9286_v44  ;;  %vm3676_vm14 = vcmp.lt.f32.partialorder %v3590_v17, 16.0  ;;  %v3419_v62 = vcvt.s32.f32 %v7639_v40  ;;  %vm9293_vm2 = vcmask 1044480  }
 0x20f   :  { %v2721_v1 = vsel %vm9284_vm4, %v2634_v32, %v2025_v9  ;;  %v3803_v27 = vmul.f32 %v7601_v7, %v3285_v13  ;;  %v3018_v42 = vadd.f32 %v6975_v22, %v3017_v48  ;;  %v1308_v25 = vpop.permute.xlu0 %1307  ;;  %v7651_v32 = vsel %vm9287_vm0, %v846_v6, %v848_v12  ;;  %vm7693_vm4 = vmand %vm7653_vm8, %vm3676_vm14 }
 0x210   :  { %1472 = vrot.lane.b32.xlu1 %v7399_v58, %s4703_s20  ;;  %4431 = vmatmul.mubr.msk.bf16.gmra.mxu0 %vm9285_vm15, %v2721_v1  ;;  %v4405_v41 = vpop.f32.mrf.mxu0  ;;  %v1200_v58 = vrot.slane %v7467_v53, 2  ;;  %v3591_v16 = vsub.f32 %v3418_v50, %v3548_v43  ;;  %v7665_v48 = vshrl.u32 %v7631_v23, 16  ;;  %v2132_v6 = vsel %vm9290_vm6, %v4659_v10, %v7544_v36 }
 0x211   :  { %4434 = vmatprep.mubr.msk.bf16.mxu0 %vm4709_vm7, %v9071_v37  ;;  %v3888_v20 = vadd.f32 %v3887_v33, %v3803_v27  ;;  %v3286_v0 = vmax.f32 %v3018_v42, 0.0  ;;  %755 = vrot.lane.b32.xlu0 %v616_v29, %s4705_s22  ;;  %v7677_v50 = vadd.s32 232, %v5853_v11  ;;  %v2219_v1 = vsel %vm2159_vm9, %v2132_v6, %v7566_v60  ;;  %v9291_v29 = vld [vmem:[#allocation5_spill] sm:$0xff] }
 0x212   :  { %v1485_v47 = vpop.permute.xlu1 %1484  ;;  %v7657_v9 = vor.u32 %v1200_v58, %v1199_v57  ;;  %v9292_v63 = vrot.slane %v9291_v29, 3  ;;  %v1408_v36 = vrot.slane %v7631_v23, 2  ;;  %v2306_v42 = vsel %vm2246_vm10, %v2219_v1, %v1028_v38 }
 0x213   :  { %v3804_v34 = vmul.f32 %v7618_v49, %v3286_v0  ;;  %v7634_v33 = vpop.permute.xlu0 %729  ;;  %vm9296_vm15 = vsmask.f32 6400  ;;  %vm7700_vm0 = vcmp.lt.f32.partialorder %v3505_v54, 16.0  ;;  %v2393_v38 = vsel %vm2333_vm11, %v2306_v42, %v1308_v25 }
 0x214   :  { %1575 = vrot.lane.b32.xlu1 %v5588_v35, %s4702_s19  ;;  %v1947_v27 = vsel %vm9293_vm2, %v1944_v59, %v9292_v63  ;;  %v1202_v31 = vsel %vm9296_vm15, %v7431_v5, %v7657_v9  ;;  %vm3677_vm6 = vcmp.lt.f32.partialorder %v3591_v16, 16.0  ;;  %v1759_v0 = vrot.slane %v7665_v48, 2 }
 0x215   :  { %v3889_v21 = vadd.f32 %v3888_v20, %v3804_v34  ;;  %932 = vrot.lane.b32.xlu0 %v7438_v45, %s4701_s16  ;;  %v7662_v45 = vshll.u32 %v7631_v23, 16  ;;  %v2480_v58 = vsel %vm2420_vm12, %v2393_v38, %v1485_v47  ;;  %v7712_v5 = vmul.f32 0.055555556, %v3419_v62  ;;  %vm3720_vm14 = vmand %vm7700_vm0, %vm3677_vm6 }
 0x216   :  { %v1588_v13 = vpop.permute.xlu1 %1587  ;;  %v3420_v54 = vcvt.s32.f32 %v7677_v50  ;;  %v7719_v34 = vsel %vm7693_vm4, 0.00390625, %v9071_v37  ;;  %v7726_v47 = vsel %vm9039_vm1, %v1406_v61, %v1408_v36  ;;  %vm9299_vm8 = vcmask 228352  }
 0x217   :  { %v7672_v19 = vpop.permute.xlu0 %906  ;;  %v1760_v57 = vrot.slane %v7662_v45, 3  ;;  %v2567_v25 = vsel %vm2507_vm13, %v2480_v58, %v1588_v13  ;;  %vm9300_vm2 = vcmask 261120   ;;  %vm9301_vm4 = vcmask 293888  }
 0x218   :  { %1855 = vrot.lane.b32.xlu1 %v1722_v14, %s4707_s26  ;;  %v1966_v14 = vrot.slane %v7631_v23, 3  ;;  %v3506_v16 = vfloor.f32 %v7712_v5  ;;  %v7745_v42 = vmul.f32 0.055555556, %v3420_v54  ;;  %v7748_v41 = vsel %vm3720_vm14, 0.00390625, %v9071_v37 }
 0x219   :  { %1035 = vrot.lane.b32.xlu0 %v7651_v32, %s4700_s15  ;;  %v7735_v29 = vor.u32 %v1760_v57, %v1759_v0  ;;  %vm9302_vm15 = vcmask 1044480   ;;  %v1204_v59 = vrot.slane %v7662_v45, 2  ;;  %v623_v58 = vrot.slane %v7467_v53, 1 }
 0x21a   :  { %v1868_v60 = vpop.permute.xlu1 %1867  ;;  %v3022_v20 = vpop.f32.mrf.mxu0  ;;  %vm9303_vm0 = vcmask 31744   ;;  %vm9304_vm6 = vsmask.f32 6400  ;;  %vm3635_vm14 = vcmp.lt.f32.partialorder %v3506_v16, 16.0 }
 0x21b   :  { %v3023_v17 = vadd.f32 %v6975_v22, %v3022_v20  ;;  %v1010_v43 = vpop.permute.xlu0 %1009  ;;  %v2654_v10 = vsel %vm9299_vm8, %v2567_v25, %v1868_v60  ;;  %v1762_v57 = vsel %vm1618_vm5, %v7532_v30, %v7735_v29  ;;  %v3507_v30 = vfloor.f32 %v7745_v42 }
 0x21c   :  { %2032 = vrot.lane.b32.xlu1 %v1947_v27, %s4706_s25  ;;  %v4408_v44 = vpop.f32.mrf.mxu0  ;;  %vm9305_vm8 = vcmask 1046528  }
 0x21d   :  { %v3287_v35 = vmax.f32 %v3023_v17, 0.0  ;;  %1315 = vrot.lane.b32.xlu0 %v1202_v31, %s4704_s21  ;;  %v1203_v31 = vrot.slane %v7665_v48, 1  ;;  %v7771_v17 = vld [vmem:[%s8955_s1 + $0x128] sm:$0xff]  }
 0x21e   :  { %v2045_v13 = vpop.permute.xlu1 %2044  ;;  %v3025_v6 = vpop.f32.mrf.mxu0  ;;  %v7786_v44 = vshll.u32 %v7771_v17, 16 }
 0x21f   :  { %v2741_v1 = vsel %vm9300_vm2, %v2654_v10, %v2045_v13  ;;  %v3805_v61 = vmul.f32 %v7719_v34, %v3287_v35  ;;  %v3026_v63 = vadd.f32 %v6975_v22, %v3025_v6  ;;  %v1290_v27 = vpop.permute.xlu0 %1289  ;;  %v1967_v22 = vsel %vm9302_vm15, %v1964_v2, %v1966_v14  ;;  %v4660_v10 = vld [vmem:[%s8955_s1 + $0xa0] sm:$0xff]  }
 0x220   :  { %4471 = vmatmul.mubr.msk.bf16.gmra.mxu1 %vm9301_vm4, %v2741_v1  ;;  %1595 = vrot.lane.b32.xlu1 %v7726_v47, %s4702_s19  ;;  %v4409_v60 = vpop.f32.mrf.mxu0  ;;  %v619_v2 = vor.u32 %v7220_v4, %v615_v3  ;;  %v7778_v25 = vor.u32 %v1204_v59, %v1203_v31  ;;  %v850_v3 = vrot.slane %v7631_v23, 1  ;;  %v7789_v35 = vshrl.u32 %v7771_v17, 16 }
 0x221   :  { %4474 = vmatprep.mubr.msk.bf16.mxu1 %vm4709_vm7, %v9071_v37  ;;  %v3890_v38 = vadd.f32 %v3889_v21, %v3805_v61  ;;  %v3288_v20 = vmax.f32 %v3026_v63, 0.0  ;;  %1492 = vrot.lane.b32.xlu0 %v7530_v52, %s4703_s20  ;;  %v3549_v52 = vmul.f32 18.0, %v3506_v16  ;;  %v2114_v13 = vsel %vm9303_vm0, %v4660_v10, %v7634_v33 }
 0x222   :  { %v1467_v0 = vpop.permute.xlu1 %1466  ;;  %v624_v53 = vsel %vm340_vm3, %v619_v2, %v623_v58  ;;  %v3550_v61 = vmul.f32 18.0, %v3507_v30  ;;  %v2201_v63 = vsel %vm2159_vm9, %v2114_v13, %v7672_v19  ;;  %v1206_v42 = vsel %vm9304_vm6, %v7657_v9, %v7778_v25 }
 0x223   :  { %v3806_v21 = vmul.f32 %v7748_v41, %v3288_v20  ;;  %v7774_v5 = vpop.permute.xlu0 %749  ;;  %v3592_v1 = vsub.f32 %v3419_v62, %v3549_v52  ;;  %v1410_v60 = vrot.slane %v7771_v17, 2  ;;  %v2288_v33 = vsel %vm2246_vm10, %v2201_v63, %v1010_v43 }
 0x224   :  { %2052 = vrot.lane.b32.xlu1 %v1967_v22, %s4706_s25  ;;  %v851_v40 = vsel %vm9305_vm8, %v848_v12, %v850_v3  ;;  %v1763_v19 = vrot.slane %v7789_v35, 2  ;;  %v1764_v62 = vrot.slane %v7786_v44, 3  ;;  %v3593_v43 = vsub.f32 %v3420_v54, %v3550_v61  ;;  %v7875_v61 = vld [vmem:[%s8955_s1 + $0x130] sm:$0xff]  }
 0x225   :  { %v7780_v55 = vadd.f32 %v3890_v38, %v3806_v21  ;;  %1875 = vrot.lane.b32.xlu0 %v1762_v57, %s4707_s26  ;;  %vm3678_vm2 = vcmp.lt.f32.partialorder %v3592_v1, 16.0  ;;  %v7830_v15 = vsel %vm9039_vm1, %v1408_v36, %v1410_v60  ;;  %v1968_v12 = vrot.slane %v7771_v17, 3 }
 0x226   :  { %v1570_v4 = vpop.permute.xlu1 %1569  ;;  %vm9306_vm4 = vcmask 228352   ;;  %vm9307_vm15 = vcmask 261120   ;;  %vm3721_vm0 = vmand %vm3635_vm14, %vm3678_vm2  ;;  %v7836_v50 = vor.u32 %v1764_v62, %v1763_v19  ;;  %vm9308_vm6 = vcmask 293888  }
 0x227   :  { %v7796_v6 = vpop.permute.xlu0 %926  ;;  %vm7841_vm8 = vcmp.lt.f32.partialorder %v3507_v30, 16.0  ;;  %vm9311_vm14 = vcmask 1044480   ;;  %v1207_v21 = vrot.slane %v7789_v35, 1  ;;  %v1208_v52 = vrot.slane %v7786_v44, 2 }
 0x228   :  { %934 = vrot.lane.b32.xlu1 %v7651_v32, %s4701_s16  ;;  %v2375_v32 = vsel %vm2333_vm11, %v2288_v33, %v1290_v27  ;;  %v1969_v2 = vsel %vm9311_vm14, %v1966_v14, %v1968_v12  ;;  %v7861_v30 = vsel %vm3721_vm0, 0.00390625, %v9071_v37  ;;  %v627_v10 = vor.u32 %v7470_v24, %v623_v58 }
 0x229   :  { %757 = vrot.lane.b32.xlu0 %v624_v53, %s4705_s22  ;;  %v2462_v9 = vsel %vm2420_vm12, %v2375_v32, %v1467_v0  ;;  %v7848_v0 = vld [vmem:[%s8958_s4 + $0x1] ss:$0 sm:$0xff]  ;;  %v631_v13 = vrot.slane %v7662_v45, 1  ;;  %v1766_v1 = vsel %vm1618_vm5, %v7735_v29, %v7836_v50  ;;  %v7881_v24 = vadd.s32 240, %v5853_v11 }
 0x22a   :  { %v1850_v22 = vpop.permute.xlu1 %1849  ;;  %v2549_v27 = vsel %vm2507_vm13, %v2462_v9, %v1570_v4  ;;  %v7885_v33 = vor.u32 %v1208_v52, %v1207_v21  ;;  %v852_v62 = vrot.slane %v7771_v17, 1  ;;  %v7912_v36 = vadd.s32 248, %v5853_v11 }
 0x22b   :  { %v7819_v31 = vpop.permute.xlu0 %1029  ;;  %v2636_v59 = vsel %vm9306_vm4, %v2549_v27, %v1850_v22  ;;  %vm3679_vm4 = vcmp.lt.f32.partialorder %v3593_v43, 16.0  ;;  %v632_v19 = vsel %vm340_vm3, %v627_v10, %v631_v13  ;;  %v7897_v27 = vshll.u32 %v7875_v61, 16 }
 0x22c   :  { %1317 = vrot.lane.b32.xlu1 %v1206_v42, %s4704_s21  ;;  %vm3722_vm2 = vmand %vm7841_vm8, %vm3679_vm4  ;;  %vm9313_vm0 = vsmask.f32 6400  ;;  %vm9315_vm8 = vcmask 228352   ;;  %vm9316_vm4 = vcmask 261120   ;;  %vm9317_vm14 = vcmask 293888  }
 0x22d   :  { %1037 = vrot.lane.b32.xlu0 %v851_v40, %s4700_s15  ;;  %v7888_v29 = vsel %vm3722_vm2, 0.00390625, %v9071_v37  ;;  %v1210_v21 = vsel %vm9313_vm0, %v7778_v25, %v7885_v33  ;;  %vm9318_vm2 = vcmask 1044480  }
 0x22e   :  { %v2027_v16 = vpop.permute.xlu1 %2026 }
 0x22f   :  { %v2723_v38 = vsel %vm9307_vm15, %v2636_v59, %v2027_v16  ;;  %v1310_v54 = vpop.permute.xlu0 %1309  ;;  %v7900_v59 = vshrl.u32 %v7875_v61, 16  ;;  %v4662_v16 = vld [vmem:[%s8955_s1 + $0xf0] sm:$0xff]   ;;  %vm9312_vm15 = vcmask 31744  }
 0x230   :  { %v3030_v20 = vpop.f32.mrf.mxu0  ;;  %4435 = vmatmul.mubr.msk.bf16.gmra.mxu0 %vm9308_vm6, %v2723_v38  ;;  %1597 = vrot.lane.b32.xlu1 %v7830_v15, %s4702_s19  ;;  %v2134_v38 = vsel %vm9312_vm15, %v4662_v16, %v7774_v5  ;;  %v1412_v5 = vrot.slane %v7875_v61, 2  ;;  %vm9314_vm6 = vcmask 1046528  }
 0x231   :  { %v3031_v57 = vadd.f32 %v7848_v0, %v3030_v20  ;;  %4438 = vmatprep.mubr.msk.bf16.mxu0 %vm4709_vm7, %v9071_v37  ;;  %1494 = vrot.lane.b32.xlu0 %v7726_v47, %s4703_s20  ;;  %v1767_v25 = vrot.slane %v7900_v59, 2  ;;  %v1211_v16 = vrot.slane %v7900_v59, 1 }
 0x232   :  { %v1487_v4 = vpop.permute.xlu1 %1486  ;;  %v4412_v53 = vpop.f32.mrf.mxu0 }
 0x233   :  { %v3289_v14 = vmax.f32 %v3031_v57, 0.0  ;;  %v7877_v47 = vpop.permute.xlu0 %731  ;;  %v2221_v57 = vsel %vm2159_vm9, %v2134_v38, %v7796_v6  ;;  %v853_v6 = vsel %vm9314_vm6, %v850_v3, %v852_v62  ;;  %v7943_v3 = vsel %vm9039_vm1, %v1410_v60, %v1412_v5 }
 0x234   :  { %v3033_v63 = vpop.f32.mrf.mxu0  ;;  %2054 = vrot.lane.b32.xlu1 %v1969_v2, %s4706_s25  ;;  %v2308_v52 = vsel %vm2246_vm10, %v2221_v57, %v7819_v31  ;;  %v1212_v38 = vrot.slane %v7897_v27, 2 }
 0x235   :  { %v3807_v58 = vmul.f32 %v7861_v30, %v3289_v14  ;;  %v3034_v42 = vadd.f32 %v7848_v0, %v3033_v63  ;;  %1877 = vrot.lane.b32.xlu0 %v1766_v1, %s4707_s26  ;;  %v2395_v53 = vsel %vm2333_vm11, %v2308_v52, %v1310_v54  ;;  %v1768_v14 = vrot.slane %v7897_v27, 3  ;;  %v7977_v52 = vld [vmem:[%s8955_s1 + $0x138] sm:$0xff]  }
 0x236   :  { %v1590_v22 = vpop.permute.xlu1 %1589  ;;  %v4413_v32 = vpop.f32.mrf.mxu0  ;;  %v2482_v1 = vsel %vm2420_vm12, %v2395_v53, %v1487_v4  ;;  %v1970_v54 = vrot.slane %v7875_v61, 3 }
 0x237   :  { %v3892_v9 = vadd.f32 %v7780_v55, %v3807_v58  ;;  %v3290_v43 = vmax.f32 %v3034_v42, 0.0  ;;  %v7907_v20 = vpop.permute.xlu0 %908  ;;  %v3421_v55 = vcvt.s32.f32 %v7881_v24  ;;  %v3422_v24 = vcvt.s32.f32 %v7912_v36 }
 0x238   :  { %936 = vrot.lane.b32.xlu1 %v851_v40, %s4701_s16  ;;  %v2569_v23 = vsel %vm2507_vm13, %v2482_v1, %v1590_v22  ;;  %v7949_v32 = vor.u32 %v1768_v14, %v1767_v25  ;;  %v7990_v14 = vshll.u32 %v7977_v52, 16  ;;  %v7993_v1 = vshrl.u32 %v7977_v52, 16 }
 0x239   :  { %v3808_v2 = vmul.f32 %v7888_v29, %v3290_v43  ;;  %759 = vrot.lane.b32.xlu0 %v632_v19, %s4705_s22  ;;  %v3465_v63 = vmul.f32 0.055555556, %v3421_v55  ;;  %v1971_v43 = vsel %vm9318_vm2, %v1968_v12, %v1970_v54  ;;  %v635_v12 = vor.u32 %v7665_v48, %v631_v13 }
 0x23a   :  { %v1870_v40 = vpop.permute.xlu1 %1869  ;;  %v854_v13 = vrot.slane %v7875_v61, 1  ;;  %vm9320_vm2 = vcmask 261120  }
 0x23b   :  { %v7930_v10 = vadd.f32 %v3892_v9, %v3808_v2  ;;  %v1012_v31 = vpop.permute.xlu0 %1011  ;;  %v2656_v58 = vsel %vm9315_vm8, %v2569_v23, %v1870_v40  ;;  %v3508_v60 = vfloor.f32 %v3465_v63  ;;  %v3466_v9 = vmul.f32 0.055555556, %v3422_v24  ;;  %v4663_v63 = vld [vmem:[%s8955_s1 + $0xa8] sm:$0xff]  }
 0x23c   :  { %1319 = vrot.lane.b32.xlu1 %v1210_v21, %s4704_s21  ;;  %v1770_v2 = vsel %vm1618_vm5, %v7836_v50, %v7949_v32  ;;  %v639_v21 = vrot.slane %v7786_v44, 1  ;;  %v7984_v50 = vor.u32 %v1212_v38, %v1211_v16  ;;  %v2116_v23 = vsel %vm9312_vm15, %v4663_v63, %v7877_v47 }
 0x23d   :  { %1039 = vrot.lane.b32.xlu0 %v853_v6, %s4700_s15  ;;  %v3551_v53 = vmul.f32 18.0, %v3508_v60  ;;  %v3509_v25 = vfloor.f32 %v3466_v9  ;;  %v2203_v9 = vsel %vm2159_vm9, %v2116_v23, %v7907_v20  ;;  %v1414_v16 = vrot.slane %v7977_v52, 2 }
 0x23e   :  { %v2047_v4 = vpop.permute.xlu1 %2046  ;;  %v640_v44 = vsel %vm340_vm3, %v635_v12, %v639_v21  ;;  %v2290_v38 = vsel %vm2246_vm10, %v2203_v9, %v1012_v31  ;;  %v1771_v20 = vrot.slane %v7993_v1, 2  ;;  %vm3637_vm8 = vcmp.lt.f32.partialorder %v3508_v60, 16.0 }
 0x23f   :  { %v2743_v42 = vsel %vm9316_vm4, %v2656_v58, %v2047_v4  ;;  %v1292_v19 = vpop.permute.xlu0 %1291  ;;  %v3594_v4 = vsub.f32 %v3421_v55, %v3551_v53  ;;  %v855_v55 = vsel %vm9314_vm6, %v852_v62, %v854_v13  ;;  %v8029_v17 = vsel %vm9039_vm1, %v1412_v5, %v1414_v16 }
 0x240   :  { %v7951_v22 = vpop.f32.mrf.mxu1  ;;  %4475 = vmatmul.mubr.msk.bf16.gmra.mxu1 %vm9317_vm14, %v2743_v42  ;;  %1599 = vrot.lane.b32.xlu1 %v7943_v3, %s4702_s19  ;;  %v3552_v42 = vmul.f32 18.0, %v3509_v25  ;;  %v1972_v62 = vrot.slane %v7977_v52, 3  ;;  %vm9319_vm14 = vcmask 228352   ;;  %vm3638_vm6 = vcmp.lt.f32.partialorder %v3509_v25, 16.0 }
 0x241   :  { %4478 = vmatprep.mubr.msk.bf16.mxu1 %vm4709_vm7, %v9071_v37  ;;  %1496 = vrot.lane.b32.xlu0 %v7830_v15, %s4703_s20  ;;  %vm3680_vm4 = vcmp.lt.f32.partialorder %v3594_v4, 16.0  ;;  %v1216_v63 = vrot.slane %v7990_v14, 2  ;;  %v647_v9 = vrot.slane %v7897_v27, 1 }
 0x242   :  { %v1469_v36 = vpop.permute.xlu1 %1468  ;;  %v4452_v57 = vpop.f32.mrf.mxu1  ;;  %v3595_v31 = vsub.f32 %v3422_v24, %v3552_v42  ;;  %vm3723_vm15 = vmand %vm3637_vm8, %vm3680_vm4  ;;  %v643_v42 = vor.u32 %v7789_v35, %v639_v21  ;;  %v8069_v35 = vadd.s32 256, %v5853_v11  ;;  %vm9324_vm4 = vsmask.f32 6400 }
 0x243   :  { %v7979_v40 = vpop.permute.xlu0 %751  ;;  %v2377_v57 = vsel %vm2333_vm11, %v2290_v38, %v1292_v19  ;;  %v8051_v23 = vsel %vm3723_vm15, 0.00390625, %v9071_v37  ;;  %v8063_v38 = vld [vmem:[%s8955_s1 + $0x140] sm:$0xff]   ;;  %vm9326_vm15 = vcmask 1045504  }
 0x244   :  { %v7981_v15 = vpop.f32.mrf.mxu1  ;;  %2056 = vrot.lane.b32.xlu1 %v1971_v43, %s4706_s25  ;;  %v1214_v43 = vsel %vm9313_vm0, %v7885_v33, %v7984_v50  ;;  %v2464_v33 = vsel %vm2420_vm12, %v2377_v57, %v1469_v36  ;;  %vm9321_vm0 = vcmask 293888   ;;  %vm3681_vm1 = vcmp.lt.f32.partialorder %v3595_v31, 16.0 }
 0x245   :  { %1879 = vrot.lane.b32.xlu0 %v1770_v2, %s4707_s26  ;;  %vm3724_vm8 = vmand %vm3638_vm6, %vm3681_vm1  ;;  %v648_v31 = vsel %vm340_vm3, %v643_v42, %v647_v9  ;;  %vm9323_vm1 = vcmask 31744   ;;  %vm9328_vm6 = vcmask 261120  }
 0x246   :  { %v1572_v45 = vpop.permute.xlu1 %1571  ;;  %v4453_v48 = vpop.f32.mrf.mxu1 }
 0x247   :  { %v8000_v58 = vpop.permute.xlu0 %928  ;;  %v2551_v19 = vsel %vm2507_vm13, %v2464_v33, %v1572_v45 }
 0x248   :  { %938 = vrot.lane.b32.xlu1 %v853_v6, %s4701_s16  ;;  %v1772_v6 = vrot.slane %v7990_v14, 3 }
 0x249   :  { %761 = vrot.lane.b32.xlu0 %v640_v44, %s4705_s22  ;;  %v1215_v44 = vrot.slane %v7993_v1, 1 }
 0x24a   :  { %v1852_v47 = vpop.permute.xlu1 %1851  ;;  %v8035_v24 = vor.u32 %v1772_v6, %v1771_v20 }
 0x24b   :  { %v8020_v2 = vpop.permute.xlu0 %1031  ;;  %v2638_v36 = vsel %vm9319_vm14, %v2551_v19, %v1852_v47  ;;  %vm9322_vm14 = vcmask 1044480   ;;  %v8073_v20 = vor.u32 %v1216_v63, %v1215_v44  ;;  %v856_v19 = vrot.slane %v7977_v52, 1 }
 0x24c   :  { %1321 = vrot.lane.b32.xlu1 %v1214_v43, %s4704_s21  ;;  %v1973_v48 = vsel %vm9322_vm14, %v1970_v54, %v1972_v62  ;;  %v1774_v43 = vsel %vm1618_vm5, %v7949_v32, %v8035_v24  ;;  %v8076_v32 = vsel %vm3724_vm8, 0.00390625, %v9071_v37  ;;  %v8100_v63 = vadd.s32 264, %v5853_v11 }
 0x24d   :  { %1041 = vrot.lane.b32.xlu0 %v855_v55, %s4700_s15  ;;  %vm9329_vm14 = vcmask 293888   ;;  %vm9330_vm8 = vcmask 1044480  }
 0x24e   :  { %v2029_v12 = vpop.permute.xlu1 %2028 }
 0x24f   :  { %v2725_v60 = vsel %vm9320_vm2, %v2638_v36, %v2029_v12  ;;  %v1312_v53 = vpop.permute.xlu0 %1311  ;;  %vm9325_vm2 = vcmask 1046528  }
 0x250   :  { %v3038_v45 = vpop.f32.mrf.mxu0  ;;  %4439 = vmatmul.mubr.msk.bf16.gmra.mxu0 %vm9321_vm0, %v2725_v60  ;;  %1601 = vrot.lane.b32.xlu1 %v8029_v17, %s4702_s19  ;;  %v8085_v60 = vshll.u32 %v8063_v38, 16  ;;  %vm9327_vm0 = vcmask 228352  }
 0x251   :  { %v3039_v5 = vadd.f32 %v7848_v0, %v3038_v45  ;;  %4442 = vmatprep.mubr.msk.bf16.mxu0 %vm4709_vm7, %v9071_v37  ;;  %1498 = vrot.lane.b32.xlu0 %v7943_v3, %s4703_s20  ;;  %v8088_v45 = vshrl.u32 %v8063_v38, 16 }
 0x252   :  { %v1489_v25 = vpop.permute.xlu1 %1488  ;;  %v4416_v4 = vpop.f32.mrf.mxu0 }
 0x253   :  { %v3291_v54 = vmax.f32 %v3039_v5, 0.0  ;;  %v8065_v47 = vpop.permute.xlu0 %733  ;;  %v4664_v5 = vld [vmem:[%s8955_s1 + $0xf8] sm:$0xff]  }
 0x254   :  { %v3041_v3 = vpop.f32.mrf.mxu0  ;;  %2058 = vrot.lane.b32.xlu1 %v1973_v48, %s4706_s25  ;;  %v2136_v48 = vsel %vm9323_vm1, %v4664_v5, %v7979_v40  ;;  %v1416_v40 = vrot.slane %v8063_v38, 2 }
 0x255   :  { %v3809_v21 = vmul.f32 %v8051_v23, %v3291_v54  ;;  %v3042_v57 = vadd.f32 %v7848_v0, %v3041_v3  ;;  %1881 = vrot.lane.b32.xlu0 %v1774_v43, %s4707_s26  ;;  %v2223_v4 = vsel %vm2159_vm9, %v2136_v48, %v8000_v58  ;;  %v1218_v54 = vsel %vm9324_vm4, %v7984_v50, %v8073_v20 }
 0x256   :  { %v1592_v6 = vpop.permute.xlu1 %1591  ;;  %v4417_v33 = vpop.f32.mrf.mxu0  ;;  %v2310_v43 = vsel %vm2246_vm10, %v2223_v4, %v8020_v2  ;;  %v857_v58 = vsel %vm9325_vm2, %v854_v13, %v856_v19  ;;  %v1775_v50 = vrot.slane %v8088_v45, 2  ;;  %v8131_v13 = vsel %vm9326_vm15, %v1414_v16, %v1416_v40 }
 0x257   :  { %v3894_v36 = vadd.f32 %v7930_v10, %v3809_v21  ;;  %v3292_v12 = vmax.f32 %v3042_v57, 0.0  ;;  %v8095_v44 = vpop.permute.xlu0 %910  ;;  %v3423_v10 = vcvt.s32.f32 %v8069_v35  ;;  %v2397_v3 = vsel %vm2333_vm11, %v2310_v43, %v1312_v53 }
 0x258   :  { %940 = vrot.lane.b32.xlu1 %v855_v55, %s4701_s16  ;;  %v1776_v21 = vrot.slane %v8085_v60, 3  ;;  %v2484_v57 = vsel %vm2420_vm12, %v2397_v3, %v1489_v25  ;;  %v1974_v53 = vrot.slane %v8063_v38, 3 }
 0x259   :  { %v3810_v42 = vmul.f32 %v8076_v32, %v3292_v12  ;;  %763 = vrot.lane.b32.xlu0 %v648_v31, %s4705_s22  ;;  %v3467_v33 = vmul.f32 0.055555556, %v3423_v10  ;;  %v3424_v31 = vcvt.s32.f32 %v8100_v63  ;;  %v2571_v61 = vsel %vm2507_vm13, %v2484_v57, %v1592_v6 }
 0x25a   :  { %v1872_v55 = vpop.permute.xlu1 %1871  ;;  %v8137_v5 = vor.u32 %v1776_v21, %v1775_v50  ;;  %v1975_v4 = vsel %vm9330_vm8, %v1972_v62, %v1974_v53  ;;  %v651_v62 = vor.u32 %v7900_v59, %v647_v9  ;;  %v655_v50 = vrot.slane %v7990_v14, 1  ;;  %v8165_v21 = vld [vmem:[%s8955_s1 + $0x148] sm:$0xff]  }
 0x25b   :  { %v8118_v35 = vadd.f32 %v3894_v36, %v3810_v42  ;;  %v1014_v2 = vpop.permute.xlu0 %1013  ;;  %v2658_v36 = vsel %vm9327_vm0, %v2571_v61, %v1872_v55  ;;  %v3510_v16 = vfloor.f32 %v3467_v33  ;;  %v3468_v63 = vmul.f32 0.055555556, %v3424_v31 }
 0x25c   :  { %1323 = vrot.lane.b32.xlu1 %v1218_v54, %s4704_s21  ;;  %v1219_v42 = vrot.slane %v8088_v45, 1  ;;  %v1220_v54 = vrot.slane %v8085_v60, 2  ;;  %v1778_v3 = vsel %vm1618_vm5, %v8035_v24, %v8137_v5  ;;  %v656_v14 = vsel %vm340_vm3, %v651_v62, %v655_v50 }
 0x25d   :  { %1043 = vrot.lane.b32.xlu0 %v857_v58, %s4700_s15  ;;  %v3553_v33 = vmul.f32 18.0, %v3510_v16  ;;  %v3511_v61 = vfloor.f32 %v3468_v63  ;;  %v858_v9 = vrot.slane %v8063_v38, 1  ;;  %v1418_v62 = vrot.slane %v8165_v21, 2 }
 0x25e   :  { %v2049_v25 = vpop.permute.xlu1 %2048  ;;  %v8172_v24 = vor.u32 %v1220_v54, %v1219_v42  ;;  %vm3639_vm15 = vcmp.lt.f32.partialorder %v3510_v16, 16.0  ;;  %vm9333_vm8 = vcmask 261120  }
 0x25f   :  { %v2745_v12 = vsel %vm9328_vm6, %v2658_v36, %v2049_v25  ;;  %v1294_v48 = vpop.permute.xlu0 %1293  ;;  %v8178_v36 = vshll.u32 %v8165_v21, 16  ;;  %v8181_v25 = vshrl.u32 %v8165_v21, 16  ;;  %v3596_v42 = vsub.f32 %v3423_v10, %v3553_v33 }
 0x260   :  { %v8139_v6 = vpop.f32.mrf.mxu1  ;;  %4479 = vmatmul.mubr.msk.bf16.gmra.mxu1 %vm9329_vm14, %v2745_v12  ;;  %1603 = vrot.lane.b32.xlu1 %v8131_v13, %s4702_s19  ;;  %v4665_v12 = vld [vmem:[%s8955_s1 + $0xb0] sm:$0xff]   ;;  %v3554_v54 = vmul.f32 18.0, %v3511_v61  ;;  %v859_v10 = vsel %vm9325_vm2, %v856_v19, %v858_v9  ;;  %vm9331_vm6 = vcmask 1045504   ;;  %v1976_v19 = vrot.slane %v8165_v21, 3 }
 0x261   :  { %4482 = vmatprep.mubr.msk.bf16.mxu1 %vm4709_vm7, %v9071_v37  ;;  %1500 = vrot.lane.b32.xlu0 %v8029_v17, %s4703_s20  ;;  %v2118_v63 = vsel %vm9323_vm1, %v4665_v12, %v8065_v47  ;;  %vm3682_vm0 = vcmp.lt.f32.partialorder %v3596_v42, 16.0  ;;  %v8217_v52 = vsel %vm9331_vm6, %v1416_v40, %v1418_v62  ;;  %vm9332_vm14 = vcmask 228352  }
 0x262   :  { %v1471_v43 = vpop.permute.xlu1 %1470  ;;  %v4456_v55 = vpop.f32.mrf.mxu1  ;;  %vm3725_vm1 = vmand %vm3639_vm15, %vm3682_vm0  ;;  %vm3640_vm2 = vcmp.lt.f32.partialorder %v3511_v61, 16.0  ;;  %vm9337_vm0 = vcmask 31744  }
 0x263   :  { %v8167_v57 = vpop.permute.xlu0 %753  ;;  %v2205_v55 = vsel %vm2159_vm9, %v2118_v63, %v8095_v44  ;;  %v1779_v44 = vrot.slane %v8181_v25, 2 }
 0x264   :  { %v8169_v17 = vpop.f32.mrf.mxu1  ;;  %2060 = vrot.lane.b32.xlu1 %v1975_v4, %s4706_s25 }
 0x265   :  { %1883 = vrot.lane.b32.xlu0 %v1778_v3, %s4707_s26  ;;  %v1222_v3 = vsel %vm9324_vm4, %v8073_v20, %v8172_v24  ;;  %vm9334_vm4 = vcmask 293888  }
 0x266   :  { %v1574_v27 = vpop.permute.xlu1 %1573  ;;  %v4457_v59 = vpop.f32.mrf.mxu1 }
 0x267   :  { %v8188_v4 = vpop.permute.xlu0 %930  ;;  %v2292_v59 = vsel %vm2246_vm10, %v2205_v55, %v1014_v2  ;;  %v3597_v2 = vsub.f32 %v3424_v31, %v3554_v54  ;;  %v1223_v54 = vrot.slane %v8181_v25, 1  ;;  %v1224_v55 = vrot.slane %v8178_v36, 2 }
 0x268   :  { %942 = vrot.lane.b32.xlu1 %v857_v58, %s4701_s16  ;;  %v2379_v12 = vsel %vm2333_vm11, %v2292_v59, %v1294_v48  ;;  %v1780_v58 = vrot.slane %v8178_v36, 3 }
 0x269   :  { %765 = vrot.lane.b32.xlu0 %v656_v14, %s4705_s22  ;;  %v2466_v20 = vsel %vm2420_vm12, %v2379_v12, %v1471_v43  ;;  %vm3683_vm6 = vcmp.lt.f32.partialorder %v3597_v2, 16.0  ;;  %v663_v12 = vrot.slane %v8085_v60, 1 }
 0x26a   :  { %v1854_v47 = vpop.permute.xlu1 %1853  ;;  %v2553_v48 = vsel %vm2507_vm13, %v2466_v20, %v1574_v27  ;;  %v8223_v31 = vor.u32 %v1780_v58, %v1779_v44  ;;  %vm3726_vm15 = vmand %vm3640_vm2, %vm3683_vm6  ;;  %v8251_v58 = vld [vmem:[%s8955_s1 + $0x150] sm:$0xff]   ;;  %vm9341_vm2 = vcmask 228352   ;;  %vm9342_vm6 = vcmask 261120  }
 0x26b   :  { %v8208_v33 = vpop.permute.xlu0 %1033  ;;  %v2640_v43 = vsel %vm9332_vm14, %v2553_v48, %v1854_v47  ;;  %vm9335_vm14 = vcmask 1044480   ;;  %v659_v47 = vor.u32 %v7993_v1, %v655_v50  ;;  %v8257_v1 = vadd.s32 272, %v5853_v11 }
 0x26c   :  { %1325 = vrot.lane.b32.xlu1 %v1222_v3, %s4704_s21  ;;  %v1977_v42 = vsel %vm9335_vm14, %v1974_v53, %v1976_v19  ;;  %v8239_v3 = vsel %vm3725_vm1, 0.00390625, %v9071_v37  ;;  %v1782_v44 = vsel %vm1618_vm5, %v8137_v5, %v8223_v31  ;;  %v8261_v48 = vor.u32 %v1224_v55, %v1223_v54  ;;  %v4666_v55 = vld [vmem:[%s8955_s1 + $0x100] sm:$0xff]  }
 0x26d   :  { %1045 = vrot.lane.b32.xlu0 %v859_v10, %s4700_s15  ;;  %v8264_v5 = vsel %vm3726_vm15, 0.00390625, %v9071_v37  ;;  %v8276_v54 = vshrl.u32 %v8251_v58, 16  ;;  %vm9339_vm1 = vcmask 1046528   ;;  %vm9343_vm14 = vcmask 293888  }
 0x26e   :  { %v2031_v14 = vpop.permute.xlu1 %2030  ;;  %9336 = vst [vmem:[#allocation6_spill] sm:$0xff] %v8264_v5  ;;  %vm9344_vm15 = vcmask 1044480  }
 0x26f   :  { %v2727_v16 = vsel %vm9333_vm8, %v2640_v43, %v2031_v14  ;;  %v1314_v27 = vpop.permute.xlu0 %1313  ;;  %vm9338_vm8 = vsmask.f32 6400 }
 0x270   :  { %v3046_v63 = vpop.f32.mrf.mxu0  ;;  %4443 = vmatmul.mubr.msk.bf16.gmra.mxu0 %vm9334_vm4, %v2727_v16  ;;  %1605 = vrot.lane.b32.xlu1 %v8217_v52, %s4702_s19  ;;  %v664_v16 = vsel %vm340_vm3, %v659_v47, %v663_v12  ;;  %v8288_v47 = vadd.s32 280, %v5853_v11  ;;  %vm9340_vm4 = vcmask 1045504  }
 0x271   :  { %v3047_v40 = vadd.f32 %v7848_v0, %v3046_v63  ;;  %4446 = vmatprep.mubr.msk.bf16.mxu0 %vm4709_vm7, %v9071_v37  ;;  %1502 = vrot.lane.b32.xlu0 %v8131_v13, %s4703_s20  ;;  %v9042_v63 = vrot.slane %v8165_v21, 1 }
 0x272   :  { %v1491_v61 = vpop.permute.xlu1 %1490  ;;  %v4420_v59 = vpop.f32.mrf.mxu0 }
 0x273   :  { %v3293_v53 = vmax.f32 %v3047_v40, 0.0  ;;  %v8253_v20 = vpop.permute.xlu0 %735  ;;  %v8273_v59 = vshll.u32 %v8251_v58, 16 }
 0x274   :  { %v3049_v13 = vpop.f32.mrf.mxu0  ;;  %2062 = vrot.lane.b32.xlu1 %v1977_v42, %s4706_s25 }
 0x275   :  { %v3811_v50 = vmul.f32 %v8239_v3, %v3293_v53  ;;  %v3050_v2 = vadd.f32 %v7848_v0, %v3049_v13  ;;  %1885 = vrot.lane.b32.xlu0 %v1782_v44, %s4707_s26  ;;  %v2138_v53 = vsel %vm9337_vm0, %v4666_v55, %v8167_v57  ;;  %v9041_v57 = vrot.slane %v8251_v58, 2 }
 0x276   :  { %v1594_v43 = vpop.permute.xlu1 %1593  ;;  %v4421_v14 = vpop.f32.mrf.mxu0  ;;  %v2225_v13 = vsel %vm2159_vm9, %v2138_v53, %v8188_v4  ;;  %v861_v4 = vsel %vm9339_vm1, %v858_v9, %v9042_v63  ;;  %v1784_v55 = vrot.slane %v8273_v59, 3 }
 0x277   :  { %v3896_v40 = vadd.f32 %v8118_v35, %v3811_v50  ;;  %v3294_v42 = vmax.f32 %v3050_v2, 0.0  ;;  %v8283_v44 = vpop.permute.xlu0 %912  ;;  %v3425_v35 = vcvt.s32.f32 %v8257_v1  ;;  %v1226_v2 = vsel %vm9338_vm8, %v8172_v24, %v8261_v48 }
 0x278   :  { %944 = vrot.lane.b32.xlu1 %v859_v10, %s4701_s16  ;;  %v2312_v14 = vsel %vm2246_vm10, %v2225_v13, %v8208_v33  ;;  %v1783_v24 = vrot.slane %v8276_v54, 2  ;;  %v3426_v13 = vcvt.s32.f32 %v8288_v47  ;;  %v8319_v9 = vsel %vm9340_vm4, %v1418_v62, %v9041_v57 }
 0x279   :  { %v3812_v50 = vmul.f32 %v8264_v5, %v3294_v42  ;;  %767 = vrot.lane.b32.xlu0 %v664_v16, %s4705_s22  ;;  %v2399_v1 = vsel %vm2333_vm11, %v2312_v14, %v1314_v27  ;;  %v3469_v16 = vmul.f32 0.055555556, %v3425_v35  ;;  %v9040_v27 = vrot.slane %v8251_v58, 3 }
 0x27a   :  { %v1874_v10 = vpop.permute.xlu1 %1873  ;;  %v2486_v53 = vsel %vm2420_vm12, %v2399_v1, %v1491_v61  ;;  %v3470_v14 = vmul.f32 0.055555556, %v3426_v13  ;;  %v1227_v1 = vrot.slane %v8276_v54, 1 }
 0x27b   :  { %v8306_v42 = vadd.f32 %v3896_v40, %v3812_v50  ;;  %v1016_v33 = vpop.permute.xlu0 %1015  ;;  %v2573_v38 = vsel %vm2507_vm13, %v2486_v53, %v1594_v43  ;;  %v3512_v62 = vfloor.f32 %v3469_v16 }
 0x27c   :  { %1327 = vrot.lane.b32.xlu1 %v1226_v2, %s4704_s21  ;;  %v2660_v40 = vsel %vm9341_vm2, %v2573_v38, %v1874_v10  ;;  %v8325_v2 = vor.u32 %v1784_v55, %v1783_v24  ;;  %v1979_v10 = vsel %vm9344_vm15, %v1976_v19, %v9040_v27  ;;  %v1228_v24 = vrot.slane %v8273_v59, 2 }
 0x27d   :  { %1047 = vrot.lane.b32.xlu0 %v861_v4, %s4700_s15  ;;  %v667_v19 = vor.u32 %v8088_v45, %v663_v12  ;;  %v9043_v38 = vrot.slane %v8178_v36, 1  ;;  %vm8392_vm4 = vcmp.lt.f32.partialorder %v3512_v62, 16.0  ;;  %vm9351_vm15 = vcmask 261120  }
 0x27e   :  { %v2051_v61 = vpop.permute.xlu1 %2050  ;;  %v1786_v16 = vsel %vm1618_vm5, %v8223_v31, %v8325_v2  ;;  %v8358_v27 = vor.u32 %v1228_v24, %v1227_v1  ;;  %v8362_v31 = vrot.slane %v8251_v58, 1 }
 0x27f   :  { %v2747_v50 = vsel %vm9342_vm6, %v2660_v40, %v2051_v61  ;;  %v1296_v47 = vpop.permute.xlu0 %1295  ;;  %v8353_v40 = vld [vmem:[%s8955_s1 + $0x158] sm:$0xff]   ;;  %v672_v12 = vsel %vm340_vm3, %v667_v19, %v9043_v38  ;;  %vm9349_vm6 = vcmask 1045504  }
 0x280   :  { %v8327_v43 = vpop.f32.mrf.mxu1  ;;  %4483 = vmatmul.mubr.msk.bf16.gmra.mxu1 %vm9343_vm14, %v2747_v50  ;;  %1607 = vrot.lane.b32.xlu1 %v8319_v9, %s4702_s19  ;;  %v1232_v57 = vshrl.u32 %v8353_v40, 16  ;;  %v1235_v63 = vshll.u32 %v8353_v40, 16  ;;  %v1230_v19 = vsel %vm9338_vm8, %v8261_v48, %v8358_v27  ;;  %v8381_v38 = vrot.slane %v8353_v40, 2 }
 0x281   :  { %4486 = vmatprep.mubr.msk.bf16.mxu1 %vm4709_vm7, %v9071_v37  ;;  %1504 = vrot.lane.b32.xlu0 %v8217_v52, %s4703_s20  ;;  %v3555_v52 = vmul.f32 18.0, %v3512_v62  ;;  %vm9350_vm14 = vcmask 228352   ;;  %vm9352_vm8 = vcmask 293888  }
 0x282   :  { %v1473_v55 = vpop.permute.xlu1 %1472  ;;  %v4460_v53 = vpop.f32.mrf.mxu1  ;;  %v1787_v48 = vrot.slane %v1232_v57, 2 }
 0x283   :  { %v756_v61 = vpop.permute.xlu0 %755  ;;  %v3513_v53 = vfloor.f32 %v3470_v14  ;;  %v4667_v14 = vld [vmem:[%s8955_s1 + $0xb8] sm:$0xff]   ;;  %v3598_v24 = vsub.f32 %v3425_v35, %v3555_v52 }
 0x284   :  { %v8355_v50 = vpop.f32.mrf.mxu1  ;;  %2064 = vrot.lane.b32.xlu1 %v1979_v10, %s4706_s25  ;;  %v2120_v10 = vsel %vm9337_vm0, %v4667_v14, %v8253_v20  ;;  %v1788_v14 = vrot.slane %v1235_v63, 3 }
 0x285   :  { %1887 = vrot.lane.b32.xlu0 %v1786_v16, %s4707_s26  ;;  %v3556_v16 = vmul.f32 18.0, %v3513_v53  ;;  %vm3684_vm2 = vcmp.lt.f32.partialorder %v3598_v24, 16.0 }
 0x286   :  { %v1576_v60 = vpop.permute.xlu1 %1575  ;;  %v4461_v45 = vpop.f32.mrf.mxu1  ;;  %vm3727_vm0 = vmand %vm8392_vm4, %vm3684_vm2  ;;  %vm9357_vm4 = vcmask 31744  }
 0x287   :  { %v933_v1 = vpop.permute.xlu0 %932  ;;  %v2207_v45 = vsel %vm2159_vm9, %v2120_v10, %v8283_v44 }
 0x288   :  { %946 = vrot.lane.b32.xlu1 %v861_v4, %s4701_s16  ;;  %v2294_v5 = vsel %vm2246_vm10, %v2207_v45, %v1016_v33  ;;  %v9345_v4 = vrot.slane %v8165_v21, 1  ;;  %v1980_v21 = vrot.slane %v8353_v40, 3 }
 0x289   :  { %769 = vrot.lane.b32.xlu0 %v672_v12, %s4705_s22  ;;  %v2381_v44 = vsel %vm2333_vm11, %v2294_v5, %v1296_v47  ;;  %v3599_v12 = vsub.f32 %v3426_v13, %v3556_v16  ;;  %v9348_v5 = vrot.slane %v8251_v58, 2  ;;  %v8412_v13 = vor.u32 %v1788_v14, %v1787_v48 }
 0x28a   :  { %v1856_v20 = vpop.permute.xlu1 %1855  ;;  %v8389_v35 = vsel %vm9339_vm1, %v9345_v4, %v8362_v31  ;;  %v2468_v10 = vsel %vm2420_vm12, %v2381_v44, %v1473_v55  ;;  %vm8417_vm1 = vcmp.lt.f32.partialorder %v3513_v53, 16.0  ;;  %v4668_v44 = vld [vmem:[%s8955_s1 + $0x108] sm:$0xff]   ;;  %v1234_v14 = vrot.slane %v1232_v57, 1 }
 0x28b   :  { %v1036_v33 = vpop.permute.xlu0 %1035  ;;  %v2555_v45 = vsel %vm2507_vm13, %v2468_v10, %v1576_v60  ;;  %v8404_v47 = vsel %vm9349_vm6, %v9348_v5, %v8381_v38  ;;  %vm3685_vm6 = vcmp.lt.f32.partialorder %v3599_v12, 16.0  ;;  %v2140_v52 = vsel %vm9357_vm4, %v4668_v44, %v756_v61 }
 0x28c   :  { %1329 = vrot.lane.b32.xlu1 %v1230_v19, %s4704_s21  ;;  %v2642_v62 = vsel %vm9350_vm14, %v2555_v45, %v1856_v20  ;;  %v9355_v20 = vrot.slane %v8251_v58, 3  ;;  %vm9356_vm14 = vcmask 1044480   ;;  %v1237_v53 = vrot.slane %v1235_v63, 2  ;;  %vm3728_vm2 = vmand %vm8417_vm1, %vm3685_vm6 }
 0x28d   :  { %1049 = vrot.lane.b32.xlu0 %v8389_v35, %s4700_s15  ;;  %v2227_v10 = vsel %vm2159_vm9, %v2140_v52, %v933_v1  ;;  %v8433_v45 = vsel %vm3727_vm0, 0.00390625, %v9071_v37  ;;  %v9048_v61 = vrot.slane %v8273_v59, 1  ;;  %v1790_v63 = vsel %vm1618_vm5, %v8325_v2, %v8412_v13 }
 0x28e   :  { %v2033_v55 = vpop.permute.xlu1 %2032  ;;  %v1981_v4 = vsel %vm9356_vm14, %v9355_v20, %v1980_v21  ;;  %v8461_v20 = vor.u32 %v1237_v53, %v1234_v14  ;;  %v8464_v44 = vsel %vm3728_vm2, 0.00390625, %v9071_v37  ;;  %vm9361_vm0 = vsmask.f32 6400  ;;  %vm9365_vm14 = vmmov %vm9357_vm4 }
 0x28f   :  { %v2729_v19 = vsel %vm9351_vm15, %v2642_v62, %v2033_v55  ;;  %v1316_v60 = vpop.permute.xlu0 %1315  ;;  %v9358_v55 = vrot.slane %v8178_v36, 1  ;;  %9359 = vst [vmem:[#allocation5_spill] sm:$0xff] %v8464_v44  ;;  %vm9360_vm15 = vcmask 228352   ;;  %vm9363_vm1 = vcmask 293888  }
 0x290   :  { %v3054_v24 = vpop.f32.mrf.mxu0  ;;  %4447 = vmatmul.mubr.msk.bf16.gmra.mxu0 %vm9352_vm8, %v2729_v19  ;;  %1609 = vrot.lane.b32.xlu1 %v8404_v47, %s4702_s19  ;;  %vm9362_vm8 = vcmask 261120   ;;  %vm9364_vm6 = vcmask 1046528   ;;  %vm9366_vm4 = vcmask 1045504   ;;  %vm9367_vm2 = vcmask 1044480  }
 0x291   :  { %v3055_v48 = vadd.f32 %v7848_v0, %v3054_v24  ;;  %1506 = vrot.lane.b32.xlu0 %v8319_v9, %s4703_s20  ;;  %v675_v19 = vor.u32 %v8181_v25, %v9358_v55  ;;  %v2314_v24 = vsel %vm2246_vm10, %v2227_v10, %v1036_v33  ;;  %v8451_v9 = vld [vmem:[%s8955_s1 + $0x160] sm:$0xff]   ;;  %v8456_v33 = vadd.s32 288, %v5853_v11 }
 0x292   :  { %v4424_v5 = vpop.f32.mrf.mxu0  ;;  %v1596_v62 = vpop.permute.xlu1 %1595  ;;  %v2401_v36 = vsel %vm2333_vm11, %v2314_v24, %v1316_v60  ;;  %v1795_v14 = vshll.u32 %v8451_v9, 16 }
 0x293   :  { %v3295_v57 = vmax.f32 %v3055_v48, 0.0  ;;  %v1493_v25 = vpop.permute.xlu0 %1492  ;;  %v9045_v48 = vrot.slane %v8353_v40, 1  ;;  %v9046_v24 = vcvt.s32.f32 %v8456_v33 }
 0x294   :  { %v3057_v1 = vpop.f32.mrf.mxu0  ;;  %2066 = vrot.lane.b32.xlu1 %v1981_v4, %s4706_s25  ;;  %v2488_v16 = vsel %vm2420_vm12, %v2401_v36, %v1493_v25  ;;  %v680_v4 = vsel %vm340_vm3, %v675_v19, %v9048_v61  ;;  %v9047_v36 = vrot.slane %v8451_v9, 2 }
 0x295   :  { %v3813_v12 = vmul.f32 %v8433_v45, %v3295_v57  ;;  %v3058_v2 = vadd.f32 %v7848_v0, %v3057_v1  ;;  %1889 = vrot.lane.b32.xlu0 %v1790_v63, %s4707_s26  ;;  %v1792_v0 = vshrl.u32 %v8451_v9, 16  ;;  %v2575_v53 = vsel %vm2507_vm13, %v2488_v16, %v1596_v62  ;;  %v8490_v62 = vld [vmem:[%s8955_s1 + $0x160] ss:$0 sps:$4 sm:$0x33]  }
 0x296   :  { %v4425_v60 = vpop.f32.mrf.mxu0  ;;  %v2053_v52 = vpop.permute.xlu1 %2052  ;;  %v8479_v57 = vadd.s32 296, %v5853_v11  ;;  %v1239_v63 = vsel %vm9361_vm0, %v8358_v27, %v8461_v20  ;;  %v4624_v1 = vld [vmem:[%s8955_s1 + $0x158] ss:$0 sps:$4 sm:$0x11]   ;;  %v966_v27 = vsel %vm9364_vm6, %v8362_v31, %v9045_v48  ;;  %vm9371_vm0 = vcmask 228352  }
 0x297   :  { %v3898_v10 = vadd.f32 %v8306_v42, %v3813_v12  ;;  %v3296_v5 = vmax.f32 %v3058_v2, 0.0  ;;  %v1876_v55 = vpop.permute.xlu0 %1875  ;;  %v1794_v16 = vrot.slane %v1792_v0, 2  ;;  %v1797_v2 = vrot.slane %v1795_v14, 3 }
 0x298   :  { %948 = vrot.lane.b32.xlu1 %v8389_v35, %s4701_s16  ;;  %v2662_v42 = vsel %vm9360_vm15, %v2575_v53, %v1876_v55  ;;  %v1526_v14 = vsel %vm9366_vm4, %v8381_v38, %v9047_v36  ;;  %v1241_v53 = vshrl.u32 %v8490_v62, 16  ;;  %v1244_v55 = vshll.u32 %v8490_v62, 16  ;;  %vm9369_vm15 = vmmov %vm9364_vm6 }
 0x299   :  { %v3814_v19 = vmul.f32 %v8464_v44, %v3296_v5  ;;  %v2749_v35 = vsel %vm9362_vm8, %v2662_v42, %v2053_v52  ;;  %771 = vrot.lane.b32.xlu0 %v680_v4, %s4705_s22  ;;  %v9049_v52 = vrot.slane %v8451_v9, 3  ;;  %v8510_v4 = vmul.f32 0.055555556, %v9046_v24  ;;  %v4669_v5 = vld [vmem:[%s8955_s1 + $0x110] sm:$0xff]  }
 0x29a   :  { %v935_v25 = vpop.permute.xlu1 %934  ;;  %4487 = vmatmul.mubr.msk.bf16.gmra.mxu1 %vm9363_vm1, %v2749_v35  ;;  %v685_v42 = vshll.u32 %v4624_v1, 16  ;;  %vm9372_vm8 = vsmask.f32 6400  ;;  %vm9373_vm1 = vcmask 261120  }
 0x29b   :  { %v8497_v12 = vadd.f32 %v3898_v10, %v3814_v19  ;;  %v758_v60 = vpop.permute.xlu0 %757  ;;  %4490 = vmatprep.mubr.msk.bf16.mxu1 %vm4709_vm7, %v9071_v37  ;;  %v9050_v10 = vcvt.s32.f32 %v8479_v57 }
 0x29c   :  { %1331 = vrot.lane.b32.xlu1 %v1239_v63, %s4704_s21  ;;  %v2142_v0 = vsel %vm9365_vm14, %v4669_v5, %v758_v60  ;;  %v8524_v63 = vor.u32 %v1797_v2, %v1794_v16  ;;  %v1983_v60 = vsel %vm9367_vm2, %v1980_v21, %v9049_v52  ;;  %v3514_v5 = vfloor.f32 %v8510_v4 }
 0x29d   :  { %1051 = vrot.lane.b32.xlu0 %v966_v27, %s4700_s15  ;;  %v2229_v35 = vsel %vm2159_vm9, %v2142_v0, %v935_v25  ;;  %v8538_v27 = vmul.f32 0.055555556, %v9050_v10  ;;  %v864_v25 = vrot.slane %v4624_v1, 1  ;;  %v1243_v2 = vrot.slane %v1241_v53, 1 }
 0x29e   :  { %v1318_v19 = vpop.permute.xlu1 %1317  ;;  %v1246_v0 = vrot.slane %v1244_v55, 2  ;;  %v687_v61 = vrot.slane %v685_v42, 1  ;;  %v1799_v21 = vsel %vm1618_vm5, %v8412_v13, %v8524_v63  ;;  %v9368_v4 = vrot.slane %v8273_v59, 1  ;;  %v4628_v1 = vld [vmem:[%s8955_s1 + $0x168] ss:$0 sps:$4 sm:$0x77]  }
 0x29f   :  { %v1038_v48 = vpop.permute.xlu0 %1037  ;;  %v3557_v13 = vmul.f32 18.0, %v3514_v5  ;;  %v3515_v59 = vfloor.f32 %v8538_v27  ;;  %v865_v42 = vsel %vm9369_vm15, %v8362_v31, %v864_v25  ;;  %v1801_v10 = vshrl.u32 %v4628_v1, 16 }
 0x2a0   :  { %1611 = vrot.lane.b32.xlu1 %v1526_v14, %s4702_s19  ;;  %v2316_v16 = vsel %vm2246_vm10, %v2229_v35, %v1038_v48  ;;  %v683_v52 = vor.u32 %v8276_v54, %v9368_v4  ;;  %v4625_v48 = vld [vmem:[%s8955_s1 + $0x160] ss:$0 sps:$4 sm:$0x11]   ;;  %v1247_v35 = vor.u32 %v1246_v0, %v1243_v2  ;;  %v1804_v44 = vshll.u32 %v4628_v1, 16 }
 0x2a1   :  { %v8527_v24 = vpop.f32.mrf.mxu1  ;;  %1508 = vrot.lane.b32.xlu0 %v8404_v47, %s4703_s20  ;;  %v2403_v47 = vsel %vm2333_vm11, %v2316_v16, %v1318_v19  ;;  %v9370_v31 = vcvt.s32.f32 %v8456_v33  ;;  %v3558_v2 = vmul.f32 18.0, %v3515_v59  ;;  %v1424_v33 = vrot.slane %v8490_v62, 2 }
 0x2a2   :  { %v1598_v36 = vpop.permute.xlu1 %1597  ;;  %v688_v4 = vsel %vm340_vm3, %v683_v52, %v687_v61  ;;  %vm9374_vm3 = vcmask 293888   ;;  %vm3643_vm14 = vcmp.lt.f32.partialorder %v3514_v5, 16.0  ;;  %vm9377_vm2 = vcmask 31744  }
 0x2a3   :  { %v4464_v14 = vpop.f32.mrf.mxu1  ;;  %v1495_v53 = vpop.permute.xlu0 %1494  ;;  %v3600_v25 = vsub.f32 %v9370_v31, %v3557_v13  ;;  %v1803_v13 = vrot.slane %v1801_v10, 2  ;;  %v9378_v62 = vrot.slane %v8451_v9, 2  ;;  %vm9379_vm15 = vcmask 1045504  }
 0x2a4   :  { %2068 = vrot.lane.b32.xlu1 %v1983_v60, %s4706_s25  ;;  %v2490_v54 = vsel %vm2420_vm12, %v2403_v47, %v1495_v53  ;;  %v4627_v14 = vld [vmem:[%s8955_s1 + $0x168] ss:$0 sps:$4 sm:$0x33]   ;;  %v967_v60 = vrot.slane %v4625_v48, 1  ;;  %v1984_v10 = vrot.slane %v4628_v1, 3 }
 0x2a5   :  { %v8556_v55 = vpop.f32.mrf.mxu1  ;;  %1891 = vrot.lane.b32.xlu0 %v1799_v21, %s4707_s26  ;;  %v2577_v27 = vsel %vm2507_vm13, %v2490_v54, %v1598_v36  ;;  %v1248_v21 = vsel %vm9372_vm8, %v8461_v20, %v1247_v35  ;;  %v1527_v53 = vrot.slane %v4627_v14, 2  ;;  %v9375_v36 = vrot.slane %v8353_v40, 1  ;;  %v4670_v40 = vld [vmem:[%s8955_s1 + $0x118] sm:$0xff]   ;;  %vm9380_vm8 = vmmov %vm9379_vm15  ;;  %v8603_v1 = vld [vmem:[%s8958_s4 + $0x1] ss:$0 sm:$0xff] }
 0x2a6   :  { %v2055_v16 = vpop.permute.xlu1 %2054  ;;  %v1806_v54 = vrot.slane %v1804_v44, 3  ;;  %vm3686_vm4 = vcmp.lt.f32.partialorder %v3600_v25, 16.0  ;;  %v9376_v20 = vcvt.s32.f32 %v8479_v57  ;;  %v1425_v57 = vsel %vm9380_vm8, %v8381_v38, %v1424_v33 }
 0x2a7   :  { %v4465_v19 = vpop.f32.mrf.mxu1  ;;  %v1878_v47 = vpop.permute.xlu0 %1877  ;;  %v968_v48 = vsel %vm9364_vm6, %v9375_v36, %v967_v60  ;;  %v1528_v44 = vsel %vm9379_vm15, %v9378_v62, %v1527_v53  ;;  %v9381_v38 = vrot.slane %v8451_v9, 3  ;;  %vm9382_vm6 = vcmask 1044480  }
 0x2a8   :  { %950 = vrot.lane.b32.xlu1 %v865_v42, %s4701_s16  ;;  %v2664_v0 = vsel %vm9371_vm0, %v2577_v27, %v1878_v47  ;;  %v3601_v35 = vsub.f32 %v9376_v20, %v3558_v2  ;;  %vm3729_vm0 = vmand %vm3643_vm14, %vm3686_vm4  ;;  %v1807_v19 = vor.u32 %v1806_v54, %v1803_v13  ;;  %v3386_v9 = vadd.s32 304, %v5853_v11 }
 0x2a9   :  { %v2751_v61 = vsel %vm9373_vm1, %v2664_v0, %v2055_v16  ;;  %773 = vrot.lane.b32.xlu0 %v688_v4, %s4705_s22  ;;  %vm3644_vm1 = vcmp.lt.f32.partialorder %v3515_v59, 16.0  ;;  %v1985_v31 = vsel %vm9382_vm6, %v9381_v38, %v1984_v10  ;;  %v8610_v25 = vsel %vm3729_vm0, 0.00390625, %v9071_v37 }
 0x2aa   :  { %v937_v52 = vpop.permute.xlu1 %936  ;;  %4491 = vmatmul.mubr.msk.bf16.gmra.mxu1 %vm9374_vm3, %v2751_v61  ;;  %vm3687_vm3 = vcmp.lt.f32.partialorder %v3601_v35, 16.0  ;;  %v3387_v62 = vadd.s32 312, %v5853_v11  ;;  %vm9384_vm4 = vcmask 261120   ;;  %vm9386_vm15 = vcmask 31744  }
 0x2ab   :  { %v760_v42 = vpop.permute.xlu0 %759  ;;  %4494 = vmatprep.mubr.msk.bf16.mxu1 %vm4709_vm7, %v9071_v37  ;;  %vm3730_vm14 = vmand %vm3644_vm1, %vm3687_vm3 }
 0x2ac   :  { %1333 = vrot.lane.b32.xlu1 %v1248_v21, %s4704_s21  ;;  %v2144_v14 = vsel %vm9377_vm2, %v4670_v40, %v760_v42  ;;  %v1808_v21 = vsel %vm1618_vm5, %v8524_v63, %v1807_v19  ;;  %v8622_v13 = vsel %vm3730_vm14, 0.00390625, %v9071_v37  ;;  %vm9383_vm5 = vcmask 228352   ;;  %vm9388_vm8 = vmmov %vm9384_vm4 }
 0x2ad   :  { %1053 = vrot.lane.b32.xlu0 %v968_v48, %s4700_s15  ;;  %v2231_v16 = vsel %vm2159_vm9, %v2144_v14, %v937_v52  ;;  %v3429_v14 = vcvt.s32.f32 %v3386_v9  ;;  %vm9385_vm2 = vcmask 293888   ;;  %vm9387_vm0 = vmmov %vm9383_vm5 }
 0x2ae   :  { %v1320_v5 = vpop.permute.xlu1 %1319  ;;  %vm9389_vm1 = vmmov %vm9385_vm2 }
 0x2af   :  { %v1040_v4 = vpop.permute.xlu0 %1039  ;;  %vm9390_vm14 = vmmov %vm9386_vm15 }
 0x2b0   :  { %v3062_v60 = vpop.f32.mrf.mxu0  ;;  %1613 = vrot.lane.b32.xlu1 %v1528_v44, %s4702_s19  ;;  %v2318_v27 = vsel %vm2246_vm10, %v2231_v16, %v1040_v4  ;;  %v3430_v4 = vcvt.s32.f32 %v3387_v62 }
 0x2b1   :  { %v3063_v47 = vadd.f32 %v8603_v1, %v3062_v60  ;;  %1510 = vrot.lane.b32.xlu0 %v1425_v57, %s4703_s20  ;;  %v2405_v53 = vsel %vm2333_vm11, %v2318_v27, %v1320_v5  ;;  %v4672_v60 = vld [vmem:[%s8955_s1 + $0x120] sm:$0xff]  }
 0x2b2   :  { %v4428_v59 = vpop.f32.mrf.mxu0  ;;  %v1600_v2 = vpop.permute.xlu1 %1599 }
 0x2b3   :  { %v3297_v0 = vmax.f32 %v3063_v47, 0.0  ;;  %v1497_v61 = vpop.permute.xlu0 %1496 }
 0x2b4   :  { %v3065_v52 = vpop.f32.mrf.mxu0  ;;  %2070 = vrot.lane.b32.xlu1 %v1985_v31, %s4706_s25  ;;  %v2492_v48 = vsel %vm2420_vm12, %v2405_v53, %v1497_v61 }
 0x2b5   :  { %v3815_v36 = vmul.f32 %v8610_v25, %v3297_v0  ;;  %v3066_v33 = vadd.f32 %v8603_v1, %v3065_v52  ;;  %1893 = vrot.lane.b32.xlu0 %v1808_v21, %s4707_s26  ;;  %v2579_v35 = vsel %vm2507_vm13, %v2492_v48, %v1600_v2  ;;  %v3474_v0 = vmul.f32 0.055555556, %v3430_v4 }
 0x2b6   :  { %v4429_v63 = vpop.f32.mrf.mxu0  ;;  %v2057_v54 = vpop.permute.xlu1 %2056 }
 0x2b7   :  { %v3900_v42 = vadd.f32 %v8497_v12, %v3815_v36  ;;  %v3298_v20 = vmax.f32 %v3066_v33, 0.0  ;;  %v1880_v40 = vpop.permute.xlu0 %1879  ;;  %v3473_v12 = vmul.f32 0.055555556, %v3429_v14  ;;  %v3517_v33 = vfloor.f32 %v3474_v0 }
 0x2b8   :  { %v2666_v10 = vsel %vm9383_vm5, %v2579_v35, %v1880_v40 }
 0x2b9   :  { %v3816_v44 = vmul.f32 %v8622_v13, %v3298_v20  ;;  %v2753_v5 = vsel %vm9384_vm4, %v2666_v10, %v2057_v54  ;;  %v3516_v2 = vfloor.f32 %v3473_v12  ;;  %v4629_v20 = vld [vmem:[%s8957_s3 + $0x8] sm:$0xff]   ;;  %vm3646_vm4 = vcmp.lt.f32.partialorder %v3517_v33, 16.0 }
 0x2ba   :  { %v939_v57 = vpop.permute.xlu1 %938  ;;  %4495 = vmatmul.mubr.msk.bf16.gmra.mxu1 %vm9385_vm2, %v2753_v5  ;;  %v4630_v5 = vld [vmem:[%s8957_s3] sm:$0xff]  }
 0x2bb   :  { %v8631_v19 = vadd.f32 %v3900_v42, %v3816_v44  ;;  %v762_v16 = vpop.permute.xlu0 %761  ;;  %4498 = vmatprep.mubr.msk.bf16.mxu1 %vm4709_vm7, %v9071_v37  ;;  %v3559_v48 = vmul.f32 18.0, %v3516_v2  ;;  %v3560_v44 = vmul.f32 18.0, %v3517_v33  ;;  %4527 = vmatpush3.bf16.msra.mxu1 %v4629_v20  ;;  %vm3645_vm3 = vcmp.lt.f32.partialorder %v3516_v2, 16.0 }
 0x2bc   :  { %v2146_v27 = vsel %vm9386_vm15, %v4672_v60, %v762_v16  ;;  %4528 = vmatprep.subr.bf16.mxu1 %v9071_v37 }
 0x2bd   :  { %v2233_v38 = vsel %vm2159_vm9, %v2146_v27, %v939_v57  ;;  %v3602_v62 = vsub.f32 %v3429_v14, %v3559_v48  ;;  %v3603_v60 = vsub.f32 %v3430_v4, %v3560_v44  ;;  %v4673_v14 = vld [vmem:[%s8955_s1 + $0x128] sm:$0xff]  }
 0x2be   :  { %v1322_v47 = vpop.permute.xlu1 %1321 }
 0x2bf   :  { %v1042_v31 = vpop.permute.xlu0 %1041  ;;  %vm3688_vm6 = vcmp.lt.f32.partialorder %v3602_v62, 16.0  ;;  %4529 = vmatpush3.bf16.msra.mxu1 %v4630_v5  ;;  %vm3689_vm2 = vcmp.lt.f32.partialorder %v3603_v60, 16.0 }
 0x2c0   :  { %v2320_v21 = vsel %vm2246_vm10, %v2233_v38, %v1042_v31  ;;  %4534 = vmatprep.subr.bf16.mxu1 %v9071_v37  ;;  %vm3731_vm5 = vmand %vm3645_vm3, %vm3688_vm6 }
 0x2c1   :  { %v8641_v59 = vpop.f32.mrf.mxu1  ;;  %v2407_v52 = vsel %vm2333_vm11, %v2320_v21, %v1322_v47  ;;  %v8670_v21 = vsel %vm3731_vm5, 0.00390625, %v9071_v37  ;;  %vm3732_vm15 = vmand %vm3646_vm4, %vm3689_vm2 }
 0x2c2   :  { %v1602_v61 = vpop.permute.xlu1 %1601  ;;  %vm9391_vm3 = vmmov %vm9390_vm14 }
 0x2c3   :  { %v4468_v53 = vpop.f32.mrf.mxu1  ;;  %v1499_v9 = vpop.permute.xlu0 %1498  ;;  %vm9392_vm6 = vmmov %vm9387_vm0 }
 0x2c4   :  { %v2494_v63 = vsel %vm2420_vm12, %v2407_v52, %v1499_v9  ;;  %vm9394_vm5 = vmmov %vm9389_vm1 }
 0x2c5   :  { %v8645_v36 = vpop.f32.mrf.mxu1  ;;  %v2581_v35 = vsel %vm2507_vm13, %v2494_v63, %v1602_v61 }
 0x2c6   :  { %v2059_v42 = vpop.permute.xlu1 %2058 }
 0x2c7   :  { %v4469_v54 = vpop.f32.mrf.mxu1  ;;  %v1882_v40 = vpop.permute.xlu0 %1881 }
 0x2c8   :  { %v2668_v10 = vsel %vm9387_vm0, %v2581_v35, %v1882_v40  ;;  %v3388_v54 = vadd.s32 320, %v5853_v11  ;;  %v8678_v35 = vsel %vm3732_vm15, 0.00390625, %v9071_v37  ;;  %vm9395_vm15 = vmmov %vm9391_vm3 }
 0x2c9   :  { %v2755_v57 = vsel %vm9388_vm8, %v2668_v10, %v2059_v42 }
 0x2ca   :  { %v941_v16 = vpop.permute.xlu1 %940  ;;  %4499 = vmatmul.mubr.msk.bf16.gmra.mxu1 %vm9389_vm1, %v2755_v57 }
 0x2cb   :  { %v764_v12 = vpop.permute.xlu0 %763  ;;  %4502 = vmatprep.mubr.msk.bf16.mxu1 %vm4709_vm7, %v9071_v37 }
 0x2cc   :  { %v2148_v27 = vsel %vm9390_vm14, %v4673_v14, %v764_v12  ;;  %v3389_v12 = vadd.s32 328, %v5853_v11  ;;  %vm9393_vm14 = vmmov %vm9388_vm8 }
 0x2cd   :  { %v2235_v38 = vsel %vm2159_vm9, %v2148_v27, %v941_v16  ;;  %v3431_v16 = vcvt.s32.f32 %v3388_v54 }
 0x2ce   :  { %v1324_v47 = vpop.permute.xlu1 %1323 }
 0x2cf   :  { %v1044_v31 = vpop.permute.xlu0 %1043 }
 0x2d0   :  { %v3070_v2 = vpop.f32.mrf.mxu0  ;;  %v2322_v4 = vsel %vm2246_vm10, %v2235_v38, %v1044_v31 }
 0x2d1   :  { %v3071_v0 = vadd.f32 %v8603_v1, %v3070_v2  ;;  %v2409_v9 = vsel %vm2333_vm11, %v2322_v4, %v1324_v47  ;;  %v3432_v2 = vcvt.s32.f32 %v3389_v12  ;;  %v4674_v4 = vld [vmem:[%s8955_s1 + $0x130] sm:$0xff]  }
 0x2d2   :  { %v4432_v53 = vpop.f32.mrf.mxu0  ;;  %v1604_v61 = vpop.permute.xlu1 %1603 }
 0x2d3   :  { %v3299_v52 = vmax.f32 %v3071_v0, 0.0  ;;  %v1501_v48 = vpop.permute.xlu0 %1500 }
 0x2d4   :  { %v3073_v63 = vpop.f32.mrf.mxu0  ;;  %v2496_v42 = vsel %vm2420_vm12, %v2409_v9, %v1501_v48 }
 0x2d5   :  { %v3817_v33 = vmul.f32 %v8670_v21, %v3299_v52  ;;  %v3074_v20 = vadd.f32 %v8603_v1, %v3073_v63  ;;  %v2583_v5 = vsel %vm2507_vm13, %v2496_v42, %v1604_v61  ;;  %v3476_v63 = vmul.f32 0.055555556, %v3432_v2 }
 0x2d6   :  { %v4433_v40 = vpop.f32.mrf.mxu0  ;;  %v2061_v62 = vpop.permute.xlu1 %2060 }
 0x2d7   :  { %v3902_v44 = vadd.f32 %v8631_v19, %v3817_v33  ;;  %v3300_v10 = vmax.f32 %v3074_v20, 0.0  ;;  %v1884_v57 = vpop.permute.xlu0 %1883  ;;  %v3475_v19 = vmul.f32 0.055555556, %v3431_v16 }
 0x2d8   :  { %v2670_v14 = vsel %vm9387_vm0, %v2583_v5, %v1884_v57 }
 0x2d9   :  { %v3818_v60 = vmul.f32 %v8678_v35, %v3300_v10  ;;  %v2757_v27 = vsel %vm9388_vm8, %v2670_v14, %v2061_v62  ;;  %v3518_v48 = vfloor.f32 %v3475_v19  ;;  %v3519_v10 = vfloor.f32 %v3476_v63 }
 0x2da   :  { %v943_v47 = vpop.permute.xlu1 %942  ;;  %4503 = vmatmul.mubr.msk.bf16.gmra.mxu1 %vm9389_vm1, %v2757_v27 }
 0x2db   :  { %v8686_v38 = vadd.f32 %v3902_v44, %v3818_v60  ;;  %v766_v31 = vpop.permute.xlu0 %765  ;;  %4506 = vmatprep.mubr.msk.bf16.mxu1 %vm4709_vm7, %v9071_v37  ;;  %v3561_v44 = vmul.f32 18.0, %v3518_v48  ;;  %vm3647_vm4 = vcmp.lt.f32.partialorder %v3518_v48, 16.0  ;;  %vm3648_vm8 = vcmp.lt.f32.partialorder %v3519_v10, 16.0 }
 0x2dc   :  { %v2150_v0 = vsel %vm9391_vm3, %v4674_v4, %v766_v31 }
 0x2dd   :  { %v2237_v61 = vsel %vm2159_vm9, %v2150_v0, %v943_v47  ;;  %v3604_v27 = vsub.f32 %v3431_v16, %v3561_v44  ;;  %v3562_v47 = vmul.f32 18.0, %v3519_v10 }
 0x2de   :  { %v1326_v53 = vpop.permute.xlu1 %1325 }
 0x2df   :  { %v1046_v52 = vpop.permute.xlu0 %1045  ;;  %vm3690_vm2 = vcmp.lt.f32.partialorder %v3604_v27, 16.0 }
 0x2e0   :  { %v8696_v9 = vpop.f32.mrf.mxu1  ;;  %v2324_v54 = vsel %vm2246_vm10, %v2237_v61, %v1046_v52  ;;  %v4675_v61 = vld [vmem:[%s8955_s1 + $0x138] sm:$0xff]   ;;  %vm3733_vm0 = vmand %vm3647_vm4, %vm3690_vm2 }
 0x2e1   :  { %v2411_v20 = vsel %vm2333_vm11, %v2324_v54, %v1326_v53  ;;  %v3605_v53 = vsub.f32 %v3432_v2, %v3562_v47  ;;  %vm9396_vm4 = vmmov %vm9395_vm15 }
 0x2e2   :  { %v4472_v33 = vpop.f32.mrf.mxu1  ;;  %v1606_v42 = vpop.permute.xlu1 %1605  ;;  %vm9397_vm2 = vmmov %vm9392_vm6 }
 0x2e3   :  { %v1503_v40 = vpop.permute.xlu0 %1502  ;;  %vm3691_vm1 = vcmp.lt.f32.partialorder %v3605_v53, 16.0 }
 0x2e4   :  { %v8700_v62 = vpop.f32.mrf.mxu1  ;;  %v2498_v5 = vsel %vm2420_vm12, %v2411_v20, %v1503_v40  ;;  %vm3734_vm3 = vmand %vm3648_vm8, %vm3691_vm1 }
 0x2e5   :  { %v2585_v60 = vsel %vm2507_vm13, %v2498_v5, %v1606_v42  ;;  %v8717_v42 = vsel %vm3733_vm0, 0.00390625, %v9071_v37  ;;  %v8725_v47 = vsel %vm3734_vm3, 0.00390625, %v9071_v37  ;;  %vm9399_vm0 = vmmov %vm9394_vm5 }
 0x2e6   :  { %v4473_v57 = vpop.f32.mrf.mxu1  ;;  %v2063_v12 = vpop.permute.xlu1 %2062  ;;  %vm9400_vm3 = vmmov %vm9396_vm4 }
 0x2e7   :  { %v1886_v14 = vpop.permute.xlu0 %1885 }
 0x2e8   :  { %v2672_v31 = vsel %vm9392_vm6, %v2585_v60, %v1886_v14  ;;  %v3390_v60 = vadd.s32 336, %v5853_v11 }
 0x2e9   :  { %v2759_v19 = vsel %vm9393_vm14, %v2672_v31, %v2063_v12 }
 0x2ea   :  { %v945_v4 = vpop.permute.xlu1 %944  ;;  %4507 = vmatmul.mubr.msk.bf16.gmra.mxu1 %vm9394_vm5, %v2759_v19 }
 0x2eb   :  { %v768_v0 = vpop.permute.xlu0 %767  ;;  %4510 = vmatprep.mubr.msk.bf16.mxu1 %vm4709_vm7, %v9071_v37 }
 0x2ec   :  { %v2152_v16 = vsel %vm9395_vm15, %v4675_v61, %v768_v0  ;;  %vm9398_vm15 = vmmov %vm9393_vm14 }
 0x2ed   :  { %v2239_v63 = vsel %vm2159_vm9, %v2152_v16, %v945_v4  ;;  %v3433_v16 = vcvt.s32.f32 %v3390_v60 }
 0x2ee   :  { %v1328_v52 = vpop.permute.xlu1 %1327 }
 0x2ef   :  { %v1048_v54 = vpop.permute.xlu0 %1047 }
 0x2f0   :  { %v3078_v33 = vpop.f32.mrf.mxu0  ;;  %v2326_v48 = vsel %vm2246_vm10, %v2239_v63, %v1048_v54 }
 0x2f1   :  { %v3079_v2 = vadd.f32 %v8603_v1, %v3078_v33  ;;  %v2413_v5 = vsel %vm2333_vm11, %v2326_v48, %v1328_v52 }
 0x2f2   :  { %v4436_v20 = vpop.f32.mrf.mxu0  ;;  %v1608_v40 = vpop.permute.xlu1 %1607 }
 0x2f3   :  { %v3301_v44 = vmax.f32 %v3079_v2, 0.0  ;;  %v1505_v57 = vpop.permute.xlu0 %1504  ;;  %v4676_v2 = vld [vmem:[%s8955_s1 + $0x140] sm:$0xff]  }
 0x2f4   :  { %v3081_v12 = vpop.f32.mrf.mxu0  ;;  %v2500_v14 = vsel %vm2420_vm12, %v2413_v5, %v1505_v57 }
 0x2f5   :  { %v3819_v10 = vmul.f32 %v8717_v42, %v3301_v44  ;;  %v3082_v27 = vadd.f32 %v8603_v1, %v3081_v12  ;;  %v2587_v53 = vsel %vm2507_vm13, %v2500_v14, %v1608_v40 }
 0x2f6   :  { %v4437_v31 = vpop.f32.mrf.mxu0  ;;  %v2065_v19 = vpop.permute.xlu1 %2064 }
 0x2f7   :  { %v3904_v4 = vadd.f32 %v8686_v38, %v3819_v10  ;;  %v3302_v0 = vmax.f32 %v3082_v27, 0.0  ;;  %v1888_v61 = vpop.permute.xlu0 %1887  ;;  %v3477_v38 = vmul.f32 0.055555556, %v3433_v16 }
 0x2f8   :  { %v2674_v52 = vsel %vm9392_vm6, %v2587_v53, %v1888_v61 }
 0x2f9   :  { %v3820_v11 = vmul.f32 %v8725_v47, %v3302_v0  ;;  %v2761_v63 = vsel %vm9393_vm14, %v2674_v52, %v2065_v19  ;;  %v3520_v12 = vfloor.f32 %v3477_v38  ;;  %vm9401_vm14 = vmmov %vm9397_vm2 }
 0x2fa   :  { %v947_v54 = vpop.permute.xlu1 %946  ;;  %4511 = vmatmul.mubr.msk.bf16.gmra.mxu1 %vm9394_vm5, %v2761_v63  ;;  %vm9402_vm5 = vmmov %vm9398_vm15 }
 0x2fb   :  { %v3905_v33 = vadd.f32 %v3904_v4, %v3820_v11  ;;  %v770_v48 = vpop.permute.xlu0 %769  ;;  %4514 = vmatprep.mubr.msk.bf16.mxu1 %vm4709_vm7, %v9071_v37  ;;  %v3563_v4 = vmul.f32 18.0, %v3520_v12  ;;  %vm3649_vm8 = vcmp.lt.f32.partialorder %v3520_v12, 16.0 }
 0x2fc   :  { %v2154_v20 = vsel %vm9396_vm4, %v4676_v2, %v770_v48  ;;  %vm9403_vm4 = vmmov %vm9399_vm0 }
 0x2fd   :  { %v2241_v44 = vsel %vm2159_vm9, %v2154_v20, %v947_v54  ;;  %v3606_v63 = vsub.f32 %v3433_v16, %v3563_v4  ;;  %v4677_v20 = vld [vmem:[%s8955_s1 + $0x148] sm:$0xff]  }
 0x2fe   :  { %v1330_v40 = vpop.permute.xlu1 %1329 }
 0x2ff   :  { %v1050_v5 = vpop.permute.xlu0 %1049  ;;  %vm3692_vm1 = vcmp.lt.f32.partialorder %v3606_v63, 16.0 }
 0x300   :  { %v8740_v57 = vpop.f32.mrf.mxu1  ;;  %v2328_v60 = vsel %vm2246_vm10, %v2241_v44, %v1050_v5  ;;  %vm3735_vm6 = vmand %vm3649_vm8, %vm3692_vm1 }
 0x301   :  { %v2415_v27 = vsel %vm2333_vm11, %v2328_v60, %v1330_v40 }
 0x302   :  { %v4476_v10 = vpop.f32.mrf.mxu1  ;;  %v1610_v14 = vpop.permute.xlu1 %1609 }
 0x303   :  { %v1507_v31 = vpop.permute.xlu0 %1506 }
 0x304   :  { %v8744_v19 = vpop.f32.mrf.mxu1  ;;  %v2502_v0 = vsel %vm2420_vm12, %v2415_v27, %v1507_v31 }
 0x305   :  { %v2589_v11 = vsel %vm2507_vm13, %v2502_v0, %v1610_v14  ;;  %v8761_v14 = vsel %vm3735_vm6, 0.00390625, %v9071_v37 }
 0x306   :  { %v4477_v53 = vpop.f32.mrf.mxu1  ;;  %v2067_v61 = vpop.permute.xlu1 %2066 }
 0x307   :  { %v1890_v52 = vpop.permute.xlu0 %1889 }
 0x308   :  { %v2676_v54 = vsel %vm9397_vm2, %v2589_v11, %v1890_v52  ;;  %vm9404_vm2 = vmmov %vm9400_vm3 }
 0x309   :  { %v2763_v48 = vsel %vm9398_vm15, %v2676_v54, %v2067_v61  ;;  %vm9406_vm15 = vmmov %vm9402_vm5 }
 0x30a   :  { %v949_v38 = vpop.permute.xlu1 %948  ;;  %4515 = vmatmul.mubr.msk.bf16.gmra.mxu1 %vm9399_vm0, %v2763_v48 }
 0x30b   :  { %v772_v2 = vpop.permute.xlu0 %771  ;;  %4518 = vmatprep.mubr.msk.bf16.mxu1 %vm4709_vm7, %v9071_v37 }
 0x30c   :  { %v2156_v40 = vsel %vm9400_vm3, %v4677_v20, %v772_v2 }
 0x30d   :  { %v2243_v44 = vsel %vm2159_vm9, %v2156_v40, %v949_v38 }
 0x30e   :  { %v1332_v16 = vpop.permute.xlu1 %1331 }
 0x30f   :  { %v1052_v5 = vpop.permute.xlu0 %1051 }
 0x310   :  { %v3086_v60 = vpop.f32.mrf.mxu0  ;;  %v2330_v10 = vsel %vm2246_vm10, %v2243_v44, %v1052_v5 }
 0x311   :  { %v3087_v12 = vadd.f32 %v8603_v1, %v3086_v60  ;;  %v2417_v0 = vsel %vm2333_vm11, %v2330_v10, %v1332_v16 }
 0x312   :  { %v4440_v27 = vpop.f32.mrf.mxu0  ;;  %v1612_v31 = vpop.permute.xlu1 %1611 }
 0x313   :  { %v3303_v4 = vmax.f32 %v3087_v12, 0.0  ;;  %v1509_v53 = vpop.permute.xlu0 %1508 }
 0x314   :  { %v3089_v61 = vpop.f32.mrf.mxu0  ;;  %v2504_v52 = vsel %vm2420_vm12, %v2417_v0, %v1509_v53 }
 0x315   :  { %v3821_v11 = vmul.f32 %v8761_v14, %v3303_v4  ;;  %v2591_v38 = vsel %vm2507_vm13, %v2504_v52, %v1612_v31 }
 0x316   :  { %v4441_v63 = vpop.f32.mrf.mxu0  ;;  %v2069_v54 = vpop.permute.xlu1 %2068 }
 0x317   :  { %v8766_v48 = vadd.f32 %v3905_v33, %v3821_v11  ;;  %v1892_v2 = vpop.permute.xlu0 %1891 }
 0x318   :  { %v2678_v20 = vsel %vm9401_vm14, %v2591_v38, %v1892_v2 }
 0x319   :  { %v2765_v40 = vsel %vm9402_vm5, %v2678_v20, %v2069_v54 }
 0x31a   :  { %v951_v44 = vpop.permute.xlu1 %950  ;;  %4519 = vmatmul.mubr.msk.bf16.gmra.mxu1 %vm9403_vm4, %v2765_v40  ;;  %v3090_v40 = vadd.f32 %v8603_v1, %v3089_v61 }
 0x31b   :  { %v774_v16 = vpop.permute.xlu0 %773  ;;  %4522 = vmatprep.mubr.msk.bf16.mxu1 %vm4709_vm7, %v9071_v37 }
 0x31c   :  { %v2158_v5 = vsel %vm9404_vm2, %v8251_v58, %v774_v16  ;;  %v3961_v16 = vld [vmem:[%s8954_s0] sm:$0x1] }
 0x31d   :  { %v2245_v33 = vsel %vm2159_vm9, %v2158_v5, %v951_v44  ;;  %vm9405_vm9 = vmmov %vm9401_vm14  ;;  %v3304_v5 = vmax.f32 %v3090_v40, 0.0 }
 0x31e   :  { %v1334_v60 = vpop.permute.xlu1 %1333 }
 0x31f   :  { %v1054_v10 = vpop.permute.xlu0 %1053 }
 0x320   :  { %v8777_v12 = vpop.f32.mrf.mxu1  ;;  %v2332_v27 = vsel %vm2246_vm10, %v2245_v33, %v1054_v10  ;;  %vm9407_vm10 = vmmov %vm9402_vm5 }
 0x321   :  { %v2419_v0 = vsel %vm2333_vm11, %v2332_v27, %v1334_v60  ;;  %vm4053_vm11 = vcmask 1041409  }
 0x322   :  { %v4480_v31 = vpop.f32.mrf.mxu1  ;;  %v1614_v4 = vpop.permute.xlu1 %1613 }
 0x323   :  { %v1511_v53 = vpop.permute.xlu0 %1510  ;;  %v9408_v31 = vld [vmem:[#allocation7_spill] sm:$0xff] }
 0x324   :  { %v8781_v11 = vpop.f32.mrf.mxu1  ;;  %v2506_v52 = vsel %vm2420_vm12, %v2419_v0, %v1511_v53  ;;  %v9409_v0 = vld [vmem:[#allocation8_spill] sm:$0xff] }
 0x325   :  { %v2593_v58 = vsel %vm2507_vm13, %v2506_v52, %v1614_v4  ;;  %v3822_v4 = vmul.f32 %v9408_v31, %v3304_v5 }
 0x326   :  { %v4481_v63 = vpop.f32.mrf.mxu1  ;;  %v2071_v54 = vpop.permute.xlu1 %2070 }
 0x327   :  { %v1894_v38 = vpop.permute.xlu0 %1893 }
 0x328   :  { %v2680_v2 = vsel %vm9405_vm9, %v2593_v58, %v1894_v38  ;;  %v9410_v58 = vld [vmem:[#allocation9_spill] sm:$0xff] }
 0x329   :  { %v2767_v20 = vsel %vm9406_vm15, %v2680_v2, %v2071_v54 }
 0x32a   :  { %4523 = vmatmul.mubr.msk.bf16.gmra.mxu1 %vm9399_vm0, %v2767_v20 }
 0x32b   :  { %4530 = vmatprep.mubr.msk.bf16.mxu1 %vm4709_vm7, %v9071_v37 }
 0x330   :  { %v3094_v44 = vpop.f32.mrf.mxu0 }
 0x331   :  { %v3095_v60 = vadd.f32 %v8603_v1, %v3094_v44 }
 0x332   :  { %v4444_v33 = vpop.f32.mrf.mxu0  ;;  %4531 = vmatmul.mubr.msk.bf16.vlgmr.msra.gmra.mxu1 %vm9407_vm10, %v3961_v16 }
 0x333   :  { %v3305_v10 = vmax.f32 %v3095_v60, 0.0  ;;  %4550 = vmatprep.mubr.msk.bf16.mxu1 %vm4709_vm7, %v9071_v37  ;;  %vm9426_vm7 = vcmask 1041408  }
 0x334   :  { %v3097_v27 = vpop.f32.mrf.mxu0  ;;  %vm9427_vm12 = vmmov %vm9426_vm7 }
 0x335   :  { %v3823_v61 = vmul.f32 %v9409_v0, %v3305_v10  ;;  %v3098_v53 = vadd.f32 %v8603_v1, %v3097_v27  ;;  %v3111_v10 = vadd.f32 %v8603_v1, %v7951_v22  ;;  %v9411_v0 = vld [vmem:[#allocation10_spill] sm:$0xff]  ;;  %v3122_v22 = vadd.f32 %v8603_v1, %v8169_v17 }
 0x336   :  { %v4445_v52 = vpop.f32.mrf.mxu0  ;;  %v9415_v17 = vld [vmem:[#allocation14_spill] sm:$0xff] }
 0x337   :  { %v3913_v63 = vadd.f32 %v3823_v61, %v3822_v4  ;;  %v3306_v54 = vmax.f32 %v3098_v53, 0.0  ;;  %v3114_v4 = vadd.f32 %v8603_v1, %v7981_v15 }
 0x339   :  { %v3824_v38 = vmul.f32 %v9410_v58, %v3306_v54  ;;  %v3119_v54 = vadd.f32 %v8603_v1, %v8139_v6  ;;  %v3312_v6 = vmax.f32 %v3122_v22, 0.0 }
 0x33b   :  { %v3914_v2 = vadd.f32 %v3913_v63, %v3824_v38  ;;  %v3309_v63 = vmax.f32 %v3111_v10, 0.0  ;;  %v3311_v15 = vmax.f32 %v3119_v54, 0.0  ;;  %v9414_v10 = vld [vmem:[#allocation13_spill] sm:$0xff] }
 0x340   :  { %v8802_v20 = vpop.f32.mrf.mxu1 }
 0x342   :  { %v4484_v40 = vpop.f32.mrf.mxu1 }
 0x343   :  { %v3310_v40 = vmax.f32 %v3114_v4, 0.0 }
 0x344   :  { %v8804_v44 = vpop.f32.mrf.mxu1 }
 0x346   :  { %v4485_v16 = vpop.f32.mrf.mxu1 }
 0x347   :  { %v9412_v16 = vld [vmem:[#allocation11_spill] sm:$0xff] }
 0x350   :  { %v3102_v60 = vpop.f32.mrf.mxu0 }
 0x351   :  { %v3103_v33 = vadd.f32 %v8603_v1, %v3102_v60 }
 0x352   :  { %v4448_v5 = vpop.f32.mrf.mxu0 }
 0x353   :  { %v3307_v27 = vmax.f32 %v3103_v33, 0.0  ;;  %v9413_v33 = vld [vmem:[#allocation12_spill] sm:$0xff] }
 0x354   :  { %v3105_v31 = vpop.f32.mrf.mxu0  ;;  %v3827_v5 = vmul.f32 %v9413_v33, %v3309_v63  ;;  %v3135_v63 = vadd.f32 %v8603_v1, %v8527_v24 }
 0x355   :  { %v3825_v61 = vmul.f32 %v9411_v0, %v3307_v27  ;;  %v3106_v53 = vadd.f32 %v8603_v1, %v3105_v31  ;;  %v3127_v27 = vadd.f32 %v8603_v1, %v8327_v43  ;;  %v9416_v43 = vld [vmem:[#allocation15_spill] sm:$0xff] }
 0x356   :  { %v4449_v52 = vpop.f32.mrf.mxu0 }
 0x357   :  { %v3915_v58 = vadd.f32 %v3914_v2, %v3825_v61  ;;  %v3308_v38 = vmax.f32 %v3106_v53, 0.0  ;;  %v3828_v52 = vmul.f32 %v9414_v10, %v3310_v40  ;;  %v3130_v2 = vadd.f32 %v8603_v1, %v8355_v50  ;;  %v9417_v50 = vld [vmem:[#allocation16_spill] sm:$0xff]  ;;  %v9418_v10 = vld [vmem:[#allocation17_spill] sm:$0xff] }
 0x358   :  { %v3829_v53 = vmul.f32 %v9415_v17, %v3311_v15  ;;  %v3138_v40 = vadd.f32 %v8603_v1, %v8556_v55  ;;  %v3143_v15 = vadd.f32 %v8603_v1, %v8641_v59  ;;  %v3151_v55 = vadd.f32 %v8603_v1, %v8696_v9 }
 0x359   :  { %v3826_v60 = vmul.f32 %v9412_v16, %v3308_v38  ;;  %v3313_v38 = vmax.f32 %v3127_v27, 0.0  ;;  %v3154_v59 = vadd.f32 %v8603_v1, %v8700_v62  ;;  %v3162_v62 = vadd.f32 %v8603_v1, %v8744_v19 }
 0x35a   :  { %v8821_v0 = vpop.f32.mrf.mxu1  ;;  %v3317_v17 = vmax.f32 %v3143_v15, 0.0 }
 0x35b   :  { %v3916_v31 = vadd.f32 %v3915_v58, %v3826_v60  ;;  %v3830_v58 = vmul.f32 %v9416_v43, %v3312_v6  ;;  %v3314_v60 = vmax.f32 %v3130_v2, 0.0  ;;  %v9419_v2 = vld [vmem:[#allocation18_spill] sm:$0xff]  ;;  %v3322_v19 = vmax.f32 %v3162_v62, 0.0 }
 0x35c   :  { %v4488_v61 = vpop.f32.mrf.mxu1 }
 0x35d   :  { %v3917_v4 = vadd.f32 %v3916_v31, %v3827_v5  ;;  %v3831_v5 = vmul.f32 %v9417_v50, %v3313_v38  ;;  %v3315_v31 = vmax.f32 %v3135_v63, 0.0  ;;  %v3832_v24 = vmul.f32 %v9418_v10, %v3314_v60  ;;  %v9420_v38 = vld [vmem:[#allocation19_spill] sm:$0xff]  ;;  %v9422_v50 = vld [vmem:[#allocation21_spill] sm:$0xff] }
 0x35e   :  { %v8829_v16 = vpop.f32.mrf.mxu1  ;;  %v4632_v10 = vld [vmem:[%s8957_s3 + $0x40] sm:$0xff]  }
 0x35f   :  { %v3918_v54 = vadd.f32 %v3917_v4, %v3828_v52  ;;  %v3316_v52 = vmax.f32 %v3138_v40, 0.0  ;;  %v3146_v4 = vadd.f32 %v8603_v1, %v8645_v36  ;;  %v3833_v61 = vmul.f32 %v9419_v2, %v3315_v31  ;;  %v9421_v36 = vld [vmem:[#allocation20_spill] sm:$0xff] }
 0x360   :  { %v4489_v33 = vpop.f32.mrf.mxu1  ;;  %v3835_v60 = vmul.f32 %v9421_v36, %v3317_v17  ;;  %v3319_v40 = vmax.f32 %v3151_v55, 0.0  ;;  %v3320_v31 = vmax.f32 %v3154_v59, 0.0 }
 0x361   :  { %v3919_v22 = vadd.f32 %v3918_v54, %v3829_v53  ;;  %v3834_v63 = vmul.f32 %v9420_v38, %v3316_v52  ;;  %v3318_v54 = vmax.f32 %v3146_v4, 0.0  ;;  %v3167_v52 = vadd.f32 %v8603_v1, %v8777_v12 }
 0x362   :  { %v3838_v2 = vmul.f32 %v7104_v28, %v3320_v31  ;;  %v3840_v28 = vmul.f32 %v7255_v8, %v3322_v19 }
 0x363   :  { %v3920_v27 = vadd.f32 %v3919_v22, %v3830_v58  ;;  %v4631_v58 = vld [vmem:[%s8957_s3 + $0x48] sm:$0xff]   ;;  %v3159_v22 = vadd.f32 %v8603_v1, %v8740_v57  ;;  %v3323_v12 = vmax.f32 %v3167_v52, 0.0 }
 0x364   :  { %4535 = vmatpush3.bf16.msra.mxu1 %v4631_v58  ;;  %v4634_v58 = vld [vmem:[%s8957_s3 + $0x30] sm:$0xff]  }
 0x365   :  { %v3921_v6 = vadd.f32 %v3920_v27, %v3831_v5  ;;  %v3836_v5 = vmul.f32 %v9422_v50, %v3318_v54  ;;  %4536 = vmatprep.subr.bf16.mxu1 %v9071_v37  ;;  %v3321_v57 = vmax.f32 %v3159_v22, 0.0  ;;  %v3841_v36 = vmul.f32 %v7285_v18, %v3323_v12  ;;  %v4635_v50 = vld [vmem:[%s8957_s3 + $0x28] sm:$0xff]  }
 0x367   :  { %v3922_v53 = vadd.f32 %v3921_v6, %v3832_v24  ;;  %v3837_v24 = vmul.f32 %v7009_v51, %v3319_v40  ;;  %v4633_v51 = vld [vmem:[%s8957_s3 + $0x38] sm:$0xff]  }
 0x368   :  { %4537 = vmatpush3.bf16.msra.mxu1 %v4632_v10 }
 0x369   :  { %v3923_v43 = vadd.f32 %v3922_v53, %v3833_v61  ;;  %v3170_v61 = vadd.f32 %v8603_v1, %v8781_v11  ;;  %4538 = vmatprep.subr.bf16.mxu1 %v9071_v37  ;;  %v9423_v53 = vld [vmem:[#allocation22_spill] sm:$0xff]  ;;  %v3178_v11 = vadd.f32 %v8603_v1, %v8804_v44  ;;  %v3186_v44 = vadd.f32 %v8603_v1, %v8829_v16 }
 0x36a   :  { %v3190_v9 = vpop.f32.mrf.mxu1  ;;  %v3839_v38 = vmul.f32 %v9423_v53, %v3321_v57 }
 0x36b   :  { %v3924_v33 = vadd.f32 %v3923_v43, %v3834_v63  ;;  %v3175_v63 = vadd.f32 %v8603_v1, %v8802_v20  ;;  %v3324_v59 = vmax.f32 %v3170_v61, 0.0  ;;  %v3183_v20 = vadd.f32 %v8603_v1, %v8821_v0 }
 0x36c   :  { %v4492_v27 = vpop.f32.mrf.mxu1  ;;  %4539 = vmatpush3.bf16.msra.mxu1 %v4633_v51  ;;  %v3326_v22 = vmax.f32 %v3178_v11, 0.0  ;;  %v3191_v0 = vadd.f32 %v8603_v1, %v3190_v9 }
 0x36d   :  { %v3925_v15 = vadd.f32 %v3924_v33, %v3835_v60  ;;  %4540 = vmatprep.subr.bf16.mxu1 %v9071_v37  ;;  %v3325_v60 = vmax.f32 %v3175_v63, 0.0  ;;  %v3842_v8 = vmul.f32 %v7370_v39, %v3324_v59  ;;  %v3328_v27 = vmax.f32 %v3186_v44, 0.0 }
 0x36e   :  { %v3193_v6 = vpop.f32.mrf.mxu1  ;;  %v3844_v39 = vmul.f32 %v7497_v56, %v3326_v22  ;;  %v3329_v52 = vmax.f32 %v3191_v0, 0.0 }
 0x36f   :  { %v3926_v4 = vadd.f32 %v3925_v15, %v3836_v5  ;;  %v3843_v18 = vmul.f32 %v7392_v46, %v3325_v60  ;;  %v3327_v5 = vmax.f32 %v3183_v20, 0.0  ;;  %v3194_v16 = vadd.f32 %v8603_v1, %v3193_v6 }
 0x370   :  { %v4493_v55 = vpop.f32.mrf.mxu1  ;;  %4541 = vmatpush3.bf16.msra.mxu1 %v4634_v58 }
 0x371   :  { %v3927_v17 = vadd.f32 %v3926_v4, %v3837_v24  ;;  %4542 = vmatprep.subr.bf16.mxu1 %v9071_v37  ;;  %v4636_v24 = vld [vmem:[%s8957_s3 + $0x20] sm:$0xff]   ;;  %v3845_v46 = vmul.f32 %v7523_v26, %v3327_v5  ;;  %v3330_v19 = vmax.f32 %v3194_v16, 0.0  ;;  %v3847_v55 = vmul.f32 %v7618_v49, %v3329_v52 }
 0x373   :  { %v3928_v54 = vadd.f32 %v3927_v17, %v3838_v2  ;;  %v3846_v2 = vmul.f32 %v7601_v7, %v3328_v27  ;;  %v4637_v17 = vld [vmem:[%s8957_s3 + $0x18] sm:$0xff]   ;;  %v4638_v7 = vld [vmem:[%s8957_s3 + $0x10] sm:$0xff]  }
 0x374   :  { %4543 = vmatpush3.bf16.msra.mxu1 %v4635_v50 }
 0x375   :  { %v3929_v43 = vadd.f32 %v3928_v54, %v3839_v38  ;;  %4544 = vmatprep.subr.bf16.mxu1 %v9071_v37  ;;  %v3848_v38 = vmul.f32 %v7719_v34, %v3330_v19 }
 0x377   :  { %v3930_v40 = vadd.f32 %v3929_v43, %v3840_v28 }
 0x378   :  { %4545 = vmatpush3.bf16.msra.mxu1 %v4636_v24 }
 0x379   :  { %v3931_v33 = vadd.f32 %v3930_v40, %v3841_v36  ;;  %4546 = vmatprep.subr.bf16.mxu1 %v9071_v37 }
 0x37a   :  { %v3198_v62 = vpop.f32.mrf.mxu1 }
 0x37b   :  { %v3932_v31 = vadd.f32 %v3931_v33, %v3842_v8  ;;  %v3199_v9 = vadd.f32 %v8603_v1, %v3198_v62 }
 0x37c   :  { %v4496_v10 = vpop.f32.mrf.mxu1  ;;  %4547 = vmatpush3.bf16.msra.mxu1 %v4637_v17 }
 0x37d   :  { %v3933_v15 = vadd.f32 %v3932_v31, %v3843_v18  ;;  %v3331_v51 = vmax.f32 %v3199_v9, 0.0  ;;  %4548 = vmatprep.subr.bf16.mxu1 %v9071_v37 }
 0x37e   :  { %v3201_v4 = vpop.f32.mrf.mxu1 }
 0x37f   :  { %v3934_v57 = vadd.f32 %v3933_v15, %v3844_v39  ;;  %v3202_v6 = vadd.f32 %v8603_v1, %v3201_v4  ;;  %v3849_v54 = vmul.f32 %v7748_v41, %v3331_v51 }
 0x380   :  { %v4497_v61 = vpop.f32.mrf.mxu1  ;;  %4549 = vmatpush3.bf16.msra.mxu1 %v4638_v7 }
 0x381   :  { %v3935_v56 = vadd.f32 %v3934_v57, %v3845_v46  ;;  %v3332_v12 = vmax.f32 %v3202_v6, 0.0 }
 0x383   :  { %v3936_v26 = vadd.f32 %v3935_v56, %v3846_v2  ;;  %v3850_v59 = vmul.f32 %v7861_v30, %v3332_v12 }
 0x385   :  { %v3937_v53 = vadd.f32 %v3936_v26, %v3847_v55 }
 0x387   :  { %v3938_v63 = vadd.f32 %v3937_v53, %v3848_v38  ;;  %v9424_v38 = vld [vmem:[#allocation6_spill] sm:$0xff] }
 0x389   :  { %v3939_v28 = vadd.f32 %v3938_v63, %v3849_v54 }
 0x38a   :  { %v3206_v11 = vpop.f32.mrf.mxu1 }
 0x38b   :  { %v3940_v49 = vadd.f32 %v3939_v28, %v3850_v59  ;;  %v3207_v43 = vadd.f32 %v8603_v1, %v3206_v11 }
 0x38c   :  { %v4500_v58 = vpop.f32.mrf.mxu1 }
 0x38d   :  { %v3333_v34 = vmax.f32 %v3207_v43, 0.0  ;;  %v9425_v43 = vld [vmem:[#allocation5_spill] sm:$0xff] }
 0x38e   :  { %v3209_v36 = vpop.f32.mrf.mxu1 }
 0x38f   :  { %v3851_v37 = vmul.f32 %v7888_v29, %v3333_v34  ;;  %v3210_v60 = vadd.f32 %v8603_v1, %v3209_v36 }
 0x390   :  { %v4501_v20 = vpop.f32.mrf.mxu1 }
 0x391   :  { %v3941_v40 = vadd.f32 %v3940_v49, %v3851_v37  ;;  %v3334_v8 = vmax.f32 %v3210_v60, 0.0 }
 0x393   :  { %v3852_v41 = vmul.f32 %v8051_v23, %v3334_v8 }
 0x395   :  { %v3942_v22 = vadd.f32 %v3941_v40, %v3852_v41 }
 0x39a   :  { %v3214_v33 = vpop.f32.mrf.mxu1 }
 0x39b   :  { %v3215_v46 = vadd.f32 %v8603_v1, %v3214_v33 }
 0x39c   :  { %v4504_v44 = vpop.f32.mrf.mxu1 }
 0x39d   :  { %v3335_v57 = vmax.f32 %v3215_v46, 0.0 }
 0x39e   :  { %v3217_v30 = vpop.f32.mrf.mxu1 }
 0x39f   :  { %v3218_v23 = vadd.f32 %v8603_v1, %v3217_v30  ;;  %v3853_v2 = vmul.f32 %v8076_v32, %v3335_v57 }
 0x3a0   :  { %v4505_v50 = vpop.f32.mrf.mxu1 }
 0x3a1   :  { %v3336_v9 = vmax.f32 %v3218_v23, 0.0  ;;  %v3943_v53 = vadd.f32 %v3942_v22, %v3853_v2 }
 0x3a3   :  { %v3854_v17 = vmul.f32 %v8239_v3, %v3336_v9 }
 0x3a5   :  { %v3944_v28 = vadd.f32 %v3943_v53, %v3854_v17 }
 0x3aa   :  { %v3222_v18 = vpop.f32.mrf.mxu1 }
 0x3ab   :  { %v3223_v52 = vadd.f32 %v8603_v1, %v3222_v18 }
 0x3ac   :  { %v4508_v5 = vpop.f32.mrf.mxu1 }
 0x3ad   :  { %v3337_v19 = vmax.f32 %v3223_v52, 0.0 }
 0x3ae   :  { %v3225_v31 = vpop.f32.mrf.mxu1 }
 0x3af   :  { %v3226_v4 = vadd.f32 %v8603_v1, %v3225_v31  ;;  %v3855_v12 = vmul.f32 %v9424_v38, %v3337_v19 }
 0x3b0   :  { %v4509_v0 = vpop.f32.mrf.mxu1 }
 0x3b1   :  { %v3338_v26 = vmax.f32 %v3226_v4, 0.0  ;;  %v3945_v11 = vadd.f32 %v3944_v28, %v3855_v12 }
 0x3b3   :  { %v3856_v32 = vmul.f32 %v8433_v45, %v3338_v26  ;;  %v3907_v45 = vrot.slane %v8766_v48, 4 }
 0x3b5   :  { %v3946_v36 = vadd.f32 %v3945_v11, %v3856_v32  ;;  %v3908_v31 = vadd.f32 %v3907_v45, %v8766_v48 }
 0x3ba   :  { %v3230_v62 = vpop.f32.mrf.mxu1 }
 0x3bb   :  { %v3231_v6 = vadd.f32 %v8603_v1, %v3230_v62 }
 0x3bc   :  { %v4512_v39 = vpop.f32.mrf.mxu1 }
 0x3bd   :  { %v3339_v7 = vmax.f32 %v3231_v6, 0.0 }
 0x3be   :  { %v3233_v15 = vpop.f32.mrf.mxu1 }
 0x3bf   :  { %v3234_v55 = vadd.f32 %v8603_v1, %v3233_v15  ;;  %v3857_v3 = vmul.f32 %v9425_v43, %v3339_v7 }
 0x3c0   :  { %v4513_v29 = vpop.f32.mrf.mxu1 }
 0x3c1   :  { %v3340_v59 = vmax.f32 %v3234_v55, 0.0  ;;  %v3947_v40 = vadd.f32 %v3946_v36, %v3857_v3 }
 0x3c3   :  { %v3858_v37 = vmul.f32 %v8610_v25, %v3340_v59 }
 0x3c5   :  { %v3948_v22 = vadd.f32 %v3947_v40, %v3858_v37 }
 0x3ca   :  { %v3238_v27 = vpop.f32.mrf.mxu1 }
 0x3cb   :  { %v3239_v63 = vadd.f32 %v8603_v1, %v3238_v27 }
 0x3cc   :  { %v4516_v16 = vpop.f32.mrf.mxu1 }
 0x3cd   :  { %v3341_v58 = vmax.f32 %v3239_v63, 0.0  ;;  %v3909_v16 = vrot.slane %v3908_v31, 2 }
 0x3ce   :  { %v3241_v10 = vpop.f32.mrf.mxu1 }
 0x3cf   :  { %v3242_v49 = vadd.f32 %v8603_v1, %v3241_v10  ;;  %v3859_v8 = vmul.f32 %v8622_v13, %v3341_v58  ;;  %v3910_v52 = vadd.f32 %v3909_v16, %v3908_v31 }
 0x3d0   :  { %v4517_v24 = vpop.f32.mrf.mxu1 }
 0x3d1   :  { %v3342_v60 = vmax.f32 %v3242_v49, 0.0  ;;  %v3949_v50 = vadd.f32 %v3948_v22, %v3859_v8  ;;  %v3911_v19 = vrot.slane %v3910_v52, 1  ;;  %v4281_v49 = vld [vmem:[%s8958_s4 + $0x2] ss:$0 sm:$0xff] }
 0x3d3   :  { %v3860_v33 = vmul.f32 %v8670_v21, %v3342_v60  ;;  %v3912_v17 = vadd.f32 %v3911_v19, %v3910_v52 }
 0x3d5   :  { %v3950_v0 = vadd.f32 %v3949_v50, %v3860_v33 }
 0x3da   :  { %v3246_v56 = vpop.f32.mrf.mxu1 }
 0x3db   :  { %v3247_v34 = vadd.f32 %v8603_v1, %v3246_v56 }
 0x3dc   :  { %v4520_v61 = vpop.f32.mrf.mxu1 }
 0x3dd   :  { %v3343_v41 = vmax.f32 %v3247_v34, 0.0 }
 0x3de   :  { %v3249_v51 = vpop.f32.mrf.mxu1 }
 0x3df   :  { %v3250_v20 = vadd.f32 %v8603_v1, %v3249_v51  ;;  %v3861_v18 = vmul.f32 %v8678_v35, %v3343_v41  ;;  %v4277_v35 = vld [vmem:[%s8958_s4] ss:$0 sm:$0xff]  ;;  %v4026_v51 = vpack.c.bf16 %v3912_v17, %v3912_v17 }
 0x3e0   :  { %v4521_v54 = vpop.f32.mrf.mxu1 }
 0x3e1   :  { %v3344_v44 = vmax.f32 %v3250_v20, 0.0  ;;  %v3951_v15 = vadd.f32 %v3950_v0, %v3861_v18  ;;  %v4051_v38 = vunpack.c.l.b16 %v4026_v51 }
 0x3e3   :  { %v3862_v62 = vmul.f32 %v8717_v42, %v3344_v44 }
 0x3e5   :  { %v3952_v10 = vadd.f32 %v3951_v15, %v3862_v62 }
 0x3ea   :  { %v3254_v30 = vpop.f32.mrf.mxu1 }
 0x3eb   :  { %v3255_v5 = vadd.f32 %v8603_v1, %v3254_v30 }
 0x3ec   :  { %v4524_v25 = vpop.f32.mrf.mxu1 }
 0x3ed   :  { %v3345_v13 = vmax.f32 %v3255_v5, 0.0 }
 0x3ee   :  { %v3257_v39 = vpop.f32.mrf.mxu1 }
 0x3ef   :  { %v3863_v29 = vmul.f32 %v8725_v47, %v3345_v13  ;;  %v3258_v21 = vadd.f32 %v8603_v1, %v3257_v39 }
 0x3f0   :  { %v4525_v27 = vpop.f32.mrf.mxu1 }
 0x3f1   :  { %v3346_v24 = vmax.f32 %v3258_v21, 0.0  ;;  %v3953_v48 = vadd.f32 %v3952_v10, %v3863_v29 }
 0x3f2   :  { %v4020_v46 = vpop.f32.mrf.mxu1 }
 0x3f3   :  { %v3864_v23 = vmul.f32 %v8761_v14, %v3346_v24  ;;  %v4021_v42 = vadd.f32 %v4277_v35, %v4020_v46 }
 0x3f4   :  { %v4532_v57 = vpop.f32.mrf.mxu1 }
 0x3f5   :  { %v3954_v9 = vadd.f32 %v3953_v48, %v3864_v23  ;;  %v4145_v4 = vmul.f32 %v4021_v42, %v4021_v42 }
 0x3f6   :  { %v4023_v47 = vpop.f32.mrf.mxu1 }
 0x3f7   :  { %v3955_v56 = vrot.slane %v3954_v9, 4  ;;  %v4146_v1 = vsel %vm9426_vm7, %v4145_v4, 0.0 }
 0x3f8   :  { %4147 = vadd.xlane.f32.xlu0 %v4146_v1  ;;  %v4533_v2 = vpop.f32.mrf.mxu1 }
 0x3f9   :  { %v3956_v6 = vadd.f32 %v3955_v56, %v3954_v9 }
 0x3fb   :  { %v3957_v61 = vrot.slane %v3956_v6, 2 }
 0x3fd   :  { %v3958_v26 = vadd.f32 %v3957_v61, %v3956_v6 }
 0x3ff   :  { %v3959_v55 = vrot.slane %v3958_v26, 1 }
 0x401   :  { %v3960_v53 = vadd.f32 %v3959_v55, %v3958_v26 }
 0x403   :  { %v4027_v14 = vpack.c.bf16 %v3960_v53, %v3960_v53 }
 0x405   :  { %v4052_v12 = vunpack.c.l.b16 %v4027_v14 }
 0x407   :  { %v4054_v7 = vsel %vm4053_vm11, %v4052_v12, %v4051_v38 }
 0x408   :  { %v4055_v63 = vpack.c.b16 %v4054_v7, %v4054_v7 }
 0x40a   :  { %4551 = vmatmul.mubr.bf16.vlgmr.msra.gmra.mxu1 %v4055_v63 }
 0x481   :  { %v4148_v54 = vpop.xlane.xlu0 %4147 }
 0x482   :  { %v4149_v28 = vmax.f32 %v4148_v54, 1e-24 }
 0x484   :  { %4639 = vrsqrt.f32 %v4149_v28 }
 0x491   :  { %v4640_v32 = vpop.eup %4639 }
 0x492   :  { %v4151_v59 = vmul.f32 %v4640_v32, %v4021_v42 }
 0x494   :  { %4159 = vst [vmem:[#allocation2] sm:$0x3] %v4151_v59 }
 0x4ca   :  { %v4139_v11 = vpop.f32.mrf.mxu1 }
 0x4cb   :  { %v4140_v43 = vadd.f32 %v4281_v49, %v4139_v11 }
 0x4cc   :  { %v4552_v3 = vpop.f32.mrf.mxu1 }
 0x4cd   :  { %v4152_v58 = vmul.f32 %v4140_v43, %v4140_v43 }
 0x4ce   :  { %v4142_v34 = vpop.f32.mrf.mxu1 }
 0x4cf   :  { %v4153_v36 = vsel %vm9427_vm12, %v4152_v58, 0.0 }
 0x4d0   :  { %4154 = vadd.xlane.f32.xlu1 %v4153_v36  ;;  %v4553_v37 = vpop.f32.mrf.mxu1 }
 0x559   :  { %v4155_v60 = vpop.xlane.xlu1 %4154 }
 0x55a   :  { %v4156_v20 = vmax.f32 %v4155_v60, 1e-24 }
 0x55c   :  { %4641 = vrsqrt.f32 %v4156_v20 }
 0x569   :  { %v4642_v40 = vpop.eup %4641 }
 0x56a   :  { %v4158_v8 = vmul.f32 %v4642_v40, %v4140_v43 }
 0x56c   :  { %4160 = vst [vmem:[#allocation2 + $0x2] sm:$0x3] %v4158_v8 }
 0x56d   :  { %4689 = shalt.err (!%p4686_p4)
}
 0x56e   :  { %4170 = dma.vmem_to_hbm [thread:$0]  %s4168_s17, 64, %s8959_s5, [#allocation3]  }
 0x56f   :  { %4698 = dma.done.wait [#allocation3], 64  }
 0x570   :  { %4699 = vsyncadd [#allocation3], 4294967232 }
 0x571   :  { %4174 = vsyncpa [#allocation3], 1 }

</bundles_post_ra>
